<compile_context>
chip_gen: v7x
topology: tpu7x:2x2x1
jax: 0.10.0
libtpu: 0.0.40
codegen_flags: <defaults>
</compile_context>

<pallas_src>
import functools

import jax
import jax.numpy as jnp
from jax.experimental import pallas as pl
from jax.experimental.pallas import tpu as pltpu

# Make the pure-JAX reference use full f32 matmuls so the tolerance check is
# meaningful (the Pallas kernel accumulates in f32 on the MXU).
jax.config.update("jax_default_matmul_precision", "highest")


def _transform_ctrnn_kernel(t_blk, num_steps, alpha, coeff,
                            # inputs
                            x_ref, w_inT_ref, b_in_ref, w_hhT_ref, b_hh_ref,
                            transT_ref, tile_ref, sum_ref, eye_ref,
                            # outputs
                            rnn_out_ref, h_final_ref,
                            # scratch (path-dependent, see wrapper)
                            *scratch):
    coeff_is_one = (coeff == 1.0)
    alpha_is_one = (alpha == 1.0)
    if coeff_is_one:
        (h_scr,) = scratch
    else:
        h_scr, th_scr, tm_scr, ipt_scr = scratch
    B, H = h_scr.shape

    @pl.when(pl.program_id(0) == 0)
    def _init():
        h_scr[...] = jnp.zeros_like(h_scr)
        if not coeff_is_one:
            # transform_hidden starts as the identity (flattened row-major).
            th_scr[...] = jnp.broadcast_to(eye_ref[...], th_scr.shape)

    # ---- Phase 1: recurrence-independent batched MXU work -------------------
    w_inT = w_inT_ref[...]
    sum_m = sum_ref[...]

    # (t_blk*B, I) @ (I, H) -> (t_blk*B, H)
    ip_all = jnp.dot(x_ref[...], w_inT,
                     preferred_element_type=jnp.float32) + b_in_ref[...]
    # (t_blk*B, H) @ (H, H*H) -> flat transform matrices, row-major (i*H + j).
    tm_all = jnp.dot(ip_all, transT_ref[...],
                     preferred_element_type=jnp.float32)
    # Lane-tiled input projection: ipt_all[n, i*H + j] == ip_all[n, j].
    ipt_all = jnp.dot(ip_all, tile_ref[...],
                      preferred_element_type=jnp.float32)

    if coeff_is_one:
        # transform_hidden == transform_matrix on every (inner) step, so the
        # transformed input is fully recurrence-independent -> hoist it all:
        # ti_all[n, i] = sum_j tm[n, i, j] * ip[n, j]
        ti_all = jnp.dot(tm_all * ipt_all, sum_m,
                         preferred_element_type=jnp.float32)   # (t_blk*B, H)
    else:
        tm_scr[...] = tm_all
        ipt_scr[...] = ipt_all

    # ---- Phase 2: serial recurrence over the t_blk time steps ---------------
    w_hhT = w_hhT_ref[...]
    b_hh = b_hh_ref[...]

    def h_update(h, ti):
        hh = jnp.dot(h, w_hhT, preferred_element_type=jnp.float32) + b_hh
        h_new = jnp.maximum(ti + hh, 0.0)
        if alpha_is_one:
            return h_new
        return h * (1.0 - alpha) + h_new * alpha

    hid = h_scr[...]
    if coeff_is_one:
        for t in range(t_blk):
            ti_t = ti_all[t * B:(t + 1) * B, :]
            for _ in range(num_steps):
                hid = h_update(hid, ti_t)
            rnn_out_ref[t] = hid.astype(rnn_out_ref.dtype)
    else:
        th = th_scr[...]
        for t in range(t_blk):
            tm_t = tm_scr[t * B:(t + 1) * B, :]
            ipt_t = ipt_scr[t * B:(t + 1) * B, :]
            for _ in range(num_steps):
                th = th * (1.0 - coeff) + tm_t * coeff
                ti = jnp.dot(th * ipt_t, sum_m,
                             preferred_element_type=jnp.float32)
                hid = h_update(hid, ti)
            rnn_out_ref[t] = hid.astype(rnn_out_ref.dtype)
        th_scr[...] = th

    h_scr[...] = hid
    h_final_ref[...] = hid.astype(h_final_ref.dtype)


def _fc_kernel(h_ref, w_fcT_ref, b_fc_ref, out_ref):
    out_ref[...] = (jnp.dot(h_ref[...], w_fcT_ref[...],
                            preferred_element_type=jnp.float32)
                    + b_fc_ref[...]).astype(out_ref.dtype)


def _pick_t_blk(seq, batch, requested, hidden):
    """Largest time block <= requested that tiles seq and keeps the flattened
    (t_blk*batch, ...) slabs sublane-aligned (rows % 8 == 0 or full array)."""
    cands = [d for d in range(1, seq + 1)
             if seq % d == 0 and ((d * batch) % 8 == 0 or d == seq)]
    budget = 8 * 1024 * 1024  # soft cap on the two (t_blk*B, H*H) f32 scratch slabs
    ok = [d for d in cands if 2 * d * batch * hidden * hidden * 4 <= budget]
    ok = ok or [min(cands)]
    le = [d for d in ok if d <= requested]
    return max(le) if le else min(ok)


def transform_rnn_net(x, params, alpha, transform_increment_coeff,
                      num_steps=1, t_blk=8):
    """x: (seq, B, I) float32.  Returns (out, rnn_output, hidden)."""
    seq, B, I = x.shape
    H = params["w_hh"].shape[0]
    O = params["w_fc"].shape[0]
    alpha = float(alpha)
    coeff = float(transform_increment_coeff)
    num_steps = int(num_steps)

    t_blk = _pick_t_blk(seq, B, int(t_blk), H)
    TB = t_blk * B
    f32 = jnp.float32

    # Pre-transposed weights: every in-kernel dot is plain row-major 2-D.
    w_inT = jnp.asarray(params["w_in"], f32).T            # (I, H)
    w_hhT = jnp.asarray(params["w_hh"], f32).T            # (H, H)
    transT = jnp.asarray(params["transform"], f32).T      # (H, H*H)
    w_fcT = jnp.asarray(params["w_fc"], f32).T            # (H, O)
    b_in = jnp.asarray(params["b_in"], f32).reshape(1, H)
    b_hh = jnp.asarray(params["b_hh"], f32).reshape(1, H)
    b_fc = jnp.asarray(params["b_fc"], f32).reshape(1, O)

    eye = jnp.eye(H, dtype=f32)
    # tile_mat[j, i*H + j] = 1  : ip (.., H) @ tile_mat -> ip repeated per row-chunk
    tile_mat = jnp.tile(eye, (1, H))                      # (H, H*H)
    # sum_mat[i*H + j, i] = 1   : segmented sum over each H-wide row-chunk
    sum_mat = jnp.repeat(eye, H, axis=0)                  # (H*H, H)
    eye_flat = eye.reshape(1, H * H)                      # identity, flattened

    # Flatten (seq, B) -> rows so the kernel only ever sees 2-D slabs (free
    # XLA reshape outside the kernel; no in-kernel reshapes needed).
    x2d = jnp.asarray(x, f32).reshape(seq * B, I)

    kernel = functools.partial(_transform_ctrnn_kernel, t_blk, num_steps,
                               alpha, coeff)

    # Whole-array VMEM residents for the constant weights: single copy, no
    # per-grid-step DMA or double buffering.
    def resident():
        return pl.BlockSpec(memory_space=pltpu.MemorySpace.VMEM)

    if coeff == 1.0:
        scratch = (pltpu.VMEM((B, H), f32),)              # hidden carry
    else:
        scratch = (pltpu.VMEM((B, H), f32),               # hidden carry
                   pltpu.VMEM((B, H * H), f32),           # transform_hidden (flat)
                   pltpu.VMEM((TB, H * H), f32),          # transform matrices (flat)
                   pltpu.VMEM((TB, H * H), f32))          # lane-tiled input proj

    grid_spec = pltpu.PrefetchScalarGridSpec(
        num_scalar_prefetch=0,
        grid=(seq // t_blk,),
        in_specs=[
            pl.BlockSpec((TB, I), lambda s: (s, 0)),      # x time block (rows)
            resident(),                                   # w_inT
            resident(),                                   # b_in
            resident(),                                   # w_hhT
            resident(),                                   # b_hh
            resident(),                                   # transT
            resident(),                                   # tile_mat
            resident(),                                   # sum_mat
            resident(),                                   # eye_flat
        ],
        out_specs=(
            pl.BlockSpec((t_blk, B, H), lambda s: (s, 0, 0)),   # rnn_output
            pl.BlockSpec((B, H), lambda s: (0, 0)),             # final hidden
        ),
        scratch_shapes=scratch,
    )

    rnn_out, hidden = pl.pallas_call(
        kernel,
        grid_spec=grid_spec,
        out_shape=(
            jax.ShapeDtypeStruct((seq, B, H), f32),
            jax.ShapeDtypeStruct((B, H), f32),
        ),
        compiler_params=pltpu.CompilerParams(
            dimension_semantics=("arbitrary",)),   # time is a true recurrence
    )(x2d, w_inT, b_in, w_hhT, b_hh, transT, tile_mat, sum_mat, eye_flat)

    # fc head: one batched matmul over the whole sequence, off the serial path.
    out = pl.pallas_call(
        _fc_kernel,
        out_shape=jax.ShapeDtypeStruct((seq * B, O), f32),
    )(rnn_out.reshape(seq * B, H), w_fcT, b_fc).reshape(seq, B, O)

    return out, rnn_out, hidden


def reference_forward(x, params, alpha, coeff, num_steps=1):
    """Pure-JAX reference mirroring the PyTorch forward."""
    seq, B, _ = x.shape
    H = params["w_hh"].shape[0]
    h = jnp.zeros((B, H), jnp.float32)
    th = jnp.broadcast_to(jnp.eye(H, dtype=jnp.float32)[None], (B, H, H))
    outs = []
    for t in range(seq):
        for _ in range(num_steps):
            ip = x[t] @ params["w_in"].T + params["b_in"]
            tm = (ip @ params["transform"].T).reshape(B, H, H)
            th = th * (1.0 - coeff) + tm * coeff
            ti = jnp.sum(th * ip[:, None, :], axis=-1)
            hn = jax.nn.relu(ti + h @ params["w_hh"].T + params["b_hh"])
            h = h * (1.0 - alpha) + hn * alpha
        outs.append(h)
    rnn_out = jnp.stack(outs, 0)
    out = rnn_out @ params["w_fc"].T + params["b_fc"]
    return out, rnn_out, h


def init_params(key, input_size, hidden_size, output_size):
    ks = jax.random.split(key, 7)
    s_in = 1.0 / jnp.sqrt(input_size)
    s_h = 1.0 / jnp.sqrt(hidden_size)
    return {
        "w_in": jax.random.uniform(ks[0], (hidden_size, input_size),
                                   jnp.float32, -s_in, s_in),
        "b_in": jax.random.uniform(ks[1], (hidden_size,),
                                   jnp.float32, -s_in, s_in),
        "w_hh": jax.random.uniform(ks[2], (hidden_size, hidden_size),
                                   jnp.float32, -s_h, s_h),
        "b_hh": jax.random.uniform(ks[3], (hidden_size,),
                                   jnp.float32, -s_h, s_h),
        # nn.Parameter(torch.randn(H*H, H)) -> standard normal
        "transform": jax.random.normal(ks[4], (hidden_size * hidden_size,
                                               hidden_size), jnp.float32),
        "w_fc": jax.random.uniform(ks[5], (output_size, hidden_size),
                                   jnp.float32, -s_h, s_h),
        "b_fc": jax.random.uniform(ks[6], (output_size,),
                                   jnp.float32, -s_h, s_h),
    }


if __name__ == "__main__":
    input_size, hidden_size, output_size = 4, 32, 8
    seq_len, batch = 16, 2   # seq=16, t_blk=8 -> grid of 2, carries exercised

    key = jax.random.PRNGKey(0)
    k_param, k_x = jax.random.split(key)
    params = init_params(k_param, input_size, hidden_size, output_size)
    x = jax.random.normal(k_x, (seq_len, batch, input_size), jnp.float32)

    # dt=None configuration: alpha = coeff = 1.0 (fully hoisted fast path).
    out, rnn_out, hidden = transform_rnn_net(x, params, 1.0, 1.0, num_steps=1)
    jax.block_until_ready((out, rnn_out, hidden))
    r_out, r_rnn, r_h = reference_forward(x, params, 1.0, 1.0, num_steps=1)
    assert jnp.allclose(out, r_out, atol=1e-3, rtol=1e-3), "out mismatch"
    assert jnp.allclose(rnn_out, r_rnn, atol=1e-3, rtol=1e-3), "rnn_out mismatch"
    assert jnp.allclose(hidden, r_h, atol=1e-3, rtol=1e-3), "hidden mismatch"

    # dt=20 configuration (alpha = coeff = 0.2) with num_steps=2: exercises the
    # general transform_hidden blend path.
    out2, rnn2, h2 = transform_rnn_net(x, params, 0.2, 0.2, num_steps=2)
    jax.block_until_ready((out2, rnn2, h2))
    r_out2, r_rnn2, r_h2 = reference_forward(x, params, 0.2, 0.2, num_steps=2)
    assert jnp.allclose(out2, r_out2, atol=1e-3, rtol=1e-3), "out mismatch (general)"
    assert jnp.allclose(rnn2, r_rnn2, atol=1e-3, rtol=1e-3), "rnn_out mismatch (general)"
    assert jnp.allclose(h2, r_h2, atol=1e-3, rtol=1e-3), "hidden mismatch (general)"

    print("KERNEL_OK")
</pallas_src>

<mosaic_0001>
module attributes {stable_mosaic.version = 11 : i64} {
  func.func @_transform_ctrnn_kernel(%arg0: i32, %arg1: memref<16x4xf32, #tpu.memory_space<vmem>>, %arg2: memref<4x32xf32, #tpu.memory_space<vmem>>, %arg3: memref<1x32xf32, #tpu.memory_space<vmem>>, %arg4: memref<32x32xf32, #tpu.memory_space<vmem>>, %arg5: memref<1x32xf32, #tpu.memory_space<vmem>>, %arg6: memref<32x1024xf32, #tpu.memory_space<vmem>>, %arg7: memref<32x1024xf32, #tpu.memory_space<vmem>>, %arg8: memref<1024x32xf32, #tpu.memory_space<vmem>>, %arg9: memref<1x1024xf32, #tpu.memory_space<vmem>>, %arg10: memref<8x2x32xf32, #tpu.memory_space<vmem>>, %arg11: memref<2x32xf32, #tpu.memory_space<vmem>>, %arg12: memref<2x32xf32, #tpu.memory_space<vmem>>) attributes {dimension_semantics = [#tpu.dimension_semantics<arbitrary>], iteration_bounds = array<i64: 2>, scalar_prefetch = 0 : i64, scratch_operands = 1 : i64, tpu.core_type = #tpu.core_type<tc>, window_params = [{transform_indices = @transform_0, window_bounds = array<i64: 16, 4>}, {pipeline_mode = #tpu.pipeline_mode<synchronous>, transform_indices = @transform_1, window_bounds = array<i64: 4, 32>}, {pipeline_mode = #tpu.pipeline_mode<synchronous>, transform_indices = @transform_2, window_bounds = array<i64: 1, 32>}, {pipeline_mode = #tpu.pipeline_mode<synchronous>, transform_indices = @transform_3, window_bounds = array<i64: 32, 32>}, {pipeline_mode = #tpu.pipeline_mode<synchronous>, transform_indices = @transform_4, window_bounds = array<i64: 1, 32>}, {pipeline_mode = #tpu.pipeline_mode<synchronous>, transform_indices = @transform_5, window_bounds = array<i64: 32, 1024>}, {pipeline_mode = #tpu.pipeline_mode<synchronous>, transform_indices = @transform_6, window_bounds = array<i64: 32, 1024>}, {pipeline_mode = #tpu.pipeline_mode<synchronous>, transform_indices = @transform_7, window_bounds = array<i64: 1024, 32>}, {pipeline_mode = #tpu.pipeline_mode<synchronous>, transform_indices = @transform_8, window_bounds = array<i64: 1, 1024>}, {transform_indices = @transform_9, window_bounds = array<i64: 8, 2, 32>}, {pipeline_mode = #tpu.pipeline_mode<synchronous>, transform_indices = @transform_10, window_bounds = array<i64: 2, 32>}]} {
    %c0_i32 = arith.constant 0 : i32
    %0 = arith.cmpi eq, %arg0, %c0_i32 : i32
    %1 = arith.extui %0 : i1 to i32
    %c0_i32_0 = arith.constant 0 : i32
    %2 = arith.cmpi ne, %1, %c0_i32_0 : i32
    scf.if %2 {
      %cst_58 = arith.constant 0.000000e+00 : f32
      %101 = vector.broadcast %cst_58 : f32 to vector<2x32xf32>
      %c0_59 = arith.constant 0 : index
      %c0_60 = arith.constant 0 : index
      %102 = vector.load %arg12[%c0_59, %c0_60] : memref<2x32xf32, #tpu.memory_space<vmem>>, vector<2x32xf32>
      tpu.vector_store %arg12[%c0_59, %c0_60], %101 {strides = array<i32>} : memref<2x32xf32, #tpu.memory_space<vmem>>, vector<2x32xf32>,
    } else {
    }
    %c0 = arith.constant 0 : index
    %c0_1 = arith.constant 0 : index
    %3 = vector.load %arg2[%c0, %c0_1] : memref<4x32xf32, #tpu.memory_space<vmem>>, vector<4x32xf32>
    %c0_2 = arith.constant 0 : index
    %c0_3 = arith.constant 0 : index
    %4 = vector.load %arg8[%c0_2, %c0_3] : memref<1024x32xf32, #tpu.memory_space<vmem>>, vector<1024x32xf32>
    %c0_4 = arith.constant 0 : index
    %c0_5 = arith.constant 0 : index
    %5 = vector.load %arg1[%c0_4, %c0_5] : memref<16x4xf32, #tpu.memory_space<vmem>>, vector<16x4xf32>
    %cst = arith.constant dense<0.000000e+00> : vector<16x32xf32>
    %6 = tpu.matmul %5, %3, %cst {dimension_numbers = #tpu.dot_dimension_numbers<[1], [0], [0], [1], [0, 0, 1, 1], [], []>, precision = #tpu.contract_precision<fp32>} : vector<16x4xf32>, vector<4x32xf32>, vector<16x32xf32> -> vector<16x32xf32>
    %c0_6 = arith.constant 0 : index
    %c0_7 = arith.constant 0 : index
    %7 = vector.load %arg3[%c0_6, %c0_7] : memref<1x32xf32, #tpu.memory_space<vmem>>, vector<1x32xf32>
    %8 = vector.broadcast %7 : vector<1x32xf32> to vector<16x32xf32>
    %9 = arith.addf %6, %8 : vector<16x32xf32>
    %c0_8 = arith.constant 0 : index
    %c0_9 = arith.constant 0 : index
    %10 = vector.load %arg6[%c0_8, %c0_9] : memref<32x1024xf32, #tpu.memory_space<vmem>>, vector<32x1024xf32>
    %cst_10 = arith.constant dense<0.000000e+00> : vector<16x1024xf32>
    %11 = tpu.matmul %9, %10, %cst_10 {dimension_numbers = #tpu.dot_dimension_numbers<[1], [0], [0], [1], [0, 0, 1, 1], [], []>, precision = #tpu.contract_precision<fp32>} : vector<16x32xf32>, vector<32x1024xf32>, vector<16x1024xf32> -> vector<16x1024xf32>
    %c0_11 = arith.constant 0 : index
    %c0_12 = arith.constant 0 : index
    %12 = vector.load %arg7[%c0_11, %c0_12] : memref<32x1024xf32, #tpu.memory_space<vmem>>, vector<32x1024xf32>
    %cst_13 = arith.constant dense<0.000000e+00> : vector<16x1024xf32>
    %13 = tpu.matmul %9, %12, %cst_13 {dimension_numbers = #tpu.dot_dimension_numbers<[1], [0], [0], [1], [0, 0, 1, 1], [], []>, precision = #tpu.contract_precision<fp32>} : vector<16x32xf32>, vector<32x1024xf32>, vector<16x1024xf32> -> vector<16x1024xf32>
    %14 = arith.mulf %11, %13 : vector<16x1024xf32>
    %cst_14 = arith.constant dense<0.000000e+00> : vector<16x32xf32>
    %15 = tpu.matmul %14, %4, %cst_14 {dimension_numbers = #tpu.dot_dimension_numbers<[1], [0], [0], [1], [0, 0, 1, 1], [], []>, precision = #tpu.contract_precision<fp32>} : vector<16x1024xf32>, vector<1024x32xf32>, vector<16x32xf32> -> vector<16x32xf32>
    %c0_15 = arith.constant 0 : index
    %c0_16 = arith.constant 0 : index
    %16 = vector.load %arg4[%c0_15, %c0_16] : memref<32x32xf32, #tpu.memory_space<vmem>>, vector<32x32xf32>
    %c0_17 = arith.constant 0 : index
    %c0_18 = arith.constant 0 : index
    %17 = vector.load %arg5[%c0_17, %c0_18] : memref<1x32xf32, #tpu.memory_space<vmem>>, vector<1x32xf32>
    %c0_19 = arith.constant 0 : index
    %c0_20 = arith.constant 0 : index
    %18 = vector.load %arg12[%c0_19, %c0_20] : memref<2x32xf32, #tpu.memory_space<vmem>>, vector<2x32xf32>
    %19 = vector.extract_strided_slice %15 {offsets = [0, 0], sizes = [2, 32], strides = [1, 1]} : vector<16x32xf32> to vector<2x32xf32>
    %cst_21 = arith.constant dense<0.000000e+00> : vector<2x32xf32>
    %20 = tpu.matmul %18, %16, %cst_21 {dimension_numbers = #tpu.dot_dimension_numbers<[1], [0], [0], [1], [0, 0, 1, 1], [], []>, precision = #tpu.contract_precision<fp32>} : vector<2x32xf32>, vector<32x32xf32>, vector<2x32xf32> -> vector<2x32xf32>
    %21 = vector.broadcast %17 : vector<1x32xf32> to vector<2x32xf32>
    %22 = arith.addf %20, %21 : vector<2x32xf32>
    %23 = arith.addf %19, %22 : vector<2x32xf32>
    %cst_22 = arith.constant 0.000000e+00 : f32
    %24 = vector.broadcast %cst_22 : f32 to vector<2x32xf32>
    %25 = arith.maximumf %23, %24 : vector<2x32xf32>
    %c0_23 = arith.constant 0 : index
    %c0_24 = arith.constant 0 : index
    %c0_25 = arith.constant 0 : index
    %26 = vector.load %arg10[%c0_23, %c0_24, %c0_25] : memref<8x2x32xf32, #tpu.memory_space<vmem>>, vector<1x2x32xf32>
    %27 = vector.shape_cast %26 : vector<1x2x32xf32> to vector<2x32xf32>
    %28 = vector.shape_cast %25 : vector<2x32xf32> to vector<1x2x32xf32>
    tpu.vector_store %arg10[%c0_23, %c0_24, %c0_25], %28 {strides = array<i32>} : memref<8x2x32xf32, #tpu.memory_space<vmem>>, vector<1x2x32xf32>,
    %29 = vector.extract_strided_slice %15 {offsets = [2, 0], sizes = [2, 32], strides = [1, 1]} : vector<16x32xf32> to vector<2x32xf32>
    %cst_26 = arith.constant dense<0.000000e+00> : vector<2x32xf32>
    %30 = tpu.matmul %25, %16, %cst_26 {dimension_numbers = #tpu.dot_dimension_numbers<[1], [0], [0], [1], [0, 0, 1, 1], [], []>, precision = #tpu.contract_precision<fp32>} : vector<2x32xf32>, vector<32x32xf32>, vector<2x32xf32> -> vector<2x32xf32>
    %31 = vector.broadcast %17 : vector<1x32xf32> to vector<2x32xf32>
    %32 = arith.addf %30, %31 : vector<2x32xf32>
    %33 = arith.addf %29, %32 : vector<2x32xf32>
    %cst_27 = arith.constant 0.000000e+00 : f32
    %34 = vector.broadcast %cst_27 : f32 to vector<2x32xf32>
    %35 = arith.maximumf %33, %34 : vector<2x32xf32>
    %c1 = arith.constant 1 : index
    %c0_28 = arith.constant 0 : index
    %c0_29 = arith.constant 0 : index
    %36 = vector.load %arg10[%c1, %c0_28, %c0_29] : memref<8x2x32xf32, #tpu.memory_space<vmem>>, vector<1x2x32xf32>
    %37 = vector.shape_cast %36 : vector<1x2x32xf32> to vector<2x32xf32>
    %38 = vector.shape_cast %35 : vector<2x32xf32> to vector<1x2x32xf32>
    tpu.vector_store %arg10[%c1, %c0_28, %c0_29], %38 {strides = array<i32>} : memref<8x2x32xf32, #tpu.memory_space<vmem>>, vector<1x2x32xf32>,
    %39 = vector.extract_strided_slice %15 {offsets = [4, 0], sizes = [2, 32], strides = [1, 1]} : vector<16x32xf32> to vector<2x32xf32>
    %cst_30 = arith.constant dense<0.000000e+00> : vector<2x32xf32>
    %40 = tpu.matmul %35, %16, %cst_30 {dimension_numbers = #tpu.dot_dimension_numbers<[1], [0], [0], [1], [0, 0, 1, 1], [], []>, precision = #tpu.contract_precision<fp32>} : vector<2x32xf32>, vector<32x32xf32>, vector<2x32xf32> -> vector<2x32xf32>
    %41 = vector.broadcast %17 : vector<1x32xf32> to vector<2x32xf32>
    %42 = arith.addf %40, %41 : vector<2x32xf32>
    %43 = arith.addf %39, %42 : vector<2x32xf32>
    %cst_31 = arith.constant 0.000000e+00 : f32
    %44 = vector.broadcast %cst_31 : f32 to vector<2x32xf32>
    %45 = arith.maximumf %43, %44 : vector<2x32xf32>
    %c2 = arith.constant 2 : index
    %c0_32 = arith.constant 0 : index
    %c0_33 = arith.constant 0 : index
    %46 = vector.load %arg10[%c2, %c0_32, %c0_33] : memref<8x2x32xf32, #tpu.memory_space<vmem>>, vector<1x2x32xf32>
    %47 = vector.shape_cast %46 : vector<1x2x32xf32> to vector<2x32xf32>
    %48 = vector.shape_cast %45 : vector<2x32xf32> to vector<1x2x32xf32>
    tpu.vector_store %arg10[%c2, %c0_32, %c0_33], %48 {strides = array<i32>} : memref<8x2x32xf32, #tpu.memory_space<vmem>>, vector<1x2x32xf32>,
    %49 = vector.extract_strided_slice %15 {offsets = [6, 0], sizes = [2, 32], strides = [1, 1]} : vector<16x32xf32> to vector<2x32xf32>
    %cst_34 = arith.constant dense<0.000000e+00> : vector<2x32xf32>
    %50 = tpu.matmul %45, %16, %cst_34 {dimension_numbers = #tpu.dot_dimension_numbers<[1], [0], [0], [1], [0, 0, 1, 1], [], []>, precision = #tpu.contract_precision<fp32>} : vector<2x32xf32>, vector<32x32xf32>, vector<2x32xf32> -> vector<2x32xf32>
    %51 = vector.broadcast %17 : vector<1x32xf32> to vector<2x32xf32>
    %52 = arith.addf %50, %51 : vector<2x32xf32>
    %53 = arith.addf %49, %52 : vector<2x32xf32>
    %cst_35 = arith.constant 0.000000e+00 : f32
    %54 = vector.broadcast %cst_35 : f32 to vector<2x32xf32>
    %55 = arith.maximumf %53, %54 : vector<2x32xf32>
    %c3 = arith.constant 3 : index
    %c0_36 = arith.constant 0 : index
    %c0_37 = arith.constant 0 : index
    %56 = vector.load %arg10[%c3, %c0_36, %c0_37] : memref<8x2x32xf32, #tpu.memory_space<vmem>>, vector<1x2x32xf32>
    %57 = vector.shape_cast %56 : vector<1x2x32xf32> to vector<2x32xf32>
    %58 = vector.shape_cast %55 : vector<2x32xf32> to vector<1x2x32xf32>
    tpu.vector_store %arg10[%c3, %c0_36, %c0_37], %58 {strides = array<i32>} : memref<8x2x32xf32, #tpu.memory_space<vmem>>, vector<1x2x32xf32>,
    %59 = vector.extract_strided_slice %15 {offsets = [8, 0], sizes = [2, 32], strides = [1, 1]} : vector<16x32xf32> to vector<2x32xf32>
    %cst_38 = arith.constant dense<0.000000e+00> : vector<2x32xf32>
    %60 = tpu.matmul %55, %16, %cst_38 {dimension_numbers = #tpu.dot_dimension_numbers<[1], [0], [0], [1], [0, 0, 1, 1], [], []>, precision = #tpu.contract_precision<fp32>} : vector<2x32xf32>, vector<32x32xf32>, vector<2x32xf32> -> vector<2x32xf32>
    %61 = vector.broadcast %17 : vector<1x32xf32> to vector<2x32xf32>
    %62 = arith.addf %60, %61 : vector<2x32xf32>
    %63 = arith.addf %59, %62 : vector<2x32xf32>
    %cst_39 = arith.constant 0.000000e+00 : f32
    %64 = vector.broadcast %cst_39 : f32 to vector<2x32xf32>
    %65 = arith.maximumf %63, %64 : vector<2x32xf32>
    %c4 = arith.constant 4 : index
    %c0_40 = arith.constant 0 : index
    %c0_41 = arith.constant 0 : index
    %66 = vector.load %arg10[%c4, %c0_40, %c0_41] : memref<8x2x32xf32, #tpu.memory_space<vmem>>, vector<1x2x32xf32>
    %67 = vector.shape_cast %66 : vector<1x2x32xf32> to vector<2x32xf32>
    %68 = vector.shape_cast %65 : vector<2x32xf32> to vector<1x2x32xf32>
    tpu.vector_store %arg10[%c4, %c0_40, %c0_41], %68 {strides = array<i32>} : memref<8x2x32xf32, #tpu.memory_space<vmem>>, vector<1x2x32xf32>,
    %69 = vector.extract_strided_slice %15 {offsets = [10, 0], sizes = [2, 32], strides = [1, 1]} : vector<16x32xf32> to vector<2x32xf32>
    %cst_42 = arith.constant dense<0.000000e+00> : vector<2x32xf32>
    %70 = tpu.matmul %65, %16, %cst_42 {dimension_numbers = #tpu.dot_dimension_numbers<[1], [0], [0], [1], [0, 0, 1, 1], [], []>, precision = #tpu.contract_precision<fp32>} : vector<2x32xf32>, vector<32x32xf32>, vector<2x32xf32> -> vector<2x32xf32>
    %71 = vector.broadcast %17 : vector<1x32xf32> to vector<2x32xf32>
    %72 = arith.addf %70, %71 : vector<2x32xf32>
    %73 = arith.addf %69, %72 : vector<2x32xf32>
    %cst_43 = arith.constant 0.000000e+00 : f32
    %74 = vector.broadcast %cst_43 : f32 to vector<2x32xf32>
    %75 = arith.maximumf %73, %74 : vector<2x32xf32>
    %c5 = arith.constant 5 : index
    %c0_44 = arith.constant 0 : index
    %c0_45 = arith.constant 0 : index
    %76 = vector.load %arg10[%c5, %c0_44, %c0_45] : memref<8x2x32xf32, #tpu.memory_space<vmem>>, vector<1x2x32xf32>
    %77 = vector.shape_cast %76 : vector<1x2x32xf32> to vector<2x32xf32>
    %78 = vector.shape_cast %75 : vector<2x32xf32> to vector<1x2x32xf32>
    tpu.vector_store %arg10[%c5, %c0_44, %c0_45], %78 {strides = array<i32>} : memref<8x2x32xf32, #tpu.memory_space<vmem>>, vector<1x2x32xf32>,
    %79 = vector.extract_strided_slice %15 {offsets = [12, 0], sizes = [2, 32], strides = [1, 1]} : vector<16x32xf32> to vector<2x32xf32>
    %cst_46 = arith.constant dense<0.000000e+00> : vector<2x32xf32>
    %80 = tpu.matmul %75, %16, %cst_46 {dimension_numbers = #tpu.dot_dimension_numbers<[1], [0], [0], [1], [0, 0, 1, 1], [], []>, precision = #tpu.contract_precision<fp32>} : vector<2x32xf32>, vector<32x32xf32>, vector<2x32xf32> -> vector<2x32xf32>
    %81 = vector.broadcast %17 : vector<1x32xf32> to vector<2x32xf32>
    %82 = arith.addf %80, %81 : vector<2x32xf32>
    %83 = arith.addf %79, %82 : vector<2x32xf32>
    %cst_47 = arith.constant 0.000000e+00 : f32
    %84 = vector.broadcast %cst_47 : f32 to vector<2x32xf32>
    %85 = arith.maximumf %83, %84 : vector<2x32xf32>
    %c6 = arith.constant 6 : index
    %c0_48 = arith.constant 0 : index
    %c0_49 = arith.constant 0 : index
    %86 = vector.load %arg10[%c6, %c0_48, %c0_49] : memref<8x2x32xf32, #tpu.memory_space<vmem>>, vector<1x2x32xf32>
    %87 = vector.shape_cast %86 : vector<1x2x32xf32> to vector<2x32xf32>
    %88 = vector.shape_cast %85 : vector<2x32xf32> to vector<1x2x32xf32>
    tpu.vector_store %arg10[%c6, %c0_48, %c0_49], %88 {strides = array<i32>} : memref<8x2x32xf32, #tpu.memory_space<vmem>>, vector<1x2x32xf32>,
    %89 = vector.extract_strided_slice %15 {offsets = [14, 0], sizes = [2, 32], strides = [1, 1]} : vector<16x32xf32> to vector<2x32xf32>
    %cst_50 = arith.constant dense<0.000000e+00> : vector<2x32xf32>
    %90 = tpu.matmul %85, %16, %cst_50 {dimension_numbers = #tpu.dot_dimension_numbers<[1], [0], [0], [1], [0, 0, 1, 1], [], []>, precision = #tpu.contract_precision<fp32>} : vector<2x32xf32>, vector<32x32xf32>, vector<2x32xf32> -> vector<2x32xf32>
    %91 = vector.broadcast %17 : vector<1x32xf32> to vector<2x32xf32>
    %92 = arith.addf %90, %91 : vector<2x32xf32>
    %93 = arith.addf %89, %92 : vector<2x32xf32>
    %cst_51 = arith.constant 0.000000e+00 : f32
    %94 = vector.broadcast %cst_51 : f32 to vector<2x32xf32>
    %95 = arith.maximumf %93, %94 : vector<2x32xf32>
    %c7 = arith.constant 7 : index
    %c0_52 = arith.constant 0 : index
    %c0_53 = arith.constant 0 : index
    %96 = vector.load %arg10[%c7, %c0_52, %c0_53] : memref<8x2x32xf32, #tpu.memory_space<vmem>>, vector<1x2x32xf32>
    %97 = vector.shape_cast %96 : vector<1x2x32xf32> to vector<2x32xf32>
    %98 = vector.shape_cast %95 : vector<2x32xf32> to vector<1x2x32xf32>
    tpu.vector_store %arg10[%c7, %c0_52, %c0_53], %98 {strides = array<i32>} : memref<8x2x32xf32, #tpu.memory_space<vmem>>, vector<1x2x32xf32>,
    %c0_54 = arith.constant 0 : index
    %c0_55 = arith.constant 0 : index
    %99 = vector.load %arg12[%c0_54, %c0_55] : memref<2x32xf32, #tpu.memory_space<vmem>>, vector<2x32xf32>
    tpu.vector_store %arg12[%c0_54, %c0_55], %95 {strides = array<i32>} : memref<2x32xf32, #tpu.memory_space<vmem>>, vector<2x32xf32>,
    %c0_56 = arith.constant 0 : index
    %c0_57 = arith.constant 0 : index
    %100 = vector.load %arg11[%c0_56, %c0_57] : memref<2x32xf32, #tpu.memory_space<vmem>>, vector<2x32xf32>
    tpu.vector_store %arg11[%c0_56, %c0_57], %95 {strides = array<i32>} : memref<2x32xf32, #tpu.memory_space<vmem>>, vector<2x32xf32>,
    return
  }
  func.func @transform_0(%arg0: i32) -> (i32, i32) {
    %c0_i32 = arith.constant 0 : i32
    %c0_i32_0 = arith.constant 0 : i32
    return %arg0, %c0_i32 : i32, i32
  }
  func.func @transform_1(%arg0: i32) -> (i32, i32) {
    %c0_i32 = arith.constant 0 : i32
    %c0_i32_0 = arith.constant 0 : i32
    %c0_i32_1 = arith.constant 0 : i32
    return %c0_i32, %c0_i32_0 : i32, i32
  }
  func.func @transform_2(%arg0: i32) -> (i32, i32) {
    %c0_i32 = arith.constant 0 : i32
    %c0_i32_0 = arith.constant 0 : i32
    %c0_i32_1 = arith.constant 0 : i32
    return %c0_i32, %c0_i32_0 : i32, i32
  }
  func.func @transform_3(%arg0: i32) -> (i32, i32) {
    %c0_i32 = arith.constant 0 : i32
    %c0_i32_0 = arith.constant 0 : i32
    %c0_i32_1 = arith.constant 0 : i32
    return %c0_i32, %c0_i32_0 : i32, i32
  }
  func.func @transform_4(%arg0: i32) -> (i32, i32) {
    %c0_i32 = arith.constant 0 : i32
    %c0_i32_0 = arith.constant 0 : i32
    %c0_i32_1 = arith.constant 0 : i32
    return %c0_i32, %c0_i32_0 : i32, i32
  }
  func.func @transform_5(%arg0: i32) -> (i32, i32) {
    %c0_i32 = arith.constant 0 : i32
    %c0_i32_0 = arith.constant 0 : i32
    %c0_i32_1 = arith.constant 0 : i32
    return %c0_i32, %c0_i32_0 : i32, i32
  }
  func.func @transform_6(%arg0: i32) -> (i32, i32) {
    %c0_i32 = arith.constant 0 : i32
    %c0_i32_0 = arith.constant 0 : i32
    %c0_i32_1 = arith.constant 0 : i32
    return %c0_i32, %c0_i32_0 : i32, i32
  }
  func.func @transform_7(%arg0: i32) -> (i32, i32) {
    %c0_i32 = arith.constant 0 : i32
    %c0_i32_0 = arith.constant 0 : i32
    %c0_i32_1 = arith.constant 0 : i32
    return %c0_i32, %c0_i32_0 : i32, i32
  }
  func.func @transform_8(%arg0: i32) -> (i32, i32) {
    %c0_i32 = arith.constant 0 : i32
    %c0_i32_0 = arith.constant 0 : i32
    %c0_i32_1 = arith.constant 0 : i32
    return %c0_i32, %c0_i32_0 : i32, i32
  }
  func.func @transform_9(%arg0: i32) -> (i32, i32, i32) {
    %c0_i32 = arith.constant 0 : i32
    %c0_i32_0 = arith.constant 0 : i32
    %c0_i32_1 = arith.constant 0 : i32
    return %arg0, %c0_i32, %c0_i32_0 : i32, i32, i32
  }
  func.func @transform_10(%arg0: i32) -> (i32, i32) {
    %c0_i32 = arith.constant 0 : i32
    %c0_i32_0 = arith.constant 0 : i32
    %c0_i32_1 = arith.constant 0 : i32
    return %c0_i32, %c0_i32_0 : i32, i32
  }
}

</mosaic_0001>

<bundles_post_ra>
// kernel: tpu_custom_call.1
= control target key start
LH: loop header
LB: loop body
LE: loop exit
PB: predicated region body
PF: predicated region fallthrough
CT: control target
= control target key end

     0   :  { %16 = vsyncpa [#allocation4], 0  ;;  %s21766_s0 = inlined_call_operand.vmem [shape: f32[32,4], index: 0, kind: input, shape index: {}]   ;;  %s21767_s1 = inlined_call_operand.vmem [shape: f32[4,32], index: 1, kind: input, shape index: {}]   ;;  %s21768_s2 = inlined_call_operand.vmem [shape: f32[1,32], index: 2, kind: input, shape index: {}]   ;;  %s21769_s3 = inlined_call_operand.vmem [shape: f32[32,32], index: 3, kind: input, shape index: {}]   ;;  %s21770_s4 = inlined_call_operand.vmem [shape: f32[1,32], index: 4, kind: input, shape index: {}]   ;;  %s21771_s5 = inlined_call_operand.vmem [shape: f32[32,1024], index: 5, kind: input, shape index: {}]   ;;  %s21772_s6 = inlined_call_operand.vmem [shape: f32[32,1024], index: 6, kind: input, shape index: {}]   ;;  %s21773_s7 = inlined_call_operand.vmem [shape: f32[1024,32], index: 7, kind: input, shape index: {}]   ;;  %s21774_s8 = inlined_call_operand.vmem [shape: f32[1,1024], index: 8, kind: input, shape index: {}]   ;;  %s21775_s9 = inlined_call_operand.hbm [shape: f32[16,2,32], index: 9, kind: output, shape index: {0}]   ;;  %s21776_s10 = inlined_call_operand.hbm [shape: f32[2,32], index: 10, kind: output, shape index: {1}]  }
   0x1   :  { %18 = vsyncpa [#allocation4 + $0x1], 0 }
   0x2   :  { %19 = vsyncpa [#allocation6], 0  ;;  %s17213_s13 = smov 0   ;;  %s17215_s14 = smov 0  }
   0x3   :  { %s17217_s15 = smov 0   ;;  %s17219_s16 = smov 0  }
   0x4 LB: > { %s17234_s8 = sadd.s32 4294967295, %s17148_s16   ;;  %s13573_s17 = sadd.s32 4294967294, %s17148_s16   ;;  %s17148_s16 = sphi %s17219_s16, %s22405_s16   ;;  %s17144_s15 = sphi %s17217_s15, %s22404_s15   ;;  %s17140_s14 = sphi %s17215_s14, %s22403_s14   ;;  %s17136_s13 = sphi %s17213_s13, %s22402_s13  }
   0x5   : > { %s17238_s18 = sadd.s32 1, %s17148_s16   ;;  %s226_s19 = sadd.s32 1, %s17144_s15 }
   0x6   : > { %s223_s20 = ssub.s32 %s17148_s16, %s17238_s18  ;;  %p236_p0 = scmp.ne.s32.totalorder %s17144_s15, %s17140_s14 }
   0x7   : > { %p224_p1 = scmp.eq.s32.totalorder %s223_s20, 0  ;;  %p237_p2 = scmp.eq.s32.totalorder %s17234_s8, 1 }
   0x8   : > { %p242_p3 = scmp.ne.s32.totalorder %s17140_s14, %s17136_s13  ;;  %p243_p4 = scmp.eq.s32.totalorder %s13573_s17, 1 }
   0x9   : > { %s17249_s21 = scalar_select %p224_p1, %s17144_s15, %s226_s19  }
   0xa   : > { %p17253_p5 = por %p237_p2, %p236_p0  ;;  %p17257_p6 = por %p243_p4, %p242_p3 }
   0xb   : > { %p13576_p7 = scmp.ge.s32.totalorder %s17148_s16, 1  ;;  %p315_p8 = scmp.lt.s32.totalorder %s17148_s16, 3 }
   0xd   : > { %p316_p9 = pnand %p13576_p7, %p315_p8 }
   0xf   : > { %319 = sbr.rel (%p316_p9) target bundleno = 3237 (0xca5), region = 56 }
  0x16   : > { %s348_s24 = sand.u32 1, %s17140_s14   ;;  %s13578_s25 = sshll.u32 %s17234_s8, 1 }
  0x17   : > { %s13577_s26 = sshll.u32 %s348_s24, 4  ;;  %p354_p10 = scmp.lt.s32.totalorder %s13578_s25, 3 }
  0x18   : > { %s17270_s11 = scalar_lea.vmem [#allocation3], %s13577_s26  ;;  %p13580_p11 = scmp.ne.s32.totalorder %s17234_s8, 0 }
  0x19   : > { %s22407_s25 = smov (!%p354_p10, %s13578_s25), 3  ;;  %vm364_vm0 = vcmask (!%p13580_p11), 254976   ;;  %v17150_v0 = vmov (!%p13580_p11), 0.0  }
  0x1a   : > { %s13579_s27 = sshll.u32 %s22407_s25, 3  ;;  %363 = sbr.rel (%p13580_p11) target bundleno = 33 (0x21), region = 60  ;;  %365 = vst.msk [vmem:[#allocation2] sm:$0x3] (!%p13580_p11), %vm364_vm0, %v17150_v0 }
  0x1b   : > { %s357_s30 = scalar_lea.vmem %s21766_s0, %s13579_s27 }
  0x21 PF: > { %v366_v1 = vld [vmem:[%s21767_s1] sm:$0xf]  ;;  %vm511_vm1 = vcmask 1043456   ;;  %vm504_vm2 = vcmask 31744   ;;  %v496_v3 = vld [vmem:[%s357_s30 + $0x8] sm:$0xff]  ;;  %v17279_v22 = vld [vmem:[%s21771_s5 + $0x18] sm:$0xff] }
  0x22   : > { %v495_v2 = vld [vmem:[%s357_s30] sm:$0xff]  ;;  %v513_v4 = vsel %vm511_vm1, %v366_v1, 0  ;;  %v509_v6 = vsel %vm504_vm2, %v496_v3, 0  ;;  %v17284_v23 = vld [vmem:[%s21771_s5 + $0x58] sm:$0xff]  ;;  %v1635_v24 = vand.u32 4294901760, %v17279_v22  ;;  %v17309_v35 = vld [vmem:[%s21771_s5 + $0x10] sm:$0xff] }
  0x23   : > { %v506_v5 = vsel %vm504_vm2, %v495_v2, 0  ;;  %v516_v7 = vand.u32 4294901760, %v513_v4  ;;  %v591_v9 = vand.u32 4294901760, %v509_v6  ;;  %v1639_v25 = vand.u32 4294901760, %v17284_v23  ;;  %v17314_v36 = vld [vmem:[%s21771_s5 + $0x50] sm:$0xff]  ;;  %v17331_v41 = vld [vmem:[%s21771_s5 + $0x98] sm:$0xff] }
  0x24   : > { %v581_v8 = vand.u32 4294901760, %v506_v5  ;;  %v17291_v26 = vsub.f32 %v17279_v22, %v1635_v24  ;;  %v1637_v37 = vand.u32 4294901760, %v17309_v35  ;;  %v1641_v38 = vand.u32 4294901760, %v17314_v36  ;;  %v17336_v42 = vld [vmem:[%s21771_s5 + $0xd8] sm:$0xff]  ;;  %v17343_v45 = vld [vmem:[%s21771_s5 + $0x90] sm:$0xff]  ;;  %s13597_s29 = sshll.u32 %s17234_s8, 8 }
  0x25   : > { %v603_v10 = vsub.f32 %v513_v4, %v516_v7  ;;  %v592_v12 = vsub.f32 %v509_v6, %v591_v9  ;;  %14768 = vmatprep.subr.mxu1 %v516_v7  ;;  %v17296_v27 = vsub.f32 %v17284_v23, %v1639_v25  ;;  %v1643_v43 = vand.u32 4294901760, %v17331_v41  ;;  %v17348_v46 = vld [vmem:[%s21771_s5 + $0xd0] sm:$0xff]  ;;  %s13489_s30 = sshll.u32 %s17270_s11, 4  ;;  %s17154_s12 = smov [#allocation5]   ;;  %s21688_s30 = int_to_ptr.vmem [resolvable:$true] %s13489_s30 }
  0x26   : > { %14775 = vmatprep.mubr.f32.mxu0 %v581_v8  ;;  %v582_v11 = vsub.f32 %v506_v5, %v581_v8  ;;  %14769 = vmatpush3.msra.mxu1 %v516_v7  ;;  %v1732_v28 = vand.u32 4294901760, %v17291_v26  ;;  %v17321_v39 = vsub.f32 %v17309_v35, %v1637_v37  ;;  %v17326_v40 = vsub.f32 %v17314_v36, %v1641_v38  ;;  %s13503_s17 = sshll.u32 %s17154_s12, 4  ;;  %s21686_s25 = scalar_lea.hbm %s21775_s9, %s13597_s29  ;;  %s21690_s17 = int_to_ptr.vmem [resolvable:$true] %s13503_s17 }
  0x27   : > { %v604_v13 = vand.u32 4294901760, %v603_v10  ;;  %v593_v15 = vand.u32 4294901760, %v592_v12  ;;  %v1744_v29 = vand.u32 4294901760, %v17296_v27  ;;  %v1647_v44 = vand.u32 4294901760, %v17336_v42  ;;  %s21698_s26 = scalar_lea.sflag [#allocation4], %s348_s24  ;;  %s17056_s27 = scalar_lea.vmem %s21688_s30, 256 }
  0x28   : > { %v583_v14 = vand.u32 4294901760, %v582_v11  ;;  %v1733_v30 = vsub.f32 %v17291_v26, %v1732_v28  ;;  %v1738_v47 = vand.u32 4294901760, %v17321_v39  ;;  %v1750_v48 = vand.u32 4294901760, %v17326_v40  ;;  %p17057_p12 = scmp.ne.s32.totalorder %s21688_s30, %s17056_s27  ;;  %s17155_s28 = smov [#allocation3]  }
  0x29   : > { %v605_v16 = vsub.f32 %v603_v10, %v604_v13  ;;  %v594_v18 = vsub.f32 %v592_v12, %v593_v15  ;;  %v1745_v31 = vsub.f32 %v17296_v27, %v1744_v29  ;;  %v1645_v49 = vand.u32 4294901760, %v17343_v45  ;;  %s17060_s29 = sshll.u32 %s17155_s28, 4  ;;  %s17061_s29 = int_to_ptr.vmem [resolvable:$false] %s17060_s29 }
  0x2a   : > { %v584_v17 = vsub.f32 %v582_v11, %v583_v14  ;;  %v1734_v32 = vand.u32 4294901760, %v1733_v30  ;;  %v1649_v50 = vand.u32 4294901760, %v17348_v46  ;;  %v17357_v51 = vsub.f32 %v17331_v41, %v1643_v43  ;;  %p17058_p13 = pnand %p17057_p12, %p17253_p5  ;;  %s17062_s12 = scalar_lea.vmem %s17061_s29, 512 }
  0x2b   : > { %v606_v19 = vand.u32 4294901760, %v605_v16  ;;  %v595_v21 = vand.u32 4294901760, %v594_v18  ;;  %v1746_v33 = vand.u32 4294901760, %v1745_v31  ;;  %v17362_v52 = vsub.f32 %v17336_v42, %v1647_v44  ;;  %p17063_p1 = scmp.lt.s32.totalorder %s21688_s30, %s17061_s29  ;;  %p17064_p3 = scmp.lt.s32.totalorder %s17062_s12, %s17056_s27 }
  0x2c   : > { %v585_v20 = vand.u32 4294901760, %v584_v17  ;;  %v1739_v53 = vsub.f32 %v17321_v39, %v1738_v47  ;;  %v1751_v54 = vsub.f32 %v17326_v40, %v1750_v48  ;;  %v17373_v55 = vsub.f32 %v17343_v45, %v1645_v49  ;;  %p17059_p0 = pneg %p17058_p13 }
  0x2d   : > { %14773 = vmatprep.subr.mxu0 %v606_v19  ;;  %v15382_v34 = vpack.c.bf16 %v1746_v33, %v1734_v32  ;;  %v17378_v56 = vsub.f32 %v17348_v46, %v1649_v50  ;;  %v1756_v57 = vand.u32 4294901760, %v17357_v51  ;;  %v1768_v58 = vand.u32 4294901760, %v17362_v52  ;;  %p17065_p4 = por %p17064_p3, %p17063_p1 }
  0x2e   : > { %14770 = vmatprep.mubr.f32.mxu1 %v585_v20  ;;  %14774 = vmatpush3.msra.mxu0 %v606_v19  ;;  %v1740_v59 = vand.u32 4294901760, %v1739_v53  ;;  %v1752_v60 = vand.u32 4294901760, %v1751_v54  ;;  %v1762_v61 = vand.u32 4294901760, %v17373_v55  ;;  %v15390_v30 = vpack.c.bf16 %v17296_v27, %v17291_v26  ;;  %v1029_v53 = vld [vmem:[%s21771_s5 + $0xc8] sm:$0xff] }
  0x2f   : > { %14771 = vmatmul.mubr.f32.vlgmr.msra.gmra.mrb[0].mxu1 %v595_v21  ;;  %14776 = vmatmul.mubr.f32.vlgmr.msra.gmra.mrb[0].mxu0 %v591_v9  ;;  %v1774_v62 = vand.u32 4294901760, %v17378_v56  ;;  %v1757_v63 = vsub.f32 %v17357_v51, %v1756_v57  ;;  %v1769_v0 = vsub.f32 %v17362_v52, %v1768_v58  ;;  %v21777_v21 = vmov 0.0   ;;  %p17066_p7 = pnand %p17065_p4, %p17059_p0 }
  0x30   : > { %14778 = vmatprep.subr.mxu0 %v603_v10  ;;  %14780 = vmatprep.mubr.f32.mxu0 %v582_v11  ;;  %v15384_v1 = vpack.c.bf16 %v1752_v60, %v1740_v59  ;;  %v1763_v2 = vsub.f32 %v17373_v55, %v1762_v61  ;;  %v1013_v11 = vld [vmem:[%s21771_s5 + $0x48] sm:$0xff]  ;;  %v15392_v54 = vpack.c.bf16 %v17326_v40, %v17321_v39  ;;  %v1055_v60 = vand.u32 4294901760, %v1029_v53 }
  0x31   : > { %14779 = vmatpush3.msra.mxu0 %v603_v10  ;;  %v1775_v3 = vsub.f32 %v17378_v56, %v1774_v62  ;;  %v1758_v4 = vand.u32 4294901760, %v1757_v63  ;;  %v1770_v5 = vand.u32 4294901760, %v1769_v0  ;;  %v1005_v10 = vld [vmem:[%s21771_s5 + $0x8] sm:$0xff]  ;;  %v1020_v63 = vld [vmem:[%s21771_s5 + $0x80] sm:$0xff]  ;;  %1115 = vmatprep.mubr.f32.mxu1 %v21777_v21  ;;  %v17490_v35 = vpack.c.bf16 %v1647_v44, %v1643_v43 }
  0x32   : > { %14783 = vmatprep.subr.mxu0 %v516_v7  ;;  %v1764_v6 = vand.u32 4294901760, %v1763_v2  ;;  %v1028_v0 = vld [vmem:[%s21771_s5 + $0xc0] sm:$0xff]  ;;  %v1053_v2 = vand.u32 4294901760, %v1020_v63  ;;  %v15406_v41 = vpack.c.bf16 %v1744_v29, %v1732_v28  ;;  %v17510_v43 = vpack.c.bf16 %v1750_v48, %v1738_v47 }
  0x33   : > { %v17518_v26 = vpack.c.bf16 %v1768_v58, %v1756_v57  ;;  %v17526_v28 = vpack.c.bf16 %v1774_v62, %v1762_v61  ;;  %vm1036_vm3 = vcmask 261120   ;;  %v22037_v39 = vpack.c.bf16 %v17378_v56, %v17373_v55  ;;  %v1019_v55 = vld [vmem:[%s21771_s5 + $0x78] sm:$0xff]  ;;  %v1010_v56 = vld [vmem:[%s21771_s5 + $0x30] sm:$0xff] }
  0x34   : > { %vm17153_vm4 = vmmov 0   ;;  %vm10001_vm5 = vcmask 254976   ;;  %vm10497_vm6 = vcmask 257026   ;;  %vm10994_vm7 = vcmask 259076  }
  0x35   : > { %vm11491_vm8 = vcmask 261126  }
  0x37   : > { %14781 = vmatmul.mubr.f32.vlgmr.msra.gmra.mrb[0].mxu0 %v592_v12  ;;  %v1043_v12 = vand.u32 4294901760, %v1005_v10 }
  0x38   : > { %14784 = vmatpush3.msra.mxu0 %v516_v7  ;;  %14785 = vmatprep.mubr.f32.mxu0 %v583_v14  ;;  %v1004_v14 = vld [vmem:[%s21771_s5] sm:$0xff] }
  0x39   : > { %14788 = vmatprep.subr.mxu0 %v604_v13  ;;  %v1045_v16 = vand.u32 4294901760, %v1004_v14  ;;  %v17410_v19 = vsub.f32 %v1005_v10, %v1043_v12 }
  0x3b   : > { %v17419_v32 = vsub.f32 %v1004_v14, %v1045_v16 }
  0x3f   : > { %14786 = vmatmul.mubr.f32.vlgmr.msra.gmra.mrb[0].mxu0 %v593_v15  ;;  %v1012_v15 = vld [vmem:[%s21771_s5 + $0x40] sm:$0xff] }
  0x40   : > { %14789 = vmatpush3.msra.mxu0 %v604_v13  ;;  %14790 = vmatprep.mubr.f32.mxu0 %v581_v8  ;;  %v1047_v13 = vand.u32 4294901760, %v1013_v11  ;;  %v1049_v17 = vand.u32 4294901760, %v1012_v15 }
  0x41   : > { %14793 = vmatprep.subr.mxu0 %v516_v7 }
  0x42   : > { %v17408_v18 = vpack.c.bf16 %v1047_v13, %v1043_v12  ;;  %v17412_v20 = vsub.f32 %v1013_v11, %v1047_v13  ;;  %v17417_v31 = vpack.c.bf16 %v1049_v17, %v1045_v16  ;;  %v17421_v33 = vsub.f32 %v1012_v15, %v1049_v17 }
  0x43   : > { %v17453_v11 = vsub.f32 %v1020_v63, %v1053_v2  ;;  %v17480_v13 = vpack.c.bf16 %v1641_v38, %v1637_v37 }
  0x44   : > { %15327 = vmatprep.subr.bf16.mxu1 %v17408_v18  ;;  %v1158_v17 = vand.u32 4294901760, %v17421_v33  ;;  %v15344_v42 = vpack.c.bf16 %v17421_v33, %v17419_v32 }
  0x45   : > { %15329 = vmatpush1.bf16.msra.mxu1 %v17417_v31 }
  0x47   : > { %14791 = vmatmul.mubr.f32.vlgmr.msra.gmra.mrb[0].mxu0 %v591_v9 }
  0x48   : > { %14794 = vmatpush3.msra.mxu0 %v516_v7  ;;  %14795 = vmatprep.mubr.f32.mxu0 %v581_v8  ;;  %v1776_v7 = vand.u32 4294901760, %v1775_v3  ;;  %v15386_v8 = vpack.c.bf16 %v1770_v5, %v1758_v4  ;;  %v1057_v3 = vand.u32 4294901760, %v1028_v0  ;;  %v1152_v4 = vand.u32 4294901760, %v17412_v20 }
  0x49   : > { %15383 = vmatprep.subr.bf16.mxu0 %v15382_v34  ;;  %v1021_v34 = vld [vmem:[%s21771_s5 + $0x88] sm:$0xff]  ;;  %v1146_v5 = vand.u32 4294901760, %v17419_v32 }
  0x4a   : > { %v1051_v59 = vand.u32 4294901760, %v1021_v34  ;;  %v17451_v10 = vpack.c.bf16 %v1057_v3, %v1053_v2  ;;  %v17455_v12 = vsub.f32 %v1028_v0, %v1057_v3  ;;  %v1153_v15 = vsub.f32 %v17412_v20, %v1152_v4 }
  0x4b   : > { %v1147_v16 = vsub.f32 %v17419_v32, %v1146_v5  ;;  %v17473_v0 = vpack.c.bf16 %v1639_v25, %v1635_v24  ;;  %v1159_v3 = vsub.f32 %v17421_v33, %v1158_v17  ;;  %v17530_v45 = vpack.c.bf16 %v1158_v17, %v1146_v5 }
  0x4c   : > { %v1154_v63 = vand.u32 4294901760, %v1153_v15  ;;  %v15348_v27 = vpack.c.bf16 %v17455_v12, %v17453_v11 }
  0x4d   : > { %v1148_v2 = vand.u32 4294901760, %v1147_v16  ;;  %v1160_v24 = vand.u32 4294901760, %v1159_v3  ;;  %v22036_v3 = vpack.c.bf16 %v17362_v52, %v17357_v51  ;;  %v1011_v52 = vld [vmem:[%s21771_s5 + $0x38] sm:$0xff] }
  0x4f   : > { %14796 = vmatmul.mubr.f32.vlgmr.msra.gmra.mrb[0].mxu0 %v591_v9  ;;  %v15388_v9 = vpack.c.bf16 %v1776_v7, %v1764_v6  ;;  %v17443_v6 = vpack.c.bf16 %v1055_v60, %v1051_v59  ;;  %v17445_v7 = vsub.f32 %v1021_v34, %v1051_v59  ;;  %v1182_v59 = vand.u32 4294901760, %v17455_v12 }
  0x50   : > { %15385 = vmatpush1.bf16.msra.mxu0 %v15384_v1  ;;  %1834 = vmatprep.mubr.f32.mxu0 %v21777_v21  ;;  %v1140_v1 = vand.u32 4294901760, %v17410_v19  ;;  %v15336_v38 = vpack.c.bf16 %v1160_v24, %v1148_v2  ;;  %v1035_v24 = vld [vmem:[%s21771_s5 + $0xf8] sm:$0xff] }
  0x51   : > { %15387 = vmatprep.subr.bf16.mxu0 %v15386_v8  ;;  %v17447_v8 = vsub.f32 %v1029_v53, %v1055_v60  ;;  %15331 = vmatprep.subr.bf16.mxu1 %v17443_v6  ;;  %v1170_v53 = vand.u32 4294901760, %v17453_v11  ;;  %v1183_v23 = vsub.f32 %v17455_v12, %v1182_v59 }
  0x52   : > { %v1141_v14 = vsub.f32 %v17410_v19, %v1140_v1  ;;  %15333 = vmatpush1.bf16.msra.mxu1 %v17451_v10  ;;  %v17528_v29 = vpack.c.bf16 %v1152_v4, %v1140_v1 }
  0x53   : > { %v1176_v34 = vand.u32 4294901760, %v17447_v8  ;;  %v1171_v22 = vsub.f32 %v17453_v11, %v1170_v53  ;;  %v1184_v37 = vand.u32 4294901760, %v1183_v23  ;;  %v15346_v44 = vpack.c.bf16 %v17447_v8, %v17445_v7  ;;  %v1027_v23 = vld [vmem:[%s21771_s5 + $0xb8] sm:$0xff] }
  0x54   : > { %15389 = vmatpush1.bf16.msra.mxu0 %v15388_v9  ;;  %v1142_v60 = vand.u32 4294901760, %v1141_v14  ;;  %v17534_v47 = vpack.c.bf16 %v1182_v59, %v1170_v53  ;;  %v22035_v53 = vmov 0.0  }
  0x55   : > { %15391 = vmatprep.subr.bf16.mxu0 %v15390_v30  ;;  %v1164_v30 = vand.u32 4294901760, %v17445_v7  ;;  %v1177_v14 = vsub.f32 %v17447_v8, %v1176_v34  ;;  %v1172_v36 = vand.u32 4294901760, %v1171_v22  ;;  %v2823_v22 = vand.u32 4294901760, %v1019_v55 }
  0x56   : > { %v15334_v15 = vpack.c.bf16 %v1154_v63, %v1142_v60  ;;  %v17496_v60 = vpack.c.bf16 %v1649_v50, %v1645_v49  ;;  %v13581_v50 = vld [vmem:[%s21768_s2] ss:$0 sm:$0xff] }
  0x57   : > { %v1165_v9 = vsub.f32 %v17445_v7, %v1164_v30  ;;  %v1178_v16 = vand.u32 4294901760, %v1177_v14  ;;  %v15340_v63 = vpack.c.bf16 %v1184_v37, %v1172_v36  ;;  %v17532_v46 = vpack.c.bf16 %v1176_v34, %v1164_v30  ;;  %v1026_v36 = vld [vmem:[%s21771_s5 + $0xb0] sm:$0xff] }
  0x58   : > { %15335 = vmatprep.subr.bf16.mxu1 %v15334_v15  ;;  %v2819_v15 = vand.u32 4294901760, %v1011_v52  ;;  %v1034_v37 = vld [vmem:[%s21771_s5 + $0xf0] sm:$0xff]  ;;  %v17628_v33 = vsub.f32 %v1019_v55, %v2823_v22 }
  0x59   : > { %v1166_v25 = vand.u32 4294901760, %v1165_v9  ;;  %v15342_v9 = vpack.c.bf16 %v17412_v20, %v17410_v19 }
  0x5a   : > { %v17626_v32 = vsub.f32 %v1011_v52, %v2819_v15 }
  0x5b   : > { %v15338_v21 = vpack.c.bf16 %v1178_v16, %v1166_v25  ;;  %v2821_v25 = vand.u32 4294901760, %v1010_v56 }
  0x5c   : > { %v2916_v12 = vand.u32 4294901760, %v17626_v32 }
  0x5d   : > { %v17636_v7 = vsub.f32 %v1010_v56, %v2821_v25 }
 0x102   : > { %v14772_v48 = vpop.f32.mrb[0].mxu1 }
 0x103   : > { %v587_v49 = vpop.f32.mrb[1].mxu1  ;;  %v598_v57 = vadd.f32 %v14772_v48, %v13581_v50  ;;  %v17662_v48 = vpack.c.bf16 %v2823_v22, %v2819_v15 }
 0x104   : > { %v588_v58 = vadd.f32 %v13581_v50, %v587_v49  ;;  %v2917_v49 = vsub.f32 %v17626_v32, %v2916_v12 }
 0x122   : > { %v14797_v19 = vpop.f32.mrb[0].mxu0 }
 0x123   : > { %v16767_v61 = vadd.f32 %v14797_v19, %v598_v57  ;;  %v994_v62 = vpop.f32.mrb[1].mxu0 }
 0x124   : > { %v16769_v20 = vadd.f32 %v994_v62, %v588_v58 }
 0x125   : > { %v1041_v1 = vsel %vm1036_vm3, %v16767_v61, 0 }
 0x126   : > { %v17540_v4 = vand.u32 4294901760, %v1041_v1  ;;  %v1038_v5 = vsel %vm1036_vm3, %v16769_v20, 0 }
 0x127   : > { %v17543_v17 = vand.u32 4294901760, %v1038_v5 }
 0x128   : > { %v17546_v30 = vsub.f32 %v1041_v1, %v17540_v4 }
 0x129   : > { %v17549_v34 = vsub.f32 %v1038_v5, %v17543_v17  ;;  %1836 = vmatmul.mubr.f32.vlgmr.msra.gmra.mrb[2].mxu0 %v17543_v17 }
 0x12a   : > { %15393 = vmatpush1.bf16.msra.mxu0 %v15392_v54  ;;  %1841 = vmatprep.mubr.f32.mxu0 %v22035_v53  ;;  %v17557_v59 = vand.u32 4294901760, %v17546_v30 }
 0x12b   : > { %v17560_v2 = vand.u32 4294901760, %v17549_v34  ;;  %15395 = vmatprep.subr.bf16.mxu0 %v22036_v3  ;;  %v2918_v3 = vand.u32 4294901760, %v2917_v49 }
 0x12c   : > { %v1130_v54 = vsub.f32 %v17546_v30, %v17557_v59 }
 0x12d   : > { %1843 = vmatmul.mubr.f32.gmra.mrb[4].mxu0 %v17540_v4  ;;  %v1119_v14 = vsub.f32 %v17549_v34, %v17560_v2 }
 0x12e   : > { %15397 = vmatpush1.bf16.msra.mxu0 %v22037_v39  ;;  %1929 = vmatprep.mubr.f32.mxu0 %v22035_v53  ;;  %v17582_v51 = vand.u32 4294901760, %v1130_v54 }
 0x12f   : > { %v17572_v40 = vand.u32 4294901760, %v1119_v14  ;;  %15399 = vmatprep.subr.bf16.mxu0 %v17473_v0 }
 0x131   : > { %1121 = vmatmul.mubr.f32.vlgmr.msra.gmra.mrb[2].mxu1 %v17572_v40  ;;  %1932 = vmatmul.mubr.f32.vlgmr.msra.gmra.mrb[2].mxu0 %v17549_v34 }
 0x132   : > { %15337 = vmatpush1.bf16.msra.mxu1 %v15336_v38  ;;  %15401 = vmatpush1.bf16.msra.mxu0 %v17480_v13  ;;  %v2827_v38 = vand.u32 4294901760, %v1027_v23 }
 0x133   : > { %1126 = vmatprep.mubr.f32.mxu1 %v22035_v53  ;;  %1937 = vmatprep.mubr.f32.mxu0 %v22035_v53 }
 0x134   : > { %15339 = vmatprep.subr.bf16.mxu1 %v15338_v21  ;;  %15403 = vmatprep.subr.bf16.mxu0 %v17490_v35  ;;  %v1018_v21 = vld [vmem:[%s21771_s5 + $0x70] sm:$0xff] }
 0x135   : > { %1132 = vmatmul.mubr.f32.gmra.mrb[4].mxu1 %v17582_v51  ;;  %1940 = vmatmul.mubr.f32.gmra.mrb[4].mxu0 %v17546_v30  ;;  %v2825_v16 = vand.u32 4294901760, %v1018_v21 }
 0x136   : > { %15341 = vmatpush1.bf16.msra.mxu1 %v15340_v63  ;;  %15405 = vmatpush1.bf16.msra.mxu0 %v17496_v60  ;;  %v2831_v63 = vand.u32 4294901760, %v1035_v24 }
 0x137   : > { %1242 = vmatprep.mubr.f32.mxu1 %v22035_v53  ;;  %2018 = vmatprep.mubr.f32.mxu0 %v22035_v53  ;;  %v17638_v8 = vsub.f32 %v1018_v21, %v2825_v16  ;;  %v17676_v19 = vpack.c.bf16 %v2825_v16, %v2821_v25 }
 0x138   : > { %15343 = vmatprep.subr.bf16.mxu1 %v15342_v9  ;;  %15407 = vmatprep.subr.bf16.mxu0 %v15406_v41  ;;  %v2829_v9 = vand.u32 4294901760, %v1026_v36  ;;  %v2833_v41 = vand.u32 4294901760, %v1034_v37  ;;  %v17646_v11 = vsub.f32 %v1035_v24, %v2831_v63  ;;  %v17690_v5 = vpack.c.bf16 %v2831_v63, %v2827_v38  ;;  %v17726_v24 = vld [vmem:[%s21771_s5 + $0x68] sm:$0xff] }
 0x139   : > { %1244 = vmatmul.mubr.f32.vlgmr.msra.gmra.mrb[2].mxu1 %v17543_v17  ;;  %2022 = vmatmul.mubr.f32.vlgmr.msra.gmra.mrb[2].mxu0 %v17560_v2  ;;  %v2231_v63 = vand.u32 4294901760, %v17726_v24 }
 0x13a   : > { %15345 = vmatpush1.bf16.msra.mxu1 %v15344_v42  ;;  %15409 = vmatpush1.bf16.msra.mxu0 %v17510_v43  ;;  %v17644_v42 = vsub.f32 %v1027_v23, %v2827_v38  ;;  %v2928_v43 = vand.u32 4294901760, %v17628_v33  ;;  %v2952_v58 = vand.u32 4294901760, %v17646_v11  ;;  %v17702_v52 = vpack.c.bf16 %v2833_v41, %v2829_v9  ;;  %v17721_v23 = vld [vmem:[%s21771_s5 + $0x28] sm:$0xff] }
 0x13b   : > { %1249 = vmatprep.mubr.f32.mxu1 %v22035_v53  ;;  %2027 = vmatprep.mubr.f32.mxu0 %v22035_v53  ;;  %v2227_v38 = vand.u32 4294901760, %v17721_v23 }
 0x13c   : > { %15347 = vmatprep.subr.bf16.mxu1 %v15346_v44  ;;  %15411 = vmatprep.subr.bf16.mxu0 %v17518_v26  ;;  %v17654_v44 = vsub.f32 %v1026_v36, %v2829_v9  ;;  %v17656_v26 = vsub.f32 %v1034_v37, %v2833_v41  ;;  %v2929_v50 = vsub.f32 %v17628_v33, %v2928_v43  ;;  %v2940_v57 = vand.u32 4294901760, %v17644_v42  ;;  %v17735_v36 = vld [vmem:[%s21771_s5 + $0x20] sm:$0xff]  ;;  %v17750_v9 = vld [vmem:[%s21771_s5 + $0xa8] sm:$0xff] }
 0x13d   : > { %1251 = vmatmul.mubr.f32.gmra.mrb[4].mxu1 %v17540_v4  ;;  %2031 = vmatmul.mubr.f32.gmra.mrb[4].mxu0 %v17557_v59  ;;  %v2953_v54 = vsub.f32 %v17646_v11, %v2952_v58  ;;  %v17740_v37 = vld [vmem:[%s21771_s5 + $0x60] sm:$0xff]  ;;  %v17755_v41 = vld [vmem:[%s21771_s5 + $0xe8] sm:$0xff]  ;;  %v2229_v49 = vand.u32 4294901760, %v17735_v36 }
 0x13e   : > { %15349 = vmatpush1.bf16.msra.mxu1 %v15348_v27  ;;  %15413 = vmatpush1.bf16.msra.mxu0 %v17526_v28  ;;  %v2922_v27 = vand.u32 4294901760, %v17636_v7  ;;  %v2934_v28 = vand.u32 4294901760, %v17638_v8  ;;  %v2946_v20 = vand.u32 4294901760, %v17654_v44  ;;  %v2958_v1 = vand.u32 4294901760, %v17656_v26 }
 0x13f   : > { %1337 = vmatprep.mubr.f32.mxu1 %v22035_v53  ;;  %2125 = vmatprep.mubr.f32.mxu0 %v22035_v53  ;;  %v2930_v14 = vand.u32 4294901760, %v2929_v50  ;;  %v2941_v39 = vsub.f32 %v17644_v42, %v2940_v57  ;;  %v2954_v22 = vand.u32 4294901760, %v2953_v54  ;;  %v2233_v50 = vand.u32 4294901760, %v17740_v37 }
 0x140   : > { %15351 = vmatprep.subr.bf16.mxu1 %v17408_v18  ;;  %15415 = vmatprep.subr.bf16.mxu0 %v17473_v0  ;;  %v2923_v61 = vsub.f32 %v17636_v7, %v2922_v27  ;;  %v2935_v62 = vsub.f32 %v17638_v8, %v2934_v28  ;;  %v2947_v56 = vsub.f32 %v17654_v44, %v2946_v20  ;;  %v2239_v54 = vand.u32 4294901760, %v17755_v41 }
 0x141   : > { %1340 = vmatmul.mubr.f32.vlgmr.msra.gmra.mrb[2].mxu1 %v17549_v34  ;;  %2127 = vmatmul.mubr.f32.vlgmr.msra.gmra.mrb[2].mxu0 %v17543_v17  ;;  %v2959_v21 = vsub.f32 %v17656_v26, %v2958_v1  ;;  %v2942_v15 = vand.u32 4294901760, %v2941_v39  ;;  %v2235_v39 = vand.u32 4294901760, %v17750_v9 }
 0x142   : > { %15353 = vmatpush1.bf16.msra.mxu1 %v17417_v31  ;;  %15417 = vmatpush1.bf16.msra.mxu0 %v17480_v13  ;;  %v2936_v55 = vand.u32 4294901760, %v2935_v62  ;;  %v2948_v25 = vand.u32 4294901760, %v2947_v56  ;;  %v17767_v62 = vld [vmem:[%s21771_s5 + $0xa0] sm:$0xff] }
 0x143   : > { %1345 = vmatprep.mubr.f32.mxu1 %v22035_v53  ;;  %2132 = vmatprep.mubr.f32.mxu0 %v22035_v53  ;;  %v2960_v16 = vand.u32 4294901760, %v2959_v21  ;;  %v2237_v56 = vand.u32 4294901760, %v17767_v62 }
 0x144   : > { %15355 = vmatprep.subr.bf16.mxu1 %v17443_v6  ;;  %15419 = vmatprep.subr.bf16.mxu0 %v17490_v35 }
 0x145   : > { %1348 = vmatmul.mubr.f32.gmra.mrb[4].mxu1 %v17546_v30  ;;  %2134 = vmatmul.mubr.f32.gmra.mrb[4].mxu0 %v17540_v4 }
 0x146   : > { %15357 = vmatpush1.bf16.msra.mxu1 %v17451_v10  ;;  %15421 = vmatpush1.bf16.msra.mxu0 %v17496_v60 }
 0x147   : > { %1426 = vmatprep.mubr.f32.mxu1 %v22035_v53  ;;  %2212 = vmatprep.mubr.f32.mxu0 %v22035_v53 }
 0x148   : > { %15359 = vmatprep.subr.bf16.mxu1 %v17528_v29  ;;  %15471 = vmatprep.subr.bf16.mxu0 %v17662_v48  ;;  %v2924_v29 = vand.u32 4294901760, %v2923_v61  ;;  %v15486_v61 = vpack.c.bf16 %v17628_v33, %v17626_v32  ;;  %v15504_v33 = vpack.c.bf16 %v2934_v28, %v2922_v27 }
 0x149   : > { %1430 = vmatmul.mubr.f32.vlgmr.msra.gmra.mrb[2].mxu1 %v17560_v2  ;;  %2214 = vmatmul.mubr.f32.vlgmr.msra.gmra.mrb[2].mxu0 %v17543_v17 }
 0x14a   : > { %15361 = vmatpush1.bf16.msra.mxu1 %v17530_v45  ;;  %15473 = vmatpush1.bf16.msra.mxu0 %v17676_v19  ;;  %v15478_v45 = vpack.c.bf16 %v2930_v14, %v2918_v3  ;;  %v17776_v3 = vsub.f32 %v17721_v23, %v2227_v38  ;;  %v17779_v14 = vsub.f32 %v17726_v24, %v2231_v63 }
 0x14b   : > { %1435 = vmatprep.mubr.f32.mxu1 %v22035_v53  ;;  %2219 = vmatprep.mubr.f32.mxu0 %v22035_v53  ;;  %v15492_v24 = vpack.c.bf16 %v17656_v26, %v17654_v44  ;;  %v17946_v44 = vld [vmem:[%s21772_s6 + $0xd0] sm:$0xff] }
 0x14c   : > { %15363 = vmatprep.subr.bf16.mxu1 %v17532_v46  ;;  %15475 = vmatprep.subr.bf16.mxu0 %v17690_v5  ;;  %v15480_v46 = vpack.c.bf16 %v2936_v55, %v2924_v29  ;;  %v15488_v29 = vpack.c.bf16 %v17638_v8, %v17636_v7  ;;  %v17792_v55 = vsub.f32 %v17740_v37, %v2233_v50  ;;  %v2336_v23 = vand.u32 4294901760, %v17779_v14 }
 0x14d   : > { %1439 = vmatmul.mubr.f32.gmra.mrb[4].mxu1 %v17557_v59  ;;  %2221 = vmatmul.mubr.f32.gmra.mrb[4].mxu0 %v17540_v4  ;;  %v15506_v8 = vpack.c.bf16 %v2952_v58, %v2940_v57  ;;  %v15508_v57 = vpack.c.bf16 %v2958_v1, %v2946_v20 }
 0x14e   : > { %15365 = vmatpush1.bf16.msra.mxu1 %v17534_v47  ;;  %15477 = vmatpush1.bf16.msra.mxu0 %v17702_v52  ;;  %v15482_v47 = vpack.c.bf16 %v2954_v22, %v2942_v15  ;;  %v17805_v15 = vsub.f32 %v17755_v41, %v2239_v54  ;;  %v2324_v22 = vand.u32 4294901760, %v17776_v3  ;;  %v2337_v37 = vsub.f32 %v17779_v14, %v2336_v23 }
 0x14f   : > { %1533 = vmatprep.mubr.f32.mxu1 %v22035_v53  ;;  %2891 = vmatprep.mubr.f32.mxu0 %v22035_v53 }
 0x150   : > { %15367 = vmatprep.subr.bf16.mxu1 %v17408_v18  ;;  %15479 = vmatprep.subr.bf16.mxu0 %v15478_v45  ;;  %v15484_v18 = vpack.c.bf16 %v2960_v16, %v2948_v25  ;;  %v15490_v45 = vpack.c.bf16 %v17646_v11, %v17644_v42  ;;  %v2342_v16 = vand.u32 4294901760, %v17792_v55  ;;  %v17926_v42 = vld [vmem:[%s21772_s6 + $0xd8] sm:$0xff] }
 0x151   : > { %1535 = vmatmul.mubr.f32.vlgmr.msra.gmra.mrb[2].mxu1 %v17543_v17  ;;  %2897 = vmatmul.mubr.f32.vlgmr.msra.gmra.mrb[6].mxu0 %v17572_v40 }
 0x152   : > { %15369 = vmatpush1.bf16.msra.mxu1 %v17417_v31  ;;  %15481 = vmatpush1.bf16.msra.mxu0 %v15480_v46  ;;  %v17772_v31 = vld [vmem:[%s21771_s5 + $0xe0] sm:$0xff] }
 0x153   : > { %1540 = vmatprep.mubr.f32.mxu1 %v22035_v53  ;;  %2902 = vmatprep.mubr.f32.mxu0 %v22035_v53  ;;  %v2241_v21 = vand.u32 4294901760, %v17772_v31 }
 0x154   : > { %15371 = vmatprep.subr.bf16.mxu1 %v17443_v6  ;;  %15483 = vmatprep.subr.bf16.mxu0 %v15482_v47  ;;  %v17789_v6 = vsub.f32 %v17735_v36, %v2229_v49  ;;  %v17824_v36 = vpack.c.bf16 %v2231_v63, %v2227_v38  ;;  %v17837_v38 = vpack.c.bf16 %v2233_v50, %v2229_v49  ;;  %v2338_v50 = vand.u32 4294901760, %v2337_v37  ;;  %v17885_v37 = vld [vmem:[%s21772_s6 + $0x18] sm:$0xff] }
 0x155   : > { %1542 = vmatmul.mubr.f32.gmra.mrb[4].mxu1 %v17540_v4  ;;  %2908 = vmatmul.mubr.f32.gmra.mrb[8].mxu0 %v17582_v51  ;;  %v17818_v46 = vsub.f32 %v17772_v31, %v2241_v21  ;;  %v2343_v63 = vsub.f32 %v17792_v55, %v2342_v16  ;;  %v17850_v49 = vpack.c.bf16 %v2239_v54, %v2235_v39  ;;  %v4035_v27 = vand.u32 4294901760, %v17885_v37 }
 0x156   : > { %15373 = vmatpush1.bf16.msra.mxu1 %v17451_v10  ;;  %15485 = vmatpush1.bf16.msra.mxu0 %v15484_v18  ;;  %v17802_v10 = vsub.f32 %v17750_v9, %v2235_v39  ;;  %v2330_v25 = vand.u32 4294901760, %v17789_v6  ;;  %v2360_v9 = vand.u32 4294901760, %v17805_v15  ;;  %v17862_v31 = vpack.c.bf16 %v2241_v21, %v2237_v56 }
 0x157   : > { %1620 = vmatprep.mubr.f32.mxu1 %v22035_v53  ;;  %3018 = vmatprep.mubr.f32.mxu0 %v22035_v53  ;;  %v2366_v18 = vand.u32 4294901760, %v17818_v46  ;;  %v2344_v54 = vand.u32 4294901760, %v2343_v63  ;;  %v15502_v21 = vpack.c.bf16 %v2928_v43, %v2916_v12  ;;  %v17903_v63 = vld [vmem:[%s21772_s6 + $0x10] sm:$0xff]  ;;  %v17949_v26 = vsub.f32 %v17885_v37, %v4035_v27 }
 0x158   : > { %15375 = vmatprep.subr.bf16.mxu1 %v17473_v0  ;;  %15487 = vmatprep.subr.bf16.mxu0 %v15486_v61  ;;  %v17815_v0 = vsub.f32 %v17767_v62, %v2237_v56  ;;  %v2348_v47 = vand.u32 4294901760, %v17802_v10  ;;  %v2361_v62 = vsub.f32 %v17805_v15, %v2360_v9  ;;  %v4037_v58 = vand.u32 4294901760, %v17903_v63 }
 0x159   : > { %1622 = vmatmul.mubr.f32.vlgmr.msra.gmra.mrb[2].mxu1 %v17543_v17  ;;  %3020 = vmatmul.mubr.f32.vlgmr.msra.gmra.mrb[6].mxu0 %v17543_v17 }
 0x15a   : > { %15377 = vmatpush1.bf16.msra.mxu1 %v17480_v13  ;;  %15489 = vmatpush1.bf16.msra.mxu0 %v15488_v29  ;;  %v2325_v13 = vsub.f32 %v17776_v3, %v2324_v22  ;;  %v2354_v41 = vand.u32 4294901760, %v17815_v0  ;;  %v2349_v61 = vsub.f32 %v17802_v10, %v2348_v47 }
 0x15b   : > { %1627 = vmatprep.mubr.f32.mxu1 %v22035_v53  ;;  %3025 = vmatprep.mubr.f32.mxu0 %v22035_v53 }
 0x15c   : > { %15379 = vmatprep.subr.bf16.mxu1 %v17490_v35  ;;  %15491 = vmatprep.subr.bf16.mxu0 %v15490_v45  ;;  %v2331_v35 = vsub.f32 %v17789_v6, %v2330_v25  ;;  %v2355_v29 = vsub.f32 %v17815_v0, %v2354_v41  ;;  %v2367_v45 = vsub.f32 %v17818_v46, %v2366_v18 }
 0x15d   : > { %1629 = vmatmul.mubr.f32.gmra.mrb[4].mxu1 %v17540_v4  ;;  %3027 = vmatmul.mubr.f32.gmra.mrb[8].mxu0 %v17540_v4 }
 0x15e   : > { %15381 = vmatpush1.bf16.msra.mxu1 %v17496_v60  ;;  %15493 = vmatpush1.bf16.msra.mxu0 %v15492_v24  ;;  %v2326_v60 = vand.u32 4294901760, %v2325_v13  ;;  %v2332_v39 = vand.u32 4294901760, %v2331_v35  ;;  %v2350_v24 = vand.u32 4294901760, %v2349_v61  ;;  %v2362_v13 = vand.u32 4294901760, %v2361_v62  ;;  %v17890_v35 = vld [vmem:[%s21772_s6 + $0x58] sm:$0xff] }
 0x15f   : > { %1707 = vmatprep.mubr.f32.mxu1 %v22035_v53  ;;  %3113 = vmatprep.mubr.f32.mxu0 %v22035_v53  ;;  %v2356_v12 = vand.u32 4294901760, %v2355_v29  ;;  %v2368_v43 = vand.u32 4294901760, %v2367_v45  ;;  %v4039_v28 = vand.u32 4294901760, %v17890_v35  ;;  %v15438_v62 = vpack.c.bf16 %v17779_v14, %v17776_v3 }
 0x160   : > { %15423 = vmatprep.subr.bf16.mxu1 %v17824_v36  ;;  %15495 = vmatprep.subr.bf16.mxu0 %v17662_v48  ;;  %v15430_v56 = vpack.c.bf16 %v2338_v50, %v2326_v60  ;;  %v15432_v32 = vpack.c.bf16 %v2344_v54, %v2332_v39  ;;  %v17908_v60 = vld [vmem:[%s21772_s6 + $0x50] sm:$0xff]  ;;  %v15434_v7 = vpack.c.bf16 %v2362_v13, %v2350_v24  ;;  %v17921_v50 = vld [vmem:[%s21772_s6 + $0x98] sm:$0xff]  ;;  %v4047_v54 = vand.u32 4294901760, %v17926_v42 }
 0x161   : > { %1713 = vmatmul.mubr.f32.vlgmr.msra.gmra.mrb[6].mxu1 %v17572_v40  ;;  %3116 = vmatmul.mubr.f32.vlgmr.msra.gmra.mrb[6].mxu0 %v17549_v34  ;;  %v15436_v11 = vpack.c.bf16 %v2368_v43, %v2356_v12  ;;  %v4041_v61 = vand.u32 4294901760, %v17908_v60  ;;  %v17941_v39 = vld [vmem:[%s21772_s6 + $0x90] sm:$0xff]  ;;  %v17952_v20 = vsub.f32 %v17890_v35, %v4039_v28  ;;  %v4043_v1 = vand.u32 4294901760, %v17921_v50 }
 0x162   : > { %15425 = vmatpush1.bf16.msra.mxu1 %v17837_v38  ;;  %15497 = vmatpush1.bf16.msra.mxu0 %v17676_v19  ;;  %v15440_v29 = vpack.c.bf16 %v17792_v55, %v17789_v6  ;;  %v17961_v45 = vsub.f32 %v17903_v63, %v4037_v58  ;;  %v4049_v24 = vand.u32 4294901760, %v17946_v44  ;;  %v15442_v13 = vpack.c.bf16 %v17805_v15, %v17802_v10  ;;  %v18098_v10 = vld [vmem:[%s21772_s6 + $0xc8] sm:$0xff] }
 0x163   : > { %1718 = vmatprep.mubr.f32.mxu1 %v22035_v53  ;;  %3121 = vmatprep.mubr.f32.mxu0 %v22035_v53  ;;  %v17974_v37 = vsub.f32 %v17921_v50, %v4043_v1  ;;  %v17977_v35 = vsub.f32 %v17926_v42, %v4047_v54  ;;  %v15444_v12 = vpack.c.bf16 %v17818_v46, %v17815_v0  ;;  %v18118_v0 = vld [vmem:[%s21772_s6 + $0xc0] sm:$0xff] }
 0x164   : > { %15427 = vmatprep.subr.bf16.mxu1 %v17850_v49  ;;  %15499 = vmatprep.subr.bf16.mxu0 %v17690_v5  ;;  %v17990_v43 = vsub.f32 %v17946_v44, %v4049_v24  ;;  %v4138_v63 = vand.u32 4294901760, %v17961_v45  ;;  %v15456_v3 = vpack.c.bf16 %v2342_v16, %v2330_v25  ;;  %v15458_v6 = vpack.c.bf16 %v2360_v9, %v2348_v47 }
 0x165   : > { %1724 = vmatmul.mubr.f32.gmra.mrb[8].mxu1 %v17582_v51  ;;  %3124 = vmatmul.mubr.f32.gmra.mrb[8].mxu0 %v17546_v30  ;;  %v4156_v50 = vand.u32 4294901760, %v17974_v37  ;;  %v4168_v42 = vand.u32 4294901760, %v17977_v35  ;;  %v15460_v15 = vpack.c.bf16 %v2366_v18, %v2354_v41 }
 0x166   : > { %15429 = vmatpush1.bf16.msra.mxu1 %v17862_v31  ;;  %15501 = vmatpush1.bf16.msra.mxu0 %v17702_v52 }
 0x167   : > { %2299 = vmatprep.mubr.f32.mxu1 %v22035_v53  ;;  %3202 = vmatprep.mubr.f32.mxu0 %v22035_v53 }
 0x168   : > { %15431 = vmatprep.subr.bf16.mxu1 %v15430_v56  ;;  %15503 = vmatprep.subr.bf16.mxu0 %v15502_v21  ;;  %v17964_v56 = vsub.f32 %v17908_v60, %v4041_v61  ;;  %v4045_v21 = vand.u32 4294901760, %v17941_v39 }
 0x169   : > { %2305 = vmatmul.mubr.f32.vlgmr.msra.gmra.mrb[10].mxu1 %v17572_v40  ;;  %3206 = vmatmul.mubr.f32.vlgmr.msra.gmra.mrb[6].mxu0 %v17560_v2 }
 0x16a   : > { %15433 = vmatpush1.bf16.msra.mxu1 %v15432_v32  ;;  %15505 = vmatpush1.bf16.msra.mxu0 %v15504_v33  ;;  %v4132_v32 = vand.u32 4294901760, %v17949_v26  ;;  %v4144_v33 = vand.u32 4294901760, %v17952_v20  ;;  %v4150_v60 = vand.u32 4294901760, %v17964_v56  ;;  %v18034_v44 = vpack.c.bf16 %v4049_v24, %v4045_v21 }
 0x16b   : > { %2310 = vmatprep.mubr.f32.mxu1 %v22035_v53  ;;  %3211 = vmatprep.mubr.f32.mxu0 %v22035_v53 }
 0x16c   : > { %15435 = vmatprep.subr.bf16.mxu1 %v15434_v7  ;;  %15507 = vmatprep.subr.bf16.mxu0 %v15506_v8  ;;  %v17996_v7 = vpack.c.bf16 %v4039_v28, %v4035_v27  ;;  %v4145_v8 = vsub.f32 %v17952_v20, %v4144_v33  ;;  %v18009_v27 = vpack.c.bf16 %v4041_v61, %v4037_v58 }
 0x16d   : > { %2316 = vmatmul.mubr.f32.gmra.mrb[12].mxu1 %v17582_v51  ;;  %3215 = vmatmul.mubr.f32.gmra.mrb[8].mxu0 %v17557_v59  ;;  %v4151_v28 = vsub.f32 %v17964_v56, %v4150_v60  ;;  %v18022_v58 = vpack.c.bf16 %v4047_v54, %v4043_v1 }
 0x16e   : > { %15437 = vmatpush1.bf16.msra.mxu1 %v15436_v11  ;;  %15509 = vmatpush1.bf16.msra.mxu0 %v15508_v57  ;;  %v4174_v57 = vand.u32 4294901760, %v17990_v43  ;;  %v4146_v61 = vand.u32 4294901760, %v4145_v8  ;;  %v18057_v8 = vld [vmem:[%s21772_s6 + $0x8] sm:$0xff] }
 0x16f   : > { %2426 = vmatprep.mubr.f32.mxu1 %v22035_v53  ;;  %3309 = vmatprep.mubr.f32.mxu0 %v22035_v53  ;;  %v4152_v54 = vand.u32 4294901760, %v4151_v28  ;;  %v18075_v28 = vld [vmem:[%s21772_s6] sm:$0xff]  ;;  %v3443_v25 = vand.u32 4294901760, %v18057_v8 }
 0x170   : > { %15439 = vmatprep.subr.bf16.mxu1 %v15438_v62  ;;  %15511 = vmatprep.subr.bf16.mxu0 %v17662_v48  ;;  %v17987_v48 = vsub.f32 %v17941_v39, %v4045_v21  ;;  %v4157_v62 = vsub.f32 %v17974_v37, %v4156_v50  ;;  %v4169_v39 = vsub.f32 %v17977_v35, %v4168_v42  ;;  %v3445_v9 = vand.u32 4294901760, %v18075_v28 }
 0x171   : > { %2428 = vmatmul.mubr.f32.vlgmr.msra.gmra.mrb[10].mxu1 %v17543_v17  ;;  %3311 = vmatmul.mubr.f32.vlgmr.msra.gmra.mrb[6].mxu0 %v17543_v17  ;;  %v15454_v21 = vpack.c.bf16 %v2336_v23, %v2324_v22  ;;  %v18121_v46 = vsub.f32 %v18057_v8, %v3443_v25 }
 0x172   : > { %15441 = vmatpush1.bf16.msra.mxu1 %v15440_v29  ;;  %15513 = vmatpush1.bf16.msra.mxu0 %v17676_v19  ;;  %v4133_v19 = vsub.f32 %v17949_v26, %v4132_v32  ;;  %v4162_v11 = vand.u32 4294901760, %v17987_v48 }
 0x173   : > { %2433 = vmatprep.mubr.f32.mxu1 %v22035_v53  ;;  %3316 = vmatprep.mubr.f32.mxu0 %v22035_v53 }
 0x174   : > { %15443 = vmatprep.subr.bf16.mxu1 %v15442_v13  ;;  %15515 = vmatprep.subr.bf16.mxu0 %v17690_v5  ;;  %v4139_v5 = vsub.f32 %v17961_v45, %v4138_v63  ;;  %v4163_v29 = vsub.f32 %v17987_v48, %v4162_v11  ;;  %v4175_v13 = vsub.f32 %v17990_v43, %v4174_v57 }
 0x175   : > { %2435 = vmatmul.mubr.f32.gmra.mrb[12].mxu1 %v17540_v4  ;;  %3318 = vmatmul.mubr.f32.gmra.mrb[8].mxu0 %v17540_v4 }
 0x176   : > { %15445 = vmatpush1.bf16.msra.mxu1 %v15444_v12  ;;  %15517 = vmatpush1.bf16.msra.mxu0 %v17702_v52  ;;  %v4134_v52 = vand.u32 4294901760, %v4133_v19  ;;  %v4140_v1 = vand.u32 4294901760, %v4139_v5  ;;  %v4158_v12 = vand.u32 4294901760, %v4157_v62  ;;  %v4170_v19 = vand.u32 4294901760, %v4169_v39  ;;  %v18062_v5 = vld [vmem:[%s21772_s6 + $0x48] sm:$0xff] }
 0x177   : > { %2521 = vmatprep.mubr.f32.mxu1 %v22035_v53  ;;  %3396 = vmatprep.mubr.f32.mxu0 %v22035_v53  ;;  %v4164_v22 = vand.u32 4294901760, %v4163_v29  ;;  %v4176_v23 = vand.u32 4294901760, %v4175_v13  ;;  %v3447_v16 = vand.u32 4294901760, %v18062_v5  ;;  %v15582_v39 = vpack.c.bf16 %v17952_v20, %v17949_v26 }
 0x178   : > { %15447 = vmatprep.subr.bf16.mxu1 %v17824_v36  ;;  %15567 = vmatprep.subr.bf16.mxu0 %v17996_v7  ;;  %v15574_v24 = vpack.c.bf16 %v4146_v61, %v4134_v52  ;;  %v15576_v14 = vpack.c.bf16 %v4152_v54, %v4140_v1  ;;  %v18080_v52 = vld [vmem:[%s21772_s6 + $0x40] sm:$0xff]  ;;  %v15578_v55 = vpack.c.bf16 %v4170_v19, %v4158_v12  ;;  %v18093_v61 = vld [vmem:[%s21772_s6 + $0x88] sm:$0xff]  ;;  %v3455_v54 = vand.u32 4294901760, %v18098_v10 }
 0x179   : > { %2524 = vmatmul.mubr.f32.vlgmr.msra.gmra.mrb[10].mxu1 %v17549_v34  ;;  %3398 = vmatmul.mubr.f32.vlgmr.msra.gmra.mrb[6].mxu0 %v17543_v17  ;;  %v15580_v47 = vpack.c.bf16 %v4176_v23, %v4164_v22  ;;  %v3449_v62 = vand.u32 4294901760, %v18080_v52  ;;  %v18113_v1 = vld [vmem:[%s21772_s6 + $0x80] sm:$0xff]  ;;  %v18124_v41 = vsub.f32 %v18062_v5, %v3447_v16  ;;  %v3451_v18 = vand.u32 4294901760, %v18093_v61 }
 0x17a   : > { %15449 = vmatpush1.bf16.msra.mxu1 %v17837_v38  ;;  %15569 = vmatpush1.bf16.msra.mxu0 %v18009_v27  ;;  %v15584_v29 = vpack.c.bf16 %v17964_v56, %v17961_v45  ;;  %v18133_v13 = vsub.f32 %v18075_v28, %v3445_v9  ;;  %v3457_v12 = vand.u32 4294901760, %v18118_v0  ;;  %v15586_v19 = vpack.c.bf16 %v17977_v35, %v17974_v37  ;;  %v18270_v37 = vld [vmem:[%s21772_s6 + $0xf8] sm:$0xff] }
 0x17b   : > { %2529 = vmatprep.mubr.f32.mxu1 %v22035_v53  ;;  %3403 = vmatprep.mubr.f32.mxu0 %v22035_v53  ;;  %v18146_v8 = vsub.f32 %v18093_v61, %v3451_v18  ;;  %v18149_v5 = vsub.f32 %v18098_v10, %v3455_v54  ;;  %v15588_v22 = vpack.c.bf16 %v17990_v43, %v17987_v48  ;;  %v18290_v48 = vld [vmem:[%s21772_s6 + $0xf0] sm:$0xff] }
 0x17c   : > { %15451 = vmatprep.subr.bf16.mxu1 %v17850_v49  ;;  %15571 = vmatprep.subr.bf16.mxu0 %v18022_v58  ;;  %v18162_v23 = vsub.f32 %v18118_v0, %v3457_v12  ;;  %v3546_v28 = vand.u32 4294901760, %v18133_v13  ;;  %v15600_v20 = vpack.c.bf16 %v4150_v60, %v4138_v63  ;;  %v15602_v56 = vpack.c.bf16 %v4168_v42, %v4156_v50 }
 0x17d   : > { %2532 = vmatmul.mubr.f32.gmra.mrb[12].mxu1 %v17546_v30  ;;  %3405 = vmatmul.mubr.f32.gmra.mrb[8].mxu0 %v17540_v4  ;;  %v3564_v61 = vand.u32 4294901760, %v18146_v8  ;;  %v3576_v10 = vand.u32 4294901760, %v18149_v5  ;;  %v15604_v50 = vpack.c.bf16 %v4174_v57, %v4162_v11 }
 0x17e   : > { %15453 = vmatpush1.bf16.msra.mxu1 %v17862_v31  ;;  %15573 = vmatpush1.bf16.msra.mxu0 %v18034_v44 }
 0x17f   : > { %2610 = vmatprep.mubr.f32.mxu1 %v22035_v53  ;;  %4107 = vmatprep.mubr.f32.mxu0 %v22035_v53 }
 0x180   : > { %15455 = vmatprep.subr.bf16.mxu1 %v15454_v21  ;;  %15575 = vmatprep.subr.bf16.mxu0 %v15574_v24  ;;  %v18136_v21 = vsub.f32 %v18080_v52, %v3449_v62  ;;  %v3453_v24 = vand.u32 4294901760, %v18113_v1 }
 0x181   : > { %2614 = vmatmul.mubr.f32.vlgmr.msra.gmra.mrb[10].mxu1 %v17560_v2  ;;  %4113 = vmatmul.mubr.f32.vlgmr.msra.gmra.mrb[10].mxu0 %v17572_v40 }
 0x182   : > { %15457 = vmatpush1.bf16.msra.mxu1 %v15456_v3  ;;  %15577 = vmatpush1.bf16.msra.mxu0 %v15576_v14  ;;  %v3540_v3 = vand.u32 4294901760, %v18121_v46  ;;  %v3552_v14 = vand.u32 4294901760, %v18124_v41  ;;  %v3558_v52 = vand.u32 4294901760, %v18136_v21  ;;  %v18206_v0 = vpack.c.bf16 %v3457_v12, %v3453_v24 }
 0x183   : > { %2619 = vmatprep.mubr.f32.mxu1 %v22035_v53  ;;  %4118 = vmatprep.mubr.f32.mxu0 %v22035_v53  ;;  %v15598_v12 = vpack.c.bf16 %v4144_v33, %v4132_v32 }
 0x184   : > { %15459 = vmatprep.subr.bf16.mxu1 %v15458_v6  ;;  %15579 = vmatprep.subr.bf16.mxu0 %v15578_v55  ;;  %v18168_v6 = vpack.c.bf16 %v3447_v16, %v3443_v25  ;;  %v3553_v55 = vsub.f32 %v18124_v41, %v3552_v14  ;;  %v18181_v25 = vpack.c.bf16 %v3449_v62, %v3445_v9 }
 0x185   : > { %2623 = vmatmul.mubr.f32.gmra.mrb[12].mxu1 %v17557_v59  ;;  %4124 = vmatmul.mubr.f32.gmra.mrb[12].mxu0 %v17582_v51  ;;  %v3559_v16 = vsub.f32 %v18136_v21, %v3558_v52  ;;  %v18194_v9 = vpack.c.bf16 %v3455_v54, %v3451_v18 }
 0x186   : > { %15461 = vmatpush1.bf16.msra.mxu1 %v15460_v15  ;;  %15581 = vmatpush1.bf16.msra.mxu0 %v15580_v47  ;;  %v3582_v47 = vand.u32 4294901760, %v18162_v23  ;;  %v3554_v62 = vand.u32 4294901760, %v3553_v55  ;;  %v18229_v55 = vld [vmem:[%s21772_s6 + $0x38] sm:$0xff] }
 0x187   : > { %2717 = vmatprep.mubr.f32.mxu1 %v22035_v53  ;;  %4234 = vmatprep.mubr.f32.mxu0 %v22035_v53  ;;  %v3560_v54 = vand.u32 4294901760, %v3559_v16  ;;  %v18247_v16 = vld [vmem:[%s21772_s6 + $0x30] sm:$0xff]  ;;  %v5219_v63 = vand.u32 4294901760, %v18229_v55 }
 0x188   : > { %15463 = vmatprep.subr.bf16.mxu1 %v17824_v36  ;;  %15583 = vmatprep.subr.bf16.mxu0 %v15582_v39  ;;  %v18159_v36 = vsub.f32 %v18113_v1, %v3453_v24  ;;  %v3565_v39 = vsub.f32 %v18146_v8, %v3564_v61  ;;  %v3577_v1 = vsub.f32 %v18149_v5, %v3576_v10  ;;  %v5221_v42 = vand.u32 4294901760, %v18247_v16 }
 0x189   : > { %2719 = vmatmul.mubr.f32.vlgmr.msra.gmra.mrb[10].mxu1 %v17543_v17  ;;  %4236 = vmatmul.mubr.f32.vlgmr.msra.gmra.mrb[10].mxu0 %v17543_v17  ;;  %v18293_v43 = vsub.f32 %v18229_v55, %v5219_v63 }
 0x18a   : > { %15465 = vmatpush1.bf16.msra.mxu1 %v17837_v38  ;;  %15585 = vmatpush1.bf16.msra.mxu0 %v15584_v29  ;;  %v3541_v38 = vsub.f32 %v18121_v46, %v3540_v3  ;;  %v3570_v15 = vand.u32 4294901760, %v18159_v36 }
 0x18b   : > { %2724 = vmatprep.mubr.f32.mxu1 %v22035_v53  ;;  %4241 = vmatprep.mubr.f32.mxu0 %v22035_v53 }
 0x18c   : > { %15467 = vmatprep.subr.bf16.mxu1 %v17850_v49  ;;  %15587 = vmatprep.subr.bf16.mxu0 %v15586_v19  ;;  %v3547_v49 = vsub.f32 %v18133_v13, %v3546_v28  ;;  %v3571_v29 = vsub.f32 %v18159_v36, %v3570_v15  ;;  %v3583_v19 = vsub.f32 %v18162_v23, %v3582_v47 }
 0x18d   : > { %2726 = vmatmul.mubr.f32.gmra.mrb[12].mxu1 %v17540_v4  ;;  %4243 = vmatmul.mubr.f32.gmra.mrb[12].mxu0 %v17540_v4 }
 0x18e   : > { %15469 = vmatpush1.bf16.msra.mxu1 %v17862_v31  ;;  %15589 = vmatpush1.bf16.msra.mxu0 %v15588_v22  ;;  %v3542_v31 = vand.u32 4294901760, %v3541_v38  ;;  %v3548_v18 = vand.u32 4294901760, %v3547_v49  ;;  %v3566_v22 = vand.u32 4294901760, %v3565_v39  ;;  %v3578_v38 = vand.u32 4294901760, %v3577_v1  ;;  %v18234_v49 = vld [vmem:[%s21772_s6 + $0x78] sm:$0xff] }
 0x18f   : > { %2804 = vmatprep.mubr.f32.mxu1 %v22035_v53  ;;  %4329 = vmatprep.mubr.f32.mxu0 %v22035_v53  ;;  %v3572_v32 = vand.u32 4294901760, %v3571_v29  ;;  %v3584_v33 = vand.u32 4294901760, %v3583_v19  ;;  %v5223_v60 = vand.u32 4294901760, %v18234_v49  ;;  %v15534_v1 = vpack.c.bf16 %v18124_v41, %v18121_v46 }
 0x190   : > { %15519 = vmatprep.subr.bf16.mxu1 %v18168_v6  ;;  %15591 = vmatprep.subr.bf16.mxu0 %v17996_v7  ;;  %v15526_v24 = vpack.c.bf16 %v3554_v62, %v3542_v31  ;;  %v15528_v26 = vpack.c.bf16 %v3560_v54, %v3548_v18  ;;  %v18252_v31 = vld [vmem:[%s21772_s6 + $0x70] sm:$0xff]  ;;  %v15530_v45 = vpack.c.bf16 %v3578_v38, %v3566_v22  ;;  %v18265_v62 = vld [vmem:[%s21772_s6 + $0xb8] sm:$0xff]  ;;  %v5231_v54 = vand.u32 4294901760, %v18270_v37 }
 0x191   : > { %2806 = vmatmul.mubr.f32.vlgmr.msra.gmra.mrb[10].mxu1 %v17543_v17  ;;  %4332 = vmatmul.mubr.f32.vlgmr.msra.gmra.mrb[10].mxu0 %v17549_v34  ;;  %v15532_v35 = vpack.c.bf16 %v3584_v33, %v3572_v32  ;;  %v5225_v39 = vand.u32 4294901760, %v18252_v31  ;;  %v18285_v18 = vld [vmem:[%s21772_s6 + $0xb0] sm:$0xff]  ;;  %v18296_v11 = vsub.f32 %v18234_v49, %v5223_v60  ;;  %v5227_v57 = vand.u32 4294901760, %v18265_v62 }
 0x192   : > { %15521 = vmatpush1.bf16.msra.mxu1 %v18181_v25  ;;  %15593 = vmatpush1.bf16.msra.mxu0 %v18009_v27  ;;  %v15536_v29 = vpack.c.bf16 %v18136_v21, %v18133_v13  ;;  %v18305_v19 = vsub.f32 %v18247_v16, %v5221_v42  ;;  %v5233_v22 = vand.u32 4294901760, %v18290_v48  ;;  %v15538_v38 = vpack.c.bf16 %v18149_v5, %v18146_v8  ;;  %v18442_v8 = vld [vmem:[%s21772_s6 + $0xe8] sm:$0xff] }
 0x193   : > { %2811 = vmatprep.mubr.f32.mxu1 %v22035_v53  ;;  %4337 = vmatprep.mubr.f32.mxu0 %v22035_v53  ;;  %v18318_v55 = vsub.f32 %v18265_v62, %v5227_v57  ;;  %v18321_v49 = vsub.f32 %v18270_v37, %v5231_v54  ;;  %v15540_v32 = vpack.c.bf16 %v18162_v23, %v18159_v36  ;;  %v18462_v36 = vld [vmem:[%s21772_s6 + $0xe0] sm:$0xff] }
 0x194   : > { %15523 = vmatprep.subr.bf16.mxu1 %v18194_v9  ;;  %15595 = vmatprep.subr.bf16.mxu0 %v18022_v58  ;;  %v18334_v33 = vsub.f32 %v18290_v48, %v5233_v22  ;;  %v5322_v16 = vand.u32 4294901760, %v18305_v19  ;;  %v15552_v46 = vpack.c.bf16 %v3558_v52, %v3546_v28  ;;  %v15554_v13 = vpack.c.bf16 %v3576_v10, %v3564_v61 }
 0x195   : > { %2813 = vmatmul.mubr.f32.gmra.mrb[12].mxu1 %v17540_v4  ;;  %4340 = vmatmul.mubr.f32.gmra.mrb[12].mxu0 %v17546_v30  ;;  %v5340_v62 = vand.u32 4294901760, %v18318_v55  ;;  %v5352_v37 = vand.u32 4294901760, %v18321_v49  ;;  %v15556_v5 = vpack.c.bf16 %v3582_v47, %v3570_v15 }
 0x196   : > { %15525 = vmatpush1.bf16.msra.mxu1 %v18206_v0  ;;  %15597 = vmatpush1.bf16.msra.mxu0 %v18034_v44 }
 0x197   : > { %3515 = vmatprep.mubr.f32.mxu1 %v22035_v53  ;;  %4418 = vmatprep.mubr.f32.mxu0 %v22035_v53 }
 0x198   : > { %15527 = vmatprep.subr.bf16.mxu1 %v15526_v24  ;;  %15599 = vmatprep.subr.bf16.mxu0 %v15598_v12  ;;  %v18308_v24 = vsub.f32 %v18252_v31, %v5225_v39  ;;  %v5229_v12 = vand.u32 4294901760, %v18285_v18 }
 0x199   : > { %3521 = vmatmul.mubr.f32.vlgmr.msra.gmra.mrb[14].mxu1 %v17572_v40  ;;  %4422 = vmatmul.mubr.f32.vlgmr.msra.gmra.mrb[10].mxu0 %v17560_v2 }
 0x19a   : > { %15529 = vmatpush1.bf16.msra.mxu1 %v15528_v26  ;;  %15601 = vmatpush1.bf16.msra.mxu0 %v15600_v20  ;;  %v5316_v26 = vand.u32 4294901760, %v18293_v43  ;;  %v5328_v20 = vand.u32 4294901760, %v18296_v11  ;;  %v5334_v31 = vand.u32 4294901760, %v18308_v24  ;;  %v18378_v48 = vpack.c.bf16 %v5233_v22, %v5229_v12 }
 0x19b   : > { %3526 = vmatprep.mubr.f32.mxu1 %v22035_v53  ;;  %4427 = vmatprep.mubr.f32.mxu0 %v22035_v53 }
 0x19c   : > { %15531 = vmatprep.subr.bf16.mxu1 %v15530_v45  ;;  %15603 = vmatprep.subr.bf16.mxu0 %v15602_v56  ;;  %v18340_v45 = vpack.c.bf16 %v5223_v60, %v5219_v63  ;;  %v5329_v56 = vsub.f32 %v18296_v11, %v5328_v20  ;;  %v18353_v63 = vpack.c.bf16 %v5225_v39, %v5221_v42 }
 0x19d   : > { %3532 = vmatmul.mubr.f32.gmra.mrb[16].mxu1 %v17582_v51  ;;  %4431 = vmatmul.mubr.f32.gmra.mrb[12].mxu0 %v17557_v59  ;;  %v5335_v60 = vsub.f32 %v18308_v24, %v5334_v31  ;;  %v18366_v42 = vpack.c.bf16 %v5231_v54, %v5227_v57 }
 0x19e   : > { %15533 = vmatpush1.bf16.msra.mxu1 %v15532_v35  ;;  %15605 = vmatpush1.bf16.msra.mxu0 %v15604_v50  ;;  %v5358_v50 = vand.u32 4294901760, %v18334_v33  ;;  %v5330_v39 = vand.u32 4294901760, %v5329_v56  ;;  %v18401_v56 = vld [vmem:[%s21772_s6 + $0x28] sm:$0xff] }
 0x19f   : > { %3642 = vmatprep.mubr.f32.mxu1 %v22035_v53  ;;  %4525 = vmatprep.mubr.f32.mxu0 %v22035_v53  ;;  %v5336_v54 = vand.u32 4294901760, %v5335_v60  ;;  %v18419_v60 = vld [vmem:[%s21772_s6 + $0x20] sm:$0xff]  ;;  %v4627_v28 = vand.u32 4294901760, %v18401_v56 }
 0x1a0   : > { %15535 = vmatprep.subr.bf16.mxu1 %v15534_v1  ;;  %15607 = vmatprep.subr.bf16.mxu0 %v17996_v7  ;;  %v18331_v7 = vsub.f32 %v18285_v18, %v5229_v12  ;;  %v5341_v1 = vsub.f32 %v18318_v55, %v5340_v62  ;;  %v5353_v18 = vsub.f32 %v18321_v49, %v5352_v37  ;;  %v4629_v10 = vand.u32 4294901760, %v18419_v60 }
 0x1a1   : > { %3644 = vmatmul.mubr.f32.vlgmr.msra.gmra.mrb[14].mxu1 %v17543_v17  ;;  %4527 = vmatmul.mubr.f32.vlgmr.msra.gmra.mrb[10].mxu0 %v17543_v17  ;;  %v15550_v12 = vpack.c.bf16 %v3552_v14, %v3540_v3  ;;  %v18465_v23 = vsub.f32 %v18401_v56, %v4627_v28 }
 0x1a2   : > { %15537 = vmatpush1.bf16.msra.mxu1 %v15536_v29  ;;  %15609 = vmatpush1.bf16.msra.mxu0 %v18009_v27  ;;  %v5317_v27 = vsub.f32 %v18293_v43, %v5316_v26  ;;  %v5346_v35 = vand.u32 4294901760, %v18331_v7 }
 0x1a3   : > { %3649 = vmatprep.mubr.f32.mxu1 %v22035_v53  ;;  %4532 = vmatprep.mubr.f32.mxu0 %v22035_v53 }
 0x1a4   : > { %15539 = vmatprep.subr.bf16.mxu1 %v15538_v38  ;;  %15611 = vmatprep.subr.bf16.mxu0 %v18022_v58  ;;  %v5323_v58 = vsub.f32 %v18305_v19, %v5322_v16  ;;  %v5347_v29 = vsub.f32 %v18331_v7, %v5346_v35  ;;  %v5359_v38 = vsub.f32 %v18334_v33, %v5358_v50 }
 0x1a5   : > { %3651 = vmatmul.mubr.f32.gmra.mrb[16].mxu1 %v17540_v4  ;;  %4534 = vmatmul.mubr.f32.gmra.mrb[12].mxu0 %v17540_v4 }
 0x1a6   : > { %15541 = vmatpush1.bf16.msra.mxu1 %v15540_v32  ;;  %15613 = vmatpush1.bf16.msra.mxu0 %v18034_v44  ;;  %v5318_v44 = vand.u32 4294901760, %v5317_v27  ;;  %v5324_v57 = vand.u32 4294901760, %v5323_v58  ;;  %v5342_v32 = vand.u32 4294901760, %v5341_v1  ;;  %v5354_v27 = vand.u32 4294901760, %v5353_v18  ;;  %v18406_v58 = vld [vmem:[%s21772_s6 + $0x68] sm:$0xff] }
 0x1a7   : > { %3737 = vmatprep.mubr.f32.mxu1 %v22035_v53  ;;  %4612 = vmatprep.mubr.f32.mxu0 %v22035_v53  ;;  %v5348_v3 = vand.u32 4294901760, %v5347_v29  ;;  %v5360_v14 = vand.u32 4294901760, %v5359_v38  ;;  %v4631_v52 = vand.u32 4294901760, %v18406_v58  ;;  %v15678_v18 = vpack.c.bf16 %v18296_v11, %v18293_v43 }
 0x1a8   : > { %15543 = vmatprep.subr.bf16.mxu1 %v18168_v6  ;;  %15663 = vmatprep.subr.bf16.mxu0 %v18340_v45  ;;  %v15670_v22 = vpack.c.bf16 %v5330_v39, %v5318_v44  ;;  %v15672_v41 = vpack.c.bf16 %v5336_v54, %v5324_v57  ;;  %v18424_v44 = vld [vmem:[%s21772_s6 + $0x60] sm:$0xff]  ;;  %v15674_v21 = vpack.c.bf16 %v5354_v27, %v5342_v32  ;;  %v18437_v39 = vld [vmem:[%s21772_s6 + $0xa8] sm:$0xff]  ;;  %v4639_v54 = vand.u32 4294901760, %v18442_v8 }
 0x1a9   : > { %3740 = vmatmul.mubr.f32.vlgmr.msra.gmra.mrb[14].mxu1 %v17549_v34  ;;  %4614 = vmatmul.mubr.f32.vlgmr.msra.gmra.mrb[10].mxu0 %v17543_v17  ;;  %v15676_v61 = vpack.c.bf16 %v5360_v14, %v5348_v3  ;;  %v4633_v1 = vand.u32 4294901760, %v18424_v44  ;;  %v18457_v57 = vld [vmem:[%s21772_s6 + $0xa0] sm:$0xff]  ;;  %v18468_v15 = vsub.f32 %v18406_v58, %v4631_v52  ;;  %v4635_v47 = vand.u32 4294901760, %v18437_v39 }
 0x1aa   : > { %15545 = vmatpush1.bf16.msra.mxu1 %v18181_v25  ;;  %15665 = vmatpush1.bf16.msra.mxu0 %v18353_v63  ;;  %v15680_v29 = vpack.c.bf16 %v18308_v24, %v18305_v19  ;;  %v18477_v38 = vsub.f32 %v18419_v60, %v4629_v10  ;;  %v4641_v32 = vand.u32 4294901760, %v18462_v36  ;;  %v15682_v27 = vpack.c.bf16 %v18321_v49, %v18318_v55 }
 0x1ab   : > { %3745 = vmatprep.mubr.f32.mxu1 %v22035_v53  ;;  %4619 = vmatprep.mubr.f32.mxu0 %v22035_v53  ;;  %v18490_v56 = vsub.f32 %v18437_v39, %v4635_v47  ;;  %v18493_v58 = vsub.f32 %v18442_v8, %v4639_v54  ;;  %v15684_v3 = vpack.c.bf16 %v18334_v33, %v18331_v7 }
 0x1ac   : > { %15547 = vmatprep.subr.bf16.mxu1 %v18194_v9  ;;  %15667 = vmatprep.subr.bf16.mxu0 %v18366_v42  ;;  %v18506_v14 = vsub.f32 %v18462_v36, %v4641_v32  ;;  %v4730_v60 = vand.u32 4294901760, %v18477_v38  ;;  %v15700_v24 = vpack.c.bf16 %v5358_v50, %v5346_v35  ;;  %v15630_v55 = vpack.c.bf16 %v18468_v15, %v18465_v23  ;;  %v385_v50 = vld [vmem:[%s21773_s7 + $0x90] sm:$0xff] }
 0x1ad   : > { %3748 = vmatmul.mubr.f32.gmra.mrb[16].mxu1 %v17546_v30  ;;  %4621 = vmatmul.mubr.f32.gmra.mrb[12].mxu0 %v17540_v4  ;;  %v4748_v39 = vand.u32 4294901760, %v18490_v56  ;;  %v4760_v8 = vand.u32 4294901760, %v18493_v58  ;;  %v15634_v49 = vpack.c.bf16 %v18493_v58, %v18490_v56 }
 0x1ae   : > { %15549 = vmatpush1.bf16.msra.mxu1 %v18206_v0  ;;  %15669 = vmatpush1.bf16.msra.mxu0 %v18378_v48 }
 0x1af   : > { %3826 = vmatprep.mubr.f32.mxu1 %v22035_v53  ;;  %5291 = vmatprep.mubr.f32.mxu0 %v22035_v53  ;;  %v15650_v7 = vpack.c.bf16 %v4760_v8, %v4748_v39 }
 0x1b0   : > { %15551 = vmatprep.subr.bf16.mxu1 %v15550_v12  ;;  %15671 = vmatprep.subr.bf16.mxu0 %v15670_v22  ;;  %v18480_v12 = vsub.f32 %v18424_v44, %v4633_v1  ;;  %v4637_v22 = vand.u32 4294901760, %v18457_v57 }
 0x1b1   : > { %3830 = vmatmul.mubr.f32.vlgmr.msra.gmra.mrb[14].mxu1 %v17560_v2  ;;  %5297 = vmatmul.mubr.f32.vlgmr.msra.gmra.mrb[14].mxu0 %v17572_v40 }
 0x1b2   : > { %15553 = vmatpush1.bf16.msra.mxu1 %v15552_v46  ;;  %15673 = vmatpush1.bf16.msra.mxu0 %v15672_v41  ;;  %v4724_v46 = vand.u32 4294901760, %v18465_v23  ;;  %v4736_v41 = vand.u32 4294901760, %v18468_v15  ;;  %v4742_v44 = vand.u32 4294901760, %v18480_v12  ;;  %v18550_v36 = vpack.c.bf16 %v4641_v32, %v4637_v22 }
 0x1b3   : > { %3835 = vmatprep.mubr.f32.mxu1 %v22035_v53  ;;  %5302 = vmatprep.mubr.f32.mxu0 %v22035_v53  ;;  %v15694_v32 = vpack.c.bf16 %v5328_v20, %v5316_v26  ;;  %v15698_v26 = vpack.c.bf16 %v5352_v37, %v5340_v62 }
 0x1b4   : > { %15555 = vmatprep.subr.bf16.mxu1 %v15554_v13  ;;  %15675 = vmatprep.subr.bf16.mxu0 %v15674_v21  ;;  %v18512_v13 = vpack.c.bf16 %v4631_v52, %v4627_v28  ;;  %v4737_v21 = vsub.f32 %v18468_v15, %v4736_v41  ;;  %v18525_v28 = vpack.c.bf16 %v4633_v1, %v4629_v10 }
 0x1b5   : > { %3839 = vmatmul.mubr.f32.gmra.mrb[16].mxu1 %v17557_v59  ;;  %5308 = vmatmul.mubr.f32.gmra.mrb[16].mxu0 %v17582_v51  ;;  %v4743_v52 = vsub.f32 %v18480_v12, %v4742_v44  ;;  %v18538_v10 = vpack.c.bf16 %v4639_v54, %v4635_v47  ;;  %v15646_v20 = vpack.c.bf16 %v4736_v41, %v4724_v46 }
 0x1b6   : > { %15557 = vmatpush1.bf16.msra.mxu1 %v15556_v5  ;;  %15677 = vmatpush1.bf16.msra.mxu0 %v15676_v61  ;;  %v4766_v61 = vand.u32 4294901760, %v18506_v14  ;;  %v4738_v1 = vand.u32 4294901760, %v4737_v21 }
 0x1b7   : > { %3933 = vmatprep.mubr.f32.mxu1 %v22035_v53  ;;  %5418 = vmatprep.mubr.f32.mxu0 %v22035_v53  ;;  %v4744_v54 = vand.u32 4294901760, %v4743_v52 }
 0x1b8   : > { %15559 = vmatprep.subr.bf16.mxu1 %v18168_v6  ;;  %15679 = vmatprep.subr.bf16.mxu0 %v15678_v18  ;;  %v18503_v6 = vsub.f32 %v18457_v57, %v4637_v22  ;;  %v4749_v18 = vsub.f32 %v18490_v56, %v4748_v39  ;;  %v4761_v57 = vsub.f32 %v18493_v58, %v4760_v8 }
 0x1b9   : > { %3935 = vmatmul.mubr.f32.vlgmr.msra.gmra.mrb[14].mxu1 %v17543_v17  ;;  %5420 = vmatmul.mubr.f32.vlgmr.msra.gmra.mrb[14].mxu0 %v17543_v17 }
 0x1ba   : > { %15561 = vmatpush1.bf16.msra.mxu1 %v18181_v25  ;;  %15681 = vmatpush1.bf16.msra.mxu0 %v15680_v29  ;;  %v4725_v25 = vsub.f32 %v18465_v23, %v4724_v46  ;;  %v4754_v5 = vand.u32 4294901760, %v18503_v6  ;;  %v5882_v23 = vand.u32 4294901760, %v385_v50 }
 0x1bb   : > { %3940 = vmatprep.mubr.f32.mxu1 %v22035_v53  ;;  %5425 = vmatprep.mubr.f32.mxu0 %v22035_v53 }
 0x1bc   : > { %15563 = vmatprep.subr.bf16.mxu1 %v18194_v9  ;;  %15683 = vmatprep.subr.bf16.mxu0 %v15682_v27  ;;  %v4731_v9 = vsub.f32 %v18477_v38, %v4730_v60  ;;  %v4755_v29 = vsub.f32 %v18503_v6, %v4754_v5  ;;  %v4767_v27 = vsub.f32 %v18506_v14, %v4766_v61 }
 0x1bd   : > { %3942 = vmatmul.mubr.f32.gmra.mrb[16].mxu1 %v17540_v4  ;;  %5427 = vmatmul.mubr.f32.gmra.mrb[16].mxu0 %v17540_v4  ;;  %v18692_v41 = vsub.f32 %v385_v50, %v5882_v23  ;;  %v377_v50 = vld [vmem:[%s21773_s7 + $0x50] sm:$0xff] }
 0x1be   : > { %15565 = vmatpush1.bf16.msra.mxu1 %v18206_v0  ;;  %15685 = vmatpush1.bf16.msra.mxu0 %v15684_v3  ;;  %v4726_v0 = vand.u32 4294901760, %v4725_v25  ;;  %v4732_v47 = vand.u32 4294901760, %v4731_v9  ;;  %v4750_v3 = vand.u32 4294901760, %v4749_v18  ;;  %v4762_v25 = vand.u32 4294901760, %v4761_v57 }
 0x1bf   : > { %4020 = vmatprep.mubr.f32.mxu1 %v22035_v53  ;;  %5513 = vmatprep.mubr.f32.mxu0 %v22035_v53  ;;  %v15696_v9 = vpack.c.bf16 %v5334_v31, %v5322_v16  ;;  %v4756_v43 = vand.u32 4294901760, %v4755_v29  ;;  %v4768_v52 = vand.u32 4294901760, %v4767_v27  ;;  %v367_v31 = vld [vmem:[%s21773_s7] sm:$0xff]  ;;  %v389_v27 = vld [vmem:[%s21773_s7 + $0xb0] sm:$0xff] }
 0x1c0   : > { %15615 = vmatprep.subr.bf16.mxu1 %v18512_v13  ;;  %15687 = vmatprep.subr.bf16.mxu0 %v18340_v45  ;;  %v15622_v22 = vpack.c.bf16 %v4738_v1, %v4726_v0  ;;  %v15624_v21 = vpack.c.bf16 %v4744_v54, %v4732_v47  ;;  %v15626_v11 = vpack.c.bf16 %v4762_v25, %v4750_v3  ;;  %v5894_v3 = vand.u32 4294901760, %v389_v27 }
 0x1c1   : > { %4022 = vmatmul.mubr.f32.vlgmr.msra.gmra.mrb[14].mxu1 %v17543_v17  ;;  %5516 = vmatmul.mubr.f32.vlgmr.msra.gmra.mrb[14].mxu0 %v17549_v34  ;;  %v15628_v19 = vpack.c.bf16 %v4768_v52, %v4756_v43 }
 0x1c2   : > { %15617 = vmatpush1.bf16.msra.mxu1 %v18525_v28  ;;  %15689 = vmatpush1.bf16.msra.mxu0 %v18353_v63 }
 0x1c3   : > { %4027 = vmatprep.mubr.f32.mxu1 %v22035_v53  ;;  %5521 = vmatprep.mubr.f32.mxu0 %v22035_v53 }
 0x1c4   : > { %15619 = vmatprep.subr.bf16.mxu1 %v18538_v10  ;;  %15691 = vmatprep.subr.bf16.mxu0 %v18366_v42 }
 0x1c5   : > { %4029 = vmatmul.mubr.f32.gmra.mrb[16].mxu1 %v17540_v4  ;;  %5524 = vmatmul.mubr.f32.gmra.mrb[16].mxu0 %v17546_v30 }
 0x1c6   : > { %15621 = vmatpush1.bf16.msra.mxu1 %v18550_v36  ;;  %15693 = vmatpush1.bf16.msra.mxu0 %v18378_v48 }
 0x1c7   : > { %4699 = vmatprep.mubr.f32.mxu1 %v22035_v53  ;;  %5602 = vmatprep.mubr.f32.mxu0 %v22035_v53 }
 0x1c8   : > { %15623 = vmatprep.subr.bf16.mxu1 %v15622_v22  ;;  %15695 = vmatprep.subr.bf16.mxu0 %v15694_v32  ;;  %v390_v22 = vld [vmem:[%s21773_s7 + $0xb8] sm:$0xff] }
 0x1c9   : > { %4705 = vmatmul.mubr.f32.vlgmr.msra.gmra.mrb[18].mxu1 %v17572_v40  ;;  %5606 = vmatmul.mubr.f32.vlgmr.msra.gmra.mrb[14].mxu0 %v17560_v2  ;;  %v15632_v40 = vpack.c.bf16 %v18480_v12, %v18477_v38  ;;  %v369_v38 = vld [vmem:[%s21773_s7 + $0x10] sm:$0xff]  ;;  %v370_v12 = vld [vmem:[%s21773_s7 + $0x18] sm:$0xff]  ;;  %v5897_v25 = vand.u32 4294901760, %v390_v22 }
 0x1ca   : > { %15625 = vmatpush1.bf16.msra.mxu1 %v15624_v21  ;;  %15697 = vmatpush1.bf16.msra.mxu0 %v15696_v9  ;;  %v5834_v58 = vand.u32 4294901760, %v369_v38  ;;  %v5837_v46 = vand.u32 4294901760, %v370_v12  ;;  %v373_v21 = vld [vmem:[%s21773_s7 + $0x30] sm:$0xff]  ;;  %v374_v9 = vld [vmem:[%s21773_s7 + $0x38] sm:$0xff] }
 0x1cb   : > { %4710 = vmatprep.mubr.f32.mxu1 %v22035_v53  ;;  %5611 = vmatprep.mubr.f32.mxu0 %v22035_v53  ;;  %v5846_v52 = vand.u32 4294901760, %v373_v21 }
 0x1cc   : > { %15627 = vmatprep.subr.bf16.mxu1 %v15626_v11  ;;  %15699 = vmatprep.subr.bf16.mxu0 %v15698_v26  ;;  %v5849_v11 = vand.u32 4294901760, %v374_v9 }
 0x1cd   : > { %4716 = vmatmul.mubr.f32.gmra.mrb[20].mxu1 %v17582_v51  ;;  %5615 = vmatmul.mubr.f32.gmra.mrb[16].mxu0 %v17557_v59  ;;  %v15636_v51 = vpack.c.bf16 %v18506_v14, %v18503_v6  ;;  %v18696_v14 = vsub.f32 %v369_v38, %v5834_v58  ;;  %v378_v38 = vld [vmem:[%s21773_s7 + $0x58] sm:$0xff] }
 0x1ce   : > { %15629 = vmatpush1.bf16.msra.mxu1 %v15628_v19  ;;  %15701 = vmatpush1.bf16.msra.mxu0 %v15700_v24  ;;  %v18748_v19 = vsub.f32 %v389_v27, %v5894_v3  ;;  %v18750_v24 = vsub.f32 %v390_v22, %v5897_v25  ;;  %v395_v22 = vld [vmem:[%s21773_s7 + $0xe0] sm:$0xff] }
 0x1cf   : > { %4826 = vmatprep.mubr.f32.mxu1 %v22035_v53  ;;  %5709 = vmatprep.mubr.f32.mxu0 %v22035_v53 }
 0x1d0   : > { %15631 = vmatprep.subr.bf16.mxu1 %v15630_v55  ;;  %15703 = vmatprep.subr.bf16.mxu0 %v18340_v45  ;;  %v5828_v45 = vand.u32 4294901760, %v367_v31  ;;  %v18752_v55 = vpack.c.bf16 %v5837_v46, %v5834_v58 }
 0x1d1   : > { %4828 = vmatmul.mubr.f32.vlgmr.msra.gmra.mrb[18].mxu1 %v17543_v17  ;;  %5711 = vmatmul.mubr.f32.vlgmr.msra.gmra.mrb[14].mxu0 %v17543_v17 }
 0x1d2   : > { %15633 = vmatpush1.bf16.msra.mxu1 %v15632_v40  ;;  %15705 = vmatpush1.bf16.msra.mxu0 %v18353_v63  ;;  %v18672_v63 = vsub.f32 %v367_v31, %v5828_v45  ;;  %22039 = vst [vmem:[#allocation10_spill] sm:$0xff] %v18752_v55  ;;  %v18754_v40 = vsub.f32 %v373_v21, %v5846_v52 }
 0x1d3   : > { %4833 = vmatprep.mubr.f32.mxu1 %v22035_v53  ;;  %5716 = vmatprep.mubr.f32.mxu0 %v22035_v53 }
 0x1d4   : > { %15635 = vmatprep.subr.bf16.mxu1 %v15634_v49  ;;  %15707 = vmatprep.subr.bf16.mxu0 %v18366_v42  ;;  %v386_v42 = vld [vmem:[%s21773_s7 + $0x98] sm:$0xff]  ;;  %v18756_v49 = vsub.f32 %v374_v9, %v5849_v11  ;;  %v379_v9 = vld [vmem:[%s21773_s7 + $0x60] sm:$0xff] }
 0x1d5   : > { %4835 = vmatmul.mubr.f32.gmra.mrb[20].mxu1 %v17540_v4  ;;  %5718 = vmatmul.mubr.f32.gmra.mrb[16].mxu0 %v17540_v4  ;;  %v5885_v15 = vand.u32 4294901760, %v386_v42 }
 0x1d6   : > { %15637 = vmatpush1.bf16.msra.mxu1 %v15636_v51  ;;  %15709 = vmatpush1.bf16.msra.mxu0 %v18378_v48  ;;  %v391_v51 = vld [vmem:[%s21773_s7 + $0xc0] sm:$0xff] }
 0x1d7   : > { %4921 = vmatprep.mubr.f32.mxu1 %v22035_v53  ;;  %5796 = vmatprep.mubr.f32.mxu0 %v22035_v53  ;;  %v18694_v6 = vsub.f32 %v386_v42, %v5885_v15  ;;  %v18746_v26 = vpack.c.bf16 %v5885_v15, %v5882_v23  ;;  %v18793_v15 = vpack.c.bf16 %v5897_v25, %v5894_v3  ;;  %v5912_v25 = vand.u32 4294901760, %v395_v22 }
 0x1d8   : > { %15639 = vmatprep.subr.bf16.mxu1 %v18512_v13 }
 0x1d9   : > { %4924 = vmatmul.mubr.f32.vlgmr.msra.gmra.mrb[18].mxu1 %v17549_v34  ;;  %5798 = vmatmul.mubr.f32.vlgmr.msra.gmra.mrb[14].mxu0 %v17543_v17  ;;  %v15648_v34 = vpack.c.bf16 %v4742_v44, %v4730_v60  ;;  %v18698_v60 = vsub.f32 %v370_v12, %v5837_v46  ;;  %v387_v44 = vld [vmem:[%s21773_s7 + $0xa0] sm:$0xff]  ;;  %v15778_v39 = vpack.c.bf16 %v18694_v6, %v18692_v41 }
 0x1da   : > { %15641 = vmatpush1.bf16.msra.mxu1 %v18525_v28  ;;  %4929 = vmatprep.mubr.f32.mxu1 %v22035_v53  ;;  %v5888_v8 = vand.u32 4294901760, %v387_v44  ;;  %22038 = vst [vmem:[#allocation9_spill] sm:$0xff] %v18746_v26  ;;  %22042 = vst [vmem:[#allocation13_spill] sm:$0xff] %v18793_v15 }
 0x1db   : > { %5803 = vmatprep.mubr.f32.mxu0 %v22035_v53  ;;  %15643 = vmatprep.subr.bf16.mxu1 %v18538_v10 }
 0x1dc   : > { %v18718_v57 = vsub.f32 %v387_v44, %v5888_v8 }
 0x1dd   : > { %4932 = vmatmul.mubr.f32.gmra.mrb[20].mxu1 %v17546_v30  ;;  %5805 = vmatmul.mubr.f32.gmra.mrb[16].mxu0 %v17540_v4  ;;  %v15652_v30 = vpack.c.bf16 %v4766_v61, %v4754_v5  ;;  %v371_v5 = vld [vmem:[%s21773_s7 + $0x20] sm:$0xff]  ;;  %v372_v61 = vld [vmem:[%s21773_s7 + $0x28] sm:$0xff] }
 0x1de   : > { %15645 = vmatpush1.bf16.msra.mxu1 %v18550_v36  ;;  %5010 = vmatprep.mubr.f32.mxu1 %v22035_v53  ;;  %v5840_v0 = vand.u32 4294901760, %v371_v5  ;;  %v5843_v1 = vand.u32 4294901760, %v372_v61 }
 0x1df   : > { %15647 = vmatprep.subr.bf16.mxu1 %v15646_v20  ;;  %v392_v20 = vld [vmem:[%s21773_s7 + $0xc8] sm:$0xff] }
 0x1e0   : > { %v18724_v54 = vsub.f32 %v371_v5, %v5840_v0  ;;  %v18726_v29 = vsub.f32 %v372_v61, %v5843_v1  ;;  %v18778_v31 = vpack.c.bf16 %v5843_v1, %v5840_v0 }
 0x1e1   : > { %5014 = vmatmul.mubr.f32.vlgmr.msra.gmra.mrb[18].mxu1 %v17560_v2  ;;  %v384_v2 = vld [vmem:[%s21773_s7 + $0x88] sm:$0xff] }
 0x1e2   : > { %15649 = vmatpush1.bf16.msra.mxu1 %v15648_v34  ;;  %5019 = vmatprep.mubr.f32.mxu1 %v22035_v53  ;;  %v5879_v16 = vand.u32 4294901760, %v384_v2  ;;  %v15784_v43 = vpack.c.bf16 %v18726_v29, %v18724_v54  ;;  %v15786_v34 = vpack.c.bf16 %v18750_v24, %v18748_v19  ;;  %22041 = vst [vmem:[#allocation12_spill] sm:$0xff] %v18778_v31 }
 0x1e3   : > { %15651 = vmatprep.subr.bf16.mxu1 %v15650_v7  ;;  %v5900_v7 = vand.u32 4294901760, %v391_v51 }
 0x1e4   : > { %v18670_v37 = vsub.f32 %v384_v2, %v5879_v16  ;;  %v376_v2 = vld [vmem:[%s21773_s7 + $0x48] sm:$0xff] }
 0x1e5   : > { %5023 = vmatmul.mubr.f32.gmra.mrb[20].mxu1 %v17557_v59  ;;  %v383_v59 = vld [vmem:[%s21773_s7 + $0x80] sm:$0xff]  ;;  %v18789_v42 = vsub.f32 %v391_v51, %v5900_v7  ;;  %v5855_v23 = vand.u32 4294901760, %v376_v2 }
 0x1e6   : > { %15653 = vmatpush1.bf16.msra.mxu1 %v15652_v30  ;;  %5117 = vmatprep.mubr.f32.mxu1 %v22035_v53  ;;  %v5876_v33 = vand.u32 4294901760, %v383_v59  ;;  %v5903_v30 = vand.u32 4294901760, %v392_v20 }
 0x1e7   : > { %15655 = vmatprep.subr.bf16.mxu1 %v18512_v13  ;;  %v388_v13 = vld [vmem:[%s21773_s7 + $0xa8] sm:$0xff]  ;;  %v18803_v44 = vsub.f32 %v376_v2, %v5855_v23  ;;  %v398_v2 = vld [vmem:[%s21773_s7 + $0xf8] sm:$0xff] }
 0x1e8   : > { %v18668_v62 = vsub.f32 %v383_v59, %v5876_v33  ;;  %v18716_v18 = vpack.c.bf16 %v5879_v16, %v5876_v33  ;;  %v375_v59 = vld [vmem:[%s21773_s7 + $0x40] sm:$0xff]  ;;  %v15788_v33 = vpack.c.bf16 %v18756_v49, %v18754_v40  ;;  %v18812_v61 = vpack.c.bf16 %v5903_v30, %v5900_v7 }
 0x1e9   : > { %5119 = vmatmul.mubr.f32.vlgmr.msra.gmra.mrb[18].mxu1 %v17543_v17 }
 0x1ea   : > { %15657 = vmatpush1.bf16.msra.mxu1 %v18525_v28  ;;  %5124 = vmatprep.mubr.f32.mxu1 %v22035_v53  ;;  %v15774_v48 = vpack.c.bf16 %v18670_v37, %v18668_v62  ;;  %v5891_v28 = vand.u32 4294901760, %v388_v13  ;;  %22044 = vst [vmem:[#allocation15_spill] sm:$0xff] %v18812_v61 }
 0x1eb   : > { %15659 = vmatprep.subr.bf16.mxu1 %v18538_v10  ;;  %v15780_v10 = vpack.c.bf16 %v18698_v60, %v18696_v14  ;;  %15711 = vmatprep.subr.bf16.mxu0 %v18716_v18 }
 0x1ec   : > { %v18776_v16 = vpack.c.bf16 %v5891_v28, %v5888_v8  ;;  %v18806_v8 = vpack.c.bf16 %v5849_v11, %v5846_v52  ;;  %v5864_v11 = vand.u32 4294901760, %v379_v9 }
 0x1ed   : > { %5126 = vmatmul.mubr.f32.gmra.mrb[20].mxu1 %v17540_v4 }
 0x1ee   : > { %15661 = vmatpush1.bf16.msra.mxu1 %v18550_v36  ;;  %5204 = vmatprep.mubr.f32.mxu1 %v22035_v53  ;;  %v18720_v36 = vsub.f32 %v388_v13, %v5891_v28  ;;  %22040 = vst [vmem:[#allocation11_spill] sm:$0xff] %v18776_v16  ;;  %v5858_v13 = vand.u32 4294901760, %v377_v50  ;;  %22043 = vst [vmem:[#allocation14_spill] sm:$0xff] %v18806_v8  ;;  %v18845_v7 = vsub.f32 %v379_v9, %v5864_v11 }
 0x1ef   : > { %15775 = vmatprep.subr.bf16.mxu1 %v15774_v48  ;;  %v18791_v48 = vsub.f32 %v392_v20, %v5903_v30  ;;  %v18841_v20 = vsub.f32 %v395_v22, %v5912_v25 }
 0x1f0   : > { %v15782_v32 = vpack.c.bf16 %v18720_v36, %v18718_v57  ;;  %v18817_v0 = vsub.f32 %v377_v50, %v5858_v13  ;;  %v382_v50 = vld [vmem:[%s21773_s7 + $0x78] sm:$0xff] }
 0x1f1   : > { %5206 = vmatmul.mubr.f32.vlgmr.msra.gmra.mrb[18].mxu1 %v17543_v17  ;;  %v368_v17 = vld [vmem:[%s21773_s7 + $0x8] sm:$0xff]  ;;  %v15790_v46 = vpack.c.bf16 %v18791_v48, %v18789_v42 }
 0x1f2   : > { %5211 = vmatprep.mubr.f32.mxu1 %v22035_v53  ;;  %v5971_v53 = vand.u32 4294901760, %v18696_v14 }
 0x1f5   : > { %5213 = vmatmul.mubr.f32.gmra.mrb[20].mxu1 %v17540_v4  ;;  %v5831_v4 = vand.u32 4294901760, %v368_v17 }
 0x1f7   : > { %v18674_v35 = vsub.f32 %v368_v17, %v5831_v4  ;;  %v18722_v47 = vpack.c.bf16 %v5831_v4, %v5828_v45  ;;  %v5852_v17 = vand.u32 4294901760, %v375_v59  ;;  %v393_v45 = vld [vmem:[%s21773_s7 + $0xd0] sm:$0xff]  ;;  %v394_v4 = vld [vmem:[%s21773_s7 + $0xd8] sm:$0xff] }
 0x1f8   : > { %v5909_v58 = vand.u32 4294901760, %v394_v4 }
 0x1f9   : > { %v15776_v56 = vpack.c.bf16 %v18674_v35, %v18672_v63  ;;  %15713 = vmatpush3.bf16.msra.mxu0 %v18722_v47  ;;  %v18799_v12 = vsub.f32 %v375_v59, %v5852_v17  ;;  %v18838_v52 = vpack.c.bf16 %v5855_v23, %v5852_v17  ;;  %v397_v59 = vld [vmem:[%s21773_s7 + $0xf0] sm:$0xff] }
 0x1fa   : > { %15715 = vmatprep.subr.bf16.mxu0 %v18746_v26  ;;  %v18810_v5 = vsub.f32 %v394_v4, %v5909_v58  ;;  %v5918_v17 = vand.u32 4294901760, %v397_v59  ;;  %v381_v4 = vld [vmem:[%s21773_s7 + $0x70] sm:$0xff] }
 0x1fb   : > { %15777 = vmatpush3.bf16.msra.mxu1 %v15776_v56  ;;  %v5906_v56 = vand.u32 4294901760, %v393_v45  ;;  %22045 = vst [vmem:[#allocation16_spill] sm:$0xff] %v18838_v52 }
 0x1fc   : > { %15779 = vmatprep.subr.bf16.mxu1 %v15778_v39  ;;  %v5861_v39 = vand.u32 4294901760, %v378_v38 }
 0x1fd   : > { %15717 = vmatpush3.bf16.msra.mxu0 %v18752_v55  ;;  %v18808_v28 = vsub.f32 %v393_v45, %v5906_v56  ;;  %v5921_v45 = vand.u32 4294901760, %v398_v2 }
 0x1fe   : > { %15719 = vmatprep.subr.bf16.mxu0 %v18776_v16  ;;  %v18819_v1 = vsub.f32 %v378_v38, %v5861_v39  ;;  %v5870_v38 = vand.u32 4294901760, %v381_v4 }
 0x1ff   : > { %15781 = vmatpush3.bf16.msra.mxu1 %v15780_v10  ;;  %v15792_v10 = vpack.c.bf16 %v18803_v44, %v18799_v12  ;;  %v15794_v27 = vpack.c.bf16 %v18810_v5, %v18808_v28  ;;  %v18870_v22 = vsub.f32 %v398_v2, %v5921_v45  ;;  %v5957_v2 = vand.u32 4294901760, %v18672_v63 }
 0x200   : > { %15783 = vmatprep.subr.bf16.mxu1 %v15782_v32  ;;  %v396_v32 = vld [vmem:[%s21773_s7 + $0xe8] sm:$0xff]  ;;  %v15796_v3 = vpack.c.bf16 %v18819_v1, %v18817_v0 }
 0x201   : > { %15721 = vmatpush3.bf16.msra.mxu0 %v18778_v31  ;;  %v5915_v21 = vand.u32 4294901760, %v396_v32 }
 0x202   : > { %15723 = vmatprep.subr.bf16.mxu0 %v18793_v15  ;;  %v6125_v15 = vand.u32 4294901760, %v18789_v42 }
 0x203   : > { %15785 = vmatpush3.bf16.msra.mxu1 %v15784_v43  ;;  %v380_v43 = vld [vmem:[%s21773_s7 + $0x68] sm:$0xff] }
 0x204   : > { %15787 = vmatprep.subr.bf16.mxu1 %v15786_v34  ;;  %v5867_v51 = vand.u32 4294901760, %v380_v43  ;;  %v18843_v34 = vsub.f32 %v396_v32, %v5915_v21  ;;  %v18872_v32 = vpack.c.bf16 %v5861_v39, %v5858_v13  ;;  %v6069_v13 = vand.u32 4294901760, %v18668_v62 }
 0x205   : > { %15725 = vmatpush3.bf16.msra.mxu0 %v18806_v8  ;;  %v6076_v39 = vand.u32 4294901760, %v18670_v37  ;;  %v6111_v8 = vand.u32 4294901760, %v18748_v19 }
 0x206   : > { %15727 = vmatprep.subr.bf16.mxu0 %v18812_v61  ;;  %v18847_v30 = vsub.f32 %v380_v43, %v5867_v51  ;;  %22047 = vst [vmem:[#allocation18_spill] sm:$0xff] %v18872_v32 }
 0x207   : > { %15789 = vmatpush3.bf16.msra.mxu1 %v15788_v33  ;;  %v15798_v33 = vpack.c.bf16 %v18843_v34, %v18841_v20 }
 0x208   : > { %15791 = vmatprep.subr.bf16.mxu1 %v15790_v46  ;;  %v15800_v23 = vpack.c.bf16 %v18847_v30, %v18845_v7  ;;  %v5873_v46 = vand.u32 4294901760, %v382_v50 }
 0x209   : > { %15729 = vmatpush3.bf16.msra.mxu0 %v18838_v52 }
 0x20a   : > { %v18876_v9 = vsub.f32 %v382_v50, %v5873_v46 }
 0x20b   : > { %15793 = vmatpush3.bf16.msra.mxu1 %v15792_v10  ;;  %v18866_v10 = vpack.c.bf16 %v5909_v58, %v5906_v56  ;;  %v18884_v58 = vpack.c.bf16 %v5915_v21, %v5912_v25 }
 0x20c   : > { %15795 = vmatprep.subr.bf16.mxu1 %v15794_v27  ;;  %v18868_v27 = vsub.f32 %v397_v59, %v5918_v17  ;;  %v18888_v59 = vpack.c.bf16 %v5867_v51, %v5864_v11  ;;  %v6083_v11 = vand.u32 4294901760, %v18692_v41  ;;  %v6090_v51 = vand.u32 4294901760, %v18694_v6 }
 0x20d   : > { %22046 = vst [vmem:[#allocation17_spill] sm:$0xff] %v18866_v10  ;;  %15731 = vmatprep.subr.bf16.mxu0 %v18866_v10  ;;  %22048 = vst [vmem:[#allocation19_spill] sm:$0xff] %v18884_v58 }
 0x20e   : > { %v15802_v43 = vpack.c.bf16 %v18870_v22, %v18868_v27  ;;  %15733 = vmatpush3.bf16.msra.mxu0 %v18872_v32  ;;  %22049 = vst [vmem:[#allocation20_spill] sm:$0xff] %v18888_v59 }
 0x20f   : > { %15797 = vmatpush3.bf16.msra.mxu1 %v15796_v3  ;;  %v18874_v3 = vsub.f32 %v381_v4, %v5870_v38  ;;  %15735 = vmatprep.subr.bf16.mxu0 %v18884_v58  ;;  %v15838_v4 = vpack.c.bf16 %v6076_v39, %v6069_v13  ;;  %v6077_v58 = vsub.f32 %v18670_v37, %v6076_v39  ;;  %v6097_v39 = vand.u32 4294901760, %v18718_v57 }
 0x210   : > { %15799 = vmatprep.subr.bf16.mxu1 %v15798_v33  ;;  %v5964_v33 = vand.u32 4294901760, %v18674_v35 }
 0x211   : > { %v15804_v56 = vpack.c.bf16 %v18876_v9, %v18874_v3 }
 0x212   : > { %15737 = vmatpush3.bf16.msra.mxu0 %v18888_v59  ;;  %v18894_v50 = vpack.c.bf16 %v5964_v33, %v5957_v2  ;;  %v5978_v59 = vand.u32 4294901760, %v18698_v60  ;;  %v5965_v32 = vsub.f32 %v18674_v35, %v5964_v33  ;;  %v5992_v35 = vand.u32 4294901760, %v18726_v29 }
 0x213   : > { %15801 = vmatpush3.bf16.msra.mxu1 %v15800_v23  ;;  %v18900_v23 = vpack.c.bf16 %v5921_v45, %v5918_v17  ;;  %v5958_v45 = vsub.f32 %v18672_v63, %v5957_v2  ;;  %v5985_v63 = vand.u32 4294901760, %v18724_v54  ;;  %v6084_v2 = vsub.f32 %v18692_v41, %v6083_v11 }
 0x214   : > { %15803 = vmatprep.subr.bf16.mxu1 %v15802_v43  ;;  %v6070_v43 = vsub.f32 %v18668_v62, %v6069_v13  ;;  %v18918_v62 = vpack.c.bf16 %v5978_v59, %v5971_v53  ;;  %v5966_v37 = vand.u32 4294901760, %v5965_v32  ;;  %v6118_v41 = vand.u32 4294901760, %v18750_v24 }
 0x215   : > { %22050 = vst [vmem:[#allocation21_spill] sm:$0xff] %v18900_v23  ;;  %15739 = vmatprep.subr.bf16.mxu0 %v18900_v23  ;;  %v5959_v13 = vand.u32 4294901760, %v5958_v45  ;;  %v6104_v23 = vand.u32 4294901760, %v18720_v36  ;;  %v5972_v45 = vsub.f32 %v18696_v14, %v5971_v53  ;;  %v18933_v32 = vpack.c.bf16 %v5992_v35, %v5985_v63 }
 0x216   : > { %v6071_v17 = vand.u32 4294901760, %v6070_v43  ;;  %v6085_v52 = vand.u32 4294901760, %v6084_v2  ;;  %v18943_v14 = vpack.c.bf16 %v6118_v41, %v6111_v8 }
 0x217   : > { %15805 = vmatpush3.bf16.msra.mxu1 %v15804_v56  ;;  %v18905_v56 = vpack.c.bf16 %v5873_v46, %v5870_v38  ;;  %v6078_v38 = vand.u32 4294901760, %v6077_v58  ;;  %v18927_v33 = vpack.c.bf16 %v5966_v37, %v5959_v13  ;;  %v6091_v58 = vsub.f32 %v18694_v6, %v6090_v51 }
 0x218   : > { %15839 = vmatprep.subr.bf16.mxu1 %v15838_v4  ;;  %v18911_v4 = vpack.c.bf16 %v6090_v51, %v6083_v11  ;;  %v5973_v61 = vand.u32 4294901760, %v5972_v45  ;;  %v5999_v13 = vand.u32 4294901760, %v18754_v40  ;;  %v6006_v37 = vand.u32 4294901760, %v18756_v49 }
 0x219   : > { %22051 = vst [vmem:[#allocation22_spill] sm:$0xff] %v18905_v56  ;;  %15741 = vmatpush3.bf16.msra.mxu0 %v18905_v56  ;;  %v15742_v43 = vpack.c.bf16 %v6078_v38, %v6071_v17  ;;  %v18929_v56 = vpack.c.bf16 %v6104_v23, %v6097_v39  ;;  %v5979_v17 = vsub.f32 %v18698_v60, %v5978_v59  ;;  %v6092_v38 = vand.u32 4294901760, %v6091_v58 }
 0x21a   : > { %v6098_v6 = vsub.f32 %v18718_v57, %v6097_v39  ;;  %v6105_v51 = vsub.f32 %v18720_v36, %v6104_v23  ;;  %v5986_v60 = vsub.f32 %v18724_v54, %v5985_v63  ;;  %v5993_v58 = vsub.f32 %v18726_v29, %v5992_v35 }
 0x21b   : > { %15743 = vmatprep.subr.bf16.mxu0 %v15742_v43  ;;  %v5980_v11 = vand.u32 4294901760, %v5979_v17  ;;  %v18941_v53 = vpack.c.bf16 %v6092_v38, %v6085_v52  ;;  %v18949_v43 = vpack.c.bf16 %v6006_v37, %v5999_v13  ;;  %v6132_v57 = vand.u32 4294901760, %v18791_v48 }
 0x21c   : > { %v18896_v25 = vpop.f32.mrb[2].mxu0  ;;  %v6099_v2 = vand.u32 4294901760, %v6098_v6  ;;  %v6106_v45 = vand.u32 4294901760, %v6105_v51  ;;  %v5987_v17 = vand.u32 4294901760, %v5986_v60  ;;  %v5994_v52 = vand.u32 4294901760, %v5993_v58 }
 0x21d   : > { %v18898_v21 = vpop.f32.mrb[3].mxu0  ;;  %v18947_v59 = vpack.c.bf16 %v5980_v11, %v5973_v61  ;;  %v6013_v39 = vand.u32 4294901760, %v18799_v12  ;;  %v6020_v36 = vand.u32 4294901760, %v18803_v44  ;;  %v6112_v54 = vsub.f32 %v18748_v19, %v6111_v8 }
 0x21e   : > { %v18957_v61 = vpack.c.bf16 %v6106_v45, %v6099_v2  ;;  %v18959_v23 = vpack.c.bf16 %v6132_v57, %v6125_v15  ;;  %v6119_v63 = vsub.f32 %v18750_v24, %v6118_v41  ;;  %v6000_v29 = vsub.f32 %v18754_v40, %v5999_v13 }
 0x21f   : > { %v18965_v38 = vpack.c.bf16 %v5994_v52, %v5987_v17  ;;  %v18967_v11 = vpack.c.bf16 %v6020_v36, %v6013_v39  ;;  %v6113_v6 = vand.u32 4294901760, %v6112_v54  ;;  %v6007_v51 = vsub.f32 %v18756_v49, %v6006_v37 }
 0x220   : > { %v18915_v10 = vpop.f32.mrb[4].mxu0  ;;  %v6120_v19 = vand.u32 4294901760, %v6119_v63  ;;  %v6001_v8 = vand.u32 4294901760, %v6000_v29  ;;  %v6139_v2 = vand.u32 4294901760, %v18808_v28  ;;  %v6146_v58 = vand.u32 4294901760, %v18810_v5 }
 0x221   : > { %v18920_v46 = vpop.f32.mrb[5].mxu0  ;;  %v6008_v24 = vand.u32 4294901760, %v6007_v51  ;;  %v6027_v40 = vand.u32 4294901760, %v18817_v0  ;;  %v6034_v41 = vand.u32 4294901760, %v18819_v1  ;;  %v6126_v13 = vsub.f32 %v18789_v42, %v6125_v15 }
 0x222   : > { %v18977_v45 = vpack.c.bf16 %v6120_v19, %v6113_v6  ;;  %v18979_v17 = vpack.c.bf16 %v6146_v58, %v6139_v2  ;;  %v6133_v49 = vsub.f32 %v18791_v48, %v6132_v57  ;;  %v6014_v37 = vsub.f32 %v18799_v12, %v6013_v39 }
 0x223   : > { %v18985_v54 = vpack.c.bf16 %v6008_v24, %v6001_v8  ;;  %v18987_v63 = vpack.c.bf16 %v6034_v41, %v6027_v40  ;;  %v6127_v29 = vand.u32 4294901760, %v6126_v13  ;;  %v6021_v51 = vsub.f32 %v18803_v44, %v6020_v36 }
 0x224   : > { %v6134_v42 = vand.u32 4294901760, %v6133_v49  ;;  %v6015_v15 = vand.u32 4294901760, %v6014_v37  ;;  %v6153_v6 = vand.u32 4294901760, %v18841_v20  ;;  %v6160_v19 = vand.u32 4294901760, %v18843_v34 }
 0x225   : > { %v6022_v48 = vand.u32 4294901760, %v6021_v51  ;;  %v6041_v12 = vand.u32 4294901760, %v18845_v7  ;;  %v6048_v57 = vand.u32 4294901760, %v18847_v30  ;;  %v6140_v39 = vsub.f32 %v18808_v28, %v6139_v2 }
 0x226   : > { %v18997_v8 = vpack.c.bf16 %v6134_v42, %v6127_v29  ;;  %v18999_v24 = vpack.c.bf16 %v6160_v19, %v6153_v6  ;;  %v6147_v44 = vsub.f32 %v18810_v5, %v6146_v58  ;;  %v6028_v36 = vsub.f32 %v18817_v0, %v6027_v40 }
 0x227   : > { %v19003_v49 = vpack.c.bf16 %v6022_v48, %v6015_v15  ;;  %v19005_v37 = vpack.c.bf16 %v6048_v57, %v6041_v12  ;;  %v6141_v51 = vand.u32 4294901760, %v6140_v39  ;;  %v6035_v16 = vsub.f32 %v18819_v1, %v6034_v41 }
 0x228   : > { %v6148_v28 = vand.u32 4294901760, %v6147_v44  ;;  %v6029_v2 = vand.u32 4294901760, %v6028_v36  ;;  %v6167_v29 = vand.u32 4294901760, %v18868_v27  ;;  %v6174_v0 = vand.u32 4294901760, %v18870_v22 }
 0x229   : > { %v6036_v5 = vand.u32 4294901760, %v6035_v16  ;;  %v6055_v58 = vand.u32 4294901760, %v18874_v3  ;;  %v6062_v15 = vand.u32 4294901760, %v18876_v9  ;;  %v6154_v1 = vsub.f32 %v18841_v20, %v6153_v6 }
 0x22a   : > { %v19013_v40 = vpack.c.bf16 %v6148_v28, %v6141_v51  ;;  %v19020_v39 = vpack.c.bf16 %v6174_v0, %v6167_v29  ;;  %v6049_v16 = vsub.f32 %v18847_v30, %v6048_v57 }
 0x22b   : > { %v19018_v48 = vpack.c.bf16 %v6036_v5, %v6029_v2  ;;  %v19025_v36 = vpack.c.bf16 %v6062_v15, %v6055_v58  ;;  %v6168_v2 = vsub.f32 %v18868_v27, %v6167_v29  ;;  %v6056_v30 = vsub.f32 %v18874_v3, %v6055_v58 }
 0x22c   : > { %v18963_v35 = vpop.f32.mrb[2].mxu1  ;;  %v6063_v5 = vsub.f32 %v18876_v9, %v6062_v15 }
 0x22d   : > { %v18970_v60 = vpop.f32.mrb[3].mxu1  ;;  %v6057_v57 = vand.u32 4294901760, %v6056_v30 }
 0x230   : > { %v18983_v52 = vpop.f32.mrb[4].mxu1 }
 0x231   : > { %v18990_v31 = vpop.f32.mrb[5].mxu1 }
 0x234   : > { %v1714_v13 = vpop.f32.mrb[6].mxu1 }
 0x235   : > { %v16770_v55 = vadd.f32 %v18896_v25, %v1714_v13  ;;  %v1716_v26 = vpop.f32.mrb[7].mxu1  ;;  %v6161_v25 = vsub.f32 %v18843_v34, %v6160_v19  ;;  %v6155_v13 = vand.u32 4294901760, %v6154_v1  ;;  %v6050_v34 = vand.u32 4294901760, %v6049_v16 }
 0x236   : > { %v16771_v42 = vadd.f32 %v18898_v21, %v1716_v26  ;;  %v6042_v26 = vsub.f32 %v18845_v7, %v6041_v12  ;;  %v6175_v7 = vsub.f32 %v18870_v22, %v6174_v0 }
 0x237   : > { %v6162_v51 = vand.u32 4294901760, %v6161_v25 }
 0x238   : > { %v1725_v41 = vpop.f32.mrb[8].mxu1  ;;  %v6043_v6 = vand.u32 4294901760, %v6042_v26  ;;  %v6176_v12 = vand.u32 4294901760, %v6175_v7 }
 0x239   : > { %v16772_v21 = vadd.f32 %v18915_v10, %v1725_v41  ;;  %v1727_v44 = vpop.f32.mrb[9].mxu1  ;;  %v19028_v19 = vpack.c.bf16 %v6162_v51, %v6155_v13  ;;  %v6169_v10 = vand.u32 4294901760, %v6168_v2 }
 0x23a   : > { %v16773_v20 = vadd.f32 %v18920_v46, %v1727_v44  ;;  %v19030_v28 = vpack.c.bf16 %v6050_v34, %v6043_v6  ;;  %v6064_v46 = vand.u32 4294901760, %v6063_v5 }
 0x23b   : > { %v19036_v1 = vpack.c.bf16 %v6176_v12, %v6169_v10 }
 0x23c   : > { %v19038_v25 = vpack.c.bf16 %v6064_v46, %v6057_v57 }
 0x24c   : > { %v19040_v41 = vpop.f32.mrb[6].mxu0 }
 0x24d   : > { %v19042_v26 = vpop.f32.mrb[7].mxu0 }
 0x250   : > { %v19044_v16 = vpop.f32.mrb[8].mxu0 }
 0x251   : > { %v19046_v27 = vpop.f32.mrb[9].mxu0 }
 0x264   : > { %v19048_v22 = vpop.f32.mrb[10].mxu1 }
 0x265   : > { %v19050_v3 = vpop.f32.mrb[11].mxu1 }
 0x268   : > { %v19052_v29 = vpop.f32.mrb[12].mxu1 }
 0x269   : > { %v19054_v9 = vpop.f32.mrb[13].mxu1 }
 0x27c   : > { %v4615_v0 = vpop.f32.mrb[10].mxu0 }
 0x27d   : > { %v19056_v58 = vmul.f32 %v16770_v55, %v4615_v0  ;;  %v4617_v15 = vpop.f32.mrb[11].mxu0 }
 0x27e   : > { %v19058_v44 = vmul.f32 %v16771_v42, %v4617_v15 }
 0x280   : > { %v4622_v13 = vpop.f32.mrb[12].mxu0 }
 0x281   : > { %v19060_v51 = vmul.f32 %v16772_v21, %v4622_v13  ;;  %v4624_v6 = vpop.f32.mrb[13].mxu0 }
 0x282   : > { %v19062_v34 = vmul.f32 %v16773_v20, %v4624_v6 }
 0x294   : > { %v4023_v2 = vpop.f32.mrb[14].mxu1 }
 0x295   : > { %v5811_v7 = vmul.f32 %v4023_v2, %v18963_v35  ;;  %v4025_v30 = vpop.f32.mrb[15].mxu1 }
 0x296   : > { %v5812_v10 = vmul.f32 %v4025_v30, %v18970_v60 }
 0x297   : > { %v19066_v12 = vand.u32 4294901760, %v5811_v7 }
 0x298   : > { %v19068_v57 = vand.u32 4294901760, %v5812_v10  ;;  %v4030_v55 = vpop.f32.mrb[16].mxu1 }
 0x299   : > { %22052 = vst [vmem:[#allocation23_spill] sm:$0xff] %v19066_v12  ;;  %v19071_v42 = vsub.f32 %v5811_v7, %v19066_v12  ;;  %v5819_v21 = vmul.f32 %v4030_v55, %v18983_v52  ;;  %v4032_v5 = vpop.f32.mrb[17].mxu1 }
 0x29a   : > { %v19075_v20 = vsub.f32 %v5812_v10, %v19068_v57  ;;  %v5820_v46 = vmul.f32 %v4032_v5, %v18990_v31  ;;  %v19215_v5 = vld [vmem:[%s21773_s7 + $0x1a8] sm:$0xff] }
 0x29b   : > { %v21811_v35 = vand.u32 4294901760, %v19071_v42  ;;  %v19079_v0 = vand.u32 4294901760, %v5819_v21 }
 0x29c   : > { %v19081_v60 = vand.u32 4294901760, %v5820_v46  ;;  %6323 = vmatprep.mubr.f32.mxu1 %v19075_v20  ;;  %v21826_v15 = vand.u32 4294901760, %v19075_v20 }
 0x29d   : > { %22053 = vst [vmem:[#allocation24_spill] sm:$0xff] %v19079_v0  ;;  %v5932_v52 = vsub.f32 %v19071_v42, %v21811_v35  ;;  %v19089_v13 = vsub.f32 %v5819_v21, %v19079_v0  ;;  %6326 = vmatmul.mubr.f32.vlgmr.msra.gmra.mrb[22].mxu1 %v19071_v42  ;;  %v19300_v35 = vld [vmem:[%s21773_s7 + $0x1c8] sm:$0xff] }
 0x29e   : > { %22054 = vst [vmem:[#allocation25_spill] sm:$0xff] %v19081_v60  ;;  %v19093_v31 = vsub.f32 %v5820_v46, %v19081_v60  ;;  %15841 = vmatpush3.bf16.msra.mxu1 %v18894_v50  ;;  %v5926_v6 = vsub.f32 %v19075_v20, %v21826_v15 }
 0x29f   : > { %15843 = vmatprep.subr.bf16.mxu1 %v18911_v4  ;;  %v21809_v2 = vand.u32 4294901760, %v19089_v13  ;;  %v5933_v10 = vand.u32 4294901760, %v5932_v52 }
 0x2a0   : > { %6332 = vmatprep.mubr.f32.mxu1 %v19093_v31  ;;  %v5927_v7 = vand.u32 4294901760, %v5926_v6  ;;  %v21810_v30 = vand.u32 4294901760, %v19093_v31 }
 0x2a1   : > { %6335 = vmatmul.mubr.f32.gmra.mrb[24].mxu1 %v19089_v13  ;;  %v5947_v50 = vsub.f32 %v19089_v13, %v21809_v2 }
 0x2a2   : > { %15845 = vmatpush3.bf16.msra.mxu1 %v18918_v62  ;;  %5928 = vmatprep.mubr.f32.mxu0 %v5927_v7  ;;  %v5941_v4 = vsub.f32 %v19093_v31, %v21810_v30  ;;  %v19239_v7 = vld [vmem:[%s21773_s7 + $0x120] sm:$0xff] }
 0x2a3   : > { %6620 = vmatprep.mubr.f32.mxu1 %v19068_v57  ;;  %5934 = vmatmul.mubr.f32.vlgmr.msra.gmra.mrb[18].mxu0 %v5933_v10  ;;  %v5948_v21 = vand.u32 4294901760, %v5947_v50  ;;  %v19244_v10 = vld [vmem:[%s21773_s7 + $0x128] sm:$0xff]  ;;  %v19295_v30 = vld [vmem:[%s21773_s7 + $0x1c0] sm:$0xff] }
 0x2a4   : > { %15745 = vmatpush3.bf16.msra.mxu0 %v18927_v33  ;;  %15847 = vmatprep.subr.bf16.mxu1 %v18929_v56  ;;  %v5942_v55 = vand.u32 4294901760, %v5941_v4  ;;  %v19253_v4 = vld [vmem:[%s21773_s7 + $0x1b0] sm:$0xff] }
 0x2a5   : > { %15747 = vmatprep.subr.bf16.mxu0 %v18941_v53  ;;  %v19133_v53 = vand.u32 4294901760, %v19058_v44 }
 0x2a6   : > { %15849 = vmatpush3.bf16.msra.mxu1 %v18933_v32  ;;  %5943 = vmatprep.mubr.f32.mxu0 %v5942_v55  ;;  %v19258_v55 = vld [vmem:[%s21773_s7 + $0x1b8] sm:$0xff] }
 0x2a7   : > { %5949 = vmatmul.mubr.f32.gmra.mrb[20].mxu0 %v5948_v21  ;;  %15851 = vmatprep.subr.bf16.mxu1 %v18943_v14  ;;  %22057 = vst [vmem:[#allocation28_spill] sm:$0xff] %v19133_v53  ;;  %v21816_v21 = vand.u32 4294901760, %v19239_v7 }
 0x2a8   : > { %15749 = vmatpush3.bf16.msra.mxu0 %v18947_v59  ;;  %6179 = vmatprep.mubr.f32.mxu0 %v19068_v57  ;;  %v19139_v59 = vld [vmem:[%s21773_s7 + $0x180] sm:$0xff] }
 0x2a9   : > { %15751 = vmatprep.subr.bf16.mxu0 %v18957_v61 }
 0x2aa   : > { %15853 = vmatpush3.bf16.msra.mxu1 %v18949_v43  ;;  %v19144_v43 = vld [vmem:[%s21773_s7 + $0x188] sm:$0xff] }
 0x2ab   : > { %15855 = vmatprep.subr.bf16.mxu1 %v18959_v23 }
 0x2ac   : > { %15753 = vmatpush3.bf16.msra.mxu0 %v18965_v38  ;;  %v5799_v56 = vpop.f32.mrb[14].mxu0 }
 0x2ad   : > { %v19124_v62 = vmul.f32 %v5799_v56, %v19040_v41  ;;  %v5801_v33 = vpop.f32.mrb[15].mxu0  ;;  %15755 = vmatprep.subr.bf16.mxu0 %v18977_v45  ;;  %v21824_v45 = vand.u32 4294901760, %v19144_v43  ;;  %v21815_v56 = vand.u32 4294901760, %v19244_v10 }
 0x2ae   : > { %v19128_v32 = vmul.f32 %v5801_v33, %v19042_v26  ;;  %15857 = vmatpush3.bf16.msra.mxu1 %v18967_v11  ;;  %v21825_v11 = vand.u32 4294901760, %v19139_v59  ;;  %v21821_v33 = vand.u32 4294901760, %v19253_v4 }
 0x2af   : > { %22055 = vst [vmem:[#allocation26_spill] sm:$0xff] %v19124_v62  ;;  %15859 = vmatprep.subr.bf16.mxu1 %v18979_v17  ;;  %v19160_v17 = vld [vmem:[%s21773_s7 + $0x100] sm:$0xff] }
 0x2b0   : > { %22056 = vst [vmem:[#allocation27_spill] sm:$0xff] %v19128_v32  ;;  %15757 = vmatpush3.bf16.msra.mxu0 %v18985_v54  ;;  %v5806_v14 = vpop.f32.mrb[16].mxu0  ;;  %v19165_v54 = vld [vmem:[%s21773_s7 + $0x108] sm:$0xff]  ;;  %v21823_v41 = vand.u32 4294901760, %v19160_v17 }
 0x2b1   : > { %v19147_v61 = vmul.f32 %v5806_v14, %v19044_v16  ;;  %v5808_v23 = vpop.f32.mrb[17].mxu0  ;;  %15759 = vmatprep.subr.bf16.mxu0 %v18997_v8  ;;  %v19169_v8 = vsub.f32 %v19058_v44, %v19133_v53  ;;  %v21822_v26 = vand.u32 4294901760, %v19165_v54  ;;  %v19210_v44 = vld [vmem:[%s21773_s7 + $0x1a0] sm:$0xff]  ;;  %v21820_v14 = vand.u32 4294901760, %v19258_v55 }
 0x2b2   : > { %v19151_v38 = vmul.f32 %v5808_v23, %v19046_v27  ;;  %15861 = vmatpush3.bf16.msra.mxu1 %v18987_v63  ;;  %v19175_v63 = vld [vmem:[%s21773_s7 + $0x190] sm:$0xff] }
 0x2b3   : > { %22058 = vst [vmem:[#allocation29_spill] sm:$0xff] %v19147_v61  ;;  %15863 = vmatprep.subr.bf16.mxu1 %v18999_v24  ;;  %v19180_v24 = vld [vmem:[%s21773_s7 + $0x198] sm:$0xff]  ;;  %v21819_v16 = vand.u32 4294901760, %v19175_v63  ;;  %v19284_v23 = vld [vmem:[%s21773_s7 + $0x130] sm:$0xff] }
 0x2b4   : > { %22059 = vst [vmem:[#allocation30_spill] sm:$0xff] %v19151_v38  ;;  %15761 = vmatpush3.bf16.msra.mxu0 %v19003_v49  ;;  %v19191_v49 = vpack.c.bf16 %v21824_v45, %v21825_v11  ;;  %v21818_v27 = vand.u32 4294901760, %v19180_v24  ;;  %v19389_v45 = vld [vmem:[%s21773_s7 + $0x1e8] sm:$0xff]  ;;  %v22075_v61 = vld [vmem:[#allocation11_spill] sm:$0xff] }
 0x2b5   : > { %15763 = vmatprep.subr.bf16.mxu0 %v19013_v40  ;;  %v19203_v40 = vld [vmem:[%s21773_s7 + $0x118] sm:$0xff] }
 0x2b6   : > { %15865 = vmatpush3.bf16.msra.mxu1 %v19005_v37  ;;  %22060 = vst [vmem:[#allocation31_spill] sm:$0xff] %v19191_v49  ;;  %v19198_v37 = vld [vmem:[%s21773_s7 + $0x110] sm:$0xff]  ;;  %v21814_v52 = vand.u32 4294901760, %v19203_v40  ;;  %v19232_v6 = vpack.c.bf16 %v21818_v27, %v21819_v16  ;;  %v19343_v16 = vld [vmem:[%s21773_s7 + $0x1d8] sm:$0xff] }
 0x2b7   : > { %15867 = vmatprep.subr.bf16.mxu1 %v19020_v39  ;;  %v21808_v39 = vand.u32 4294901760, %v19169_v8  ;;  %v21817_v46 = vand.u32 4294901760, %v19198_v37  ;;  %v19338_v27 = vld [vmem:[%s21773_s7 + $0x1d0] sm:$0xff] }
 0x2b8   : > { %15765 = vmatpush3.bf16.msra.mxu0 %v19018_v48  ;;  %v19223_v48 = vpack.c.bf16 %v21822_v26, %v21823_v41  ;;  %22062 = vst [vmem:[#allocation33_spill] sm:$0xff] %v19232_v6  ;;  %v22068_v26 = vld [vmem:[#allocation9_spill] sm:$0xff] }
 0x2b9   : > { %15767 = vmatprep.subr.bf16.mxu0 %v19028_v19  ;;  %v21812_v19 = vand.u32 4294901760, %v19215_v5  ;;  %v6844_v50 = vsub.f32 %v19169_v8, %v21808_v39  ;;  %v19289_v39 = vld [vmem:[%s21773_s7 + $0x138] sm:$0xff] }
 0x2ba   : > { %15869 = vmatpush3.bf16.msra.mxu1 %v19025_v36  ;;  %22061 = vst [vmem:[#allocation32_spill] sm:$0xff] %v19223_v48  ;;  %v21813_v36 = vand.u32 4294901760, %v19210_v44 }
 0x2bb   : > { %15903 = vmatprep.subr.bf16.mxu1 %v19191_v49  ;;  %v6845_v2 = vand.u32 4294901760, %v6844_v50  ;;  %v21828_v50 = vand.u32 4294901760, %v19284_v23 }
 0x2bc   : > { %15769 = vmatpush3.bf16.msra.mxu0 %v19030_v28  ;;  %v19268_v28 = vpack.c.bf16 %v21814_v52, %v21817_v46  ;;  %v19321_v52 = vld [vmem:[%s21773_s7 + $0x148] sm:$0xff] }
 0x2bd   : > { %6622 = vmatmul.mubr.f32.vlgmr.msra.gmra.mrb[26].mxu1 %v19066_v12  ;;  %15771 = vmatprep.subr.bf16.mxu0 %v19036_v1  ;;  %v19277_v1 = vpack.c.bf16 %v21812_v19, %v21813_v36  ;;  %v21827_v19 = vand.u32 4294901760, %v19289_v39  ;;  %v19316_v36 = vld [vmem:[%s21773_s7 + $0x140] sm:$0xff]  ;;  %v22077_v62 = vand.u32 4294901760, %v19321_v52 }
 0x2be   : > { %6627 = vmatprep.mubr.f32.mxu1 %v19081_v60  ;;  %15905 = vmatpush3.bf16.msra.mxu1 %v19223_v48  ;;  %22063 = vst [vmem:[#allocation34_spill] sm:$0xff] %v19268_v28  ;;  %v22076_v38 = vand.u32 4294901760, %v19316_v36 }
 0x2bf   : > { %15907 = vmatprep.subr.bf16.mxu1 %v19232_v6  ;;  %22064 = vst [vmem:[#allocation35_spill] sm:$0xff] %v19277_v1  ;;  %v19359_v15 = vpack.c.bf16 %v21827_v19, %v21828_v50  ;;  %v19379_v19 = vld [vmem:[%s21773_s7 + $0x158] sm:$0xff]  ;;  %v19384_v50 = vld [vmem:[%s21773_s7 + $0x1e0] sm:$0xff]  ;;  %v22096_v6 = vld [vmem:[#allocation14_spill] sm:$0xff] }
 0x2c0   : > { %15773 = vmatpush3.bf16.msra.mxu0 %v19038_v25  ;;  %v19309_v25 = vpack.c.bf16 %v21815_v56, %v21816_v21  ;;  %v21830_v56 = vand.u32 4294901760, %v19295_v30  ;;  %v21829_v21 = vand.u32 4294901760, %v19300_v35  ;;  %v19402_v32 = vpack.c.bf16 %v22077_v62, %v22076_v38 }
 0x2c1   : > { %6629 = vmatmul.mubr.f32.gmra.mrb[28].mxu1 %v19079_v0  ;;  %15807 = vmatprep.subr.bf16.mxu0 %v18716_v18  ;;  %22070 = vst [vmem:[#allocation39_spill] sm:$0xff] %v19359_v15  ;;  %v22081_v62 = vand.u32 4294901760, %v19338_v27  ;;  %v22082_v38 = vand.u32 4294901760, %v19343_v16 }
 0x2c2   : > { %15909 = vmatpush3.bf16.msra.mxu1 %v19268_v28  ;;  %6846 = vmatprep.mubr.f32.mxu1 %v6845_v2  ;;  %22065 = vst [vmem:[#allocation36_spill] sm:$0xff] %v19309_v25  ;;  %v19329_v2 = vpack.c.bf16 %v21820_v14, %v21821_v33  ;;  %22078 = vst [vmem:[#allocation11_spill] sm:$0xff] %v19402_v32  ;;  %v22097_v28 = vld [vmem:[#allocation15_spill] sm:$0xff] }
 0x2c3   : > { %6181 = vmatmul.mubr.f32.vlgmr.msra.gmra.mrb[22].mxu0 %v19066_v12  ;;  %15911 = vmatprep.subr.bf16.mxu1 %v19277_v1  ;;  %v22118_v12 = vld [vmem:[#allocation19_spill] sm:$0xff] }
 0x2c4   : > { %22066 = vst [vmem:[#allocation37_spill] sm:$0xff] %v19329_v2  ;;  %6186 = vmatprep.mubr.f32.mxu0 %v19081_v60  ;;  %15809 = vmatpush3.bf16.msra.mxu0 %v18722_v47  ;;  %v5207_v46 = vpop.f32.mrb[18].mxu1 }
 0x2c5   : > { %v19346_v14 = vmul.f32 %v5207_v46, %v19048_v22  ;;  %v5209_v33 = vpop.f32.mrb[19].mxu1  ;;  %15811 = vmatprep.subr.bf16.mxu0 %v22068_v26  ;;  %v19364_v22 = vld [vmem:[%s21773_s7 + $0x150] sm:$0xff] }
 0x2c6   : > { %v19352_v11 = vmul.f32 %v5209_v33, %v19050_v3  ;;  %15913 = vmatpush3.bf16.msra.mxu1 %v19309_v25  ;;  %v19372_v3 = vpack.c.bf16 %v21829_v21, %v21830_v56  ;;  %v22072_v21 = vld [vmem:[#allocation10_spill] sm:$0xff]  ;;  %v22073_v56 = vand.u32 4294901760, %v19075_v20  ;;  %v22086_v20 = vld [vmem:[#allocation13_spill] sm:$0xff] }
 0x2c7   : > { %22067 = vst [vmem:[#allocation38_spill] sm:$0xff] %v19346_v14  ;;  %6188 = vmatmul.mubr.f32.gmra.mrb[24].mxu0 %v19079_v0  ;;  %15915 = vmatprep.subr.bf16.mxu1 %v19329_v2  ;;  %v19420_v2 = vpack.c.bf16 %v22082_v38, %v22081_v62  ;;  %v19439_v62 = vld [vmem:[%s21773_s7 + $0x1f0] sm:$0xff]  ;;  %v19444_v38 = vld [vmem:[%s21773_s7 + $0x1f8] sm:$0xff]  ;;  %v22091_v14 = vand.u32 4294901760, %v19389_v45 }
 0x2c8   : > { %22069 = vst [vmem:[#allocation9_spill] sm:$0xff] %v19352_v11  ;;  %22071 = vst [vmem:[#allocation40_spill] sm:$0xff] %v19372_v3  ;;  %15813 = vmatpush3.bf16.msra.mxu0 %v22072_v21  ;;  %6439 = vmatprep.mubr.f32.mxu0 %v22073_v56  ;;  %v5214_v33 = vpop.f32.mrb[20].mxu1  ;;  %v19433_v56 = vand.u32 4294901760, %v19062_v34 }
 0x2c9   : > { %v19395_v46 = vmul.f32 %v5214_v33, %v19052_v29  ;;  %v5216_v41 = vpop.f32.mrb[21].mxu1  ;;  %15815 = vmatprep.subr.bf16.mxu0 %v22075_v61  ;;  %v19413_v33 = vand.u32 4294901760, %v19056_v58  ;;  %22083 = vst [vmem:[#allocation43_spill] sm:$0xff] %v19420_v2  ;;  %v22085_v29 = vld [vmem:[#allocation12_spill] sm:$0xff] }
 0x2ca   : > { %v19406_v25 = vmul.f32 %v5216_v41, %v19054_v9  ;;  %15917 = vmatpush3.bf16.msra.mxu1 %v19359_v15  ;;  %v19425_v9 = vld [vmem:[%s21773_s7 + $0x160] sm:$0xff]  ;;  %v19430_v41 = vld [vmem:[%s21773_s7 + $0x168] sm:$0xff]  ;;  %22084 = vst [vmem:[#allocation44_spill] sm:$0xff] %v19433_v56  ;;  %v22088_v15 = vand.u32 4294901760, %v19379_v19 }
 0x2cb   : > { %22074 = vst [vmem:[#allocation10_spill] sm:$0xff] %v19395_v46  ;;  %22080 = vst [vmem:[#allocation42_spill] sm:$0xff] %v19413_v33  ;;  %15919 = vmatprep.subr.bf16.mxu1 %v19372_v3  ;;  %v22087_v3 = vand.u32 4294901760, %v19364_v22  ;;  %v19464_v48 = vsub.f32 %v19056_v58, %v19413_v33  ;;  %v19484_v58 = vsub.f32 %v19062_v34, %v19433_v56  ;;  %v22100_v49 = vand.u32 4294901760, %v19430_v41  ;;  %v22106_v56 = vld [vmem:[#allocation16_spill] sm:$0xff] }
 0x2cc   : > { %22079 = vst [vmem:[#allocation41_spill] sm:$0xff] %v19406_v25  ;;  %15817 = vmatpush3.bf16.msra.mxu0 %v22085_v29  ;;  %v22090_v25 = vand.u32 4294901760, %v19384_v50 }
 0x2cd   : > { %15819 = vmatprep.subr.bf16.mxu0 %v22086_v20  ;;  %v19452_v46 = vpack.c.bf16 %v22088_v15, %v22087_v3  ;;  %22093 = vst [vmem:[#allocation45_spill] sm:$0xff] %v19464_v48  ;;  %22095 = vst [vmem:[#allocation47_spill] sm:$0xff] %v19484_v58  ;;  %v22098_v3 = vand.u32 4294901760, %v19139_v59 }
 0x2ce   : > { %15921 = vmatpush3.bf16.msra.mxu1 %v19402_v32  ;;  %v19458_v1 = vpack.c.bf16 %v22091_v14, %v22090_v25  ;;  %v19467_v32 = vand.u32 4294901760, %v19060_v51  ;;  %v19475_v14 = vld [vmem:[%s21773_s7 + $0x170] sm:$0xff]  ;;  %v19480_v25 = vld [vmem:[%s21773_s7 + $0x178] sm:$0xff] }
 0x2cf   : > { %22089 = vst [vmem:[#allocation12_spill] sm:$0xff] %v19452_v46  ;;  %15923 = vmatprep.subr.bf16.mxu1 %v19420_v2  ;;  %v19491_v15 = vsub.f32 %v19139_v59, %v22098_v3  ;;  %v22099_v2 = vand.u32 4294901760, %v19425_v9  ;;  %v22102_v59 = vand.u32 4294901760, %v19144_v43  ;;  %v22112_v11 = vand.u32 4294901760, %v19480_v25 }
 0x2d0   : > { %22092 = vst [vmem:[#allocation13_spill] sm:$0xff] %v19458_v1  ;;  %22094 = vst [vmem:[#allocation46_spill] sm:$0xff] %v19467_v32  ;;  %15821 = vmatpush3.bf16.msra.mxu0 %v22096_v6  ;;  %v19505_v0 = vsub.f32 %v19060_v51, %v19467_v32  ;;  %v22108_v51 = vand.u32 4294901760, %v19160_v17 }
 0x2d1   : > { %15823 = vmatprep.subr.bf16.mxu0 %v22097_v28  ;;  %v19498_v33 = vpack.c.bf16 %v22100_v49, %v22099_v2  ;;  %v19510_v3 = vsub.f32 %v19144_v43, %v22102_v59  ;;  %v22103_v49 = vand.u32 4294901760, %v19439_v62  ;;  %v22104_v2 = vand.u32 4294901760, %v19444_v38 }
 0x2d2   : > { %15925 = vmatpush3.bf16.msra.mxu1 %v19452_v46  ;;  %v22107_v46 = vld [vmem:[#allocation17_spill] sm:$0xff]  ;;  %v19525_v32 = vsub.f32 %v19160_v17, %v22108_v51  ;;  %v22109_v43 = vand.u32 4294901760, %v19165_v54  ;;  %v22114_v17 = vand.u32 4294901760, %v19464_v48 }
 0x2d3   : > { %22101 = vst [vmem:[#allocation14_spill] sm:$0xff] %v19498_v33  ;;  %15927 = vmatprep.subr.bf16.mxu1 %v19458_v1  ;;  %v19517_v34 = vpack.c.bf16 %v22104_v2, %v22103_v49  ;;  %v22110_v1 = vand.u32 4294901760, %v19175_v63  ;;  %v22111_v2 = vand.u32 4294901760, %v19475_v14 }
 0x2d4   : > { %15825 = vmatpush3.bf16.msra.mxu0 %v22106_v56  ;;  %v19530_v59 = vsub.f32 %v19165_v54, %v22109_v43  ;;  %v6850_v51 = vsub.f32 %v19464_v48, %v22114_v17  ;;  %v22115_v54 = vand.u32 4294901760, %v19180_v24  ;;  %v22119_v17 = vand.u32 4294901760, %v19198_v37 }
 0x2d5   : > { %22105 = vst [vmem:[#allocation15_spill] sm:$0xff] %v19517_v34  ;;  %15827 = vmatprep.subr.bf16.mxu0 %v22107_v46  ;;  %v19535_v49 = vsub.f32 %v19175_v63, %v22110_v1  ;;  %v19542_v60 = vpack.c.bf16 %v22112_v11, %v22111_v2  ;;  %v15966_v63 = vpack.c.bf16 %v19510_v3, %v19491_v15  ;;  %v22117_v11 = vand.u32 4294901760, %v19484_v58 }
 0x2d6   : > { %15929 = vmatpush3.bf16.msra.mxu1 %v19498_v33  ;;  %v19550_v43 = vsub.f32 %v19180_v24, %v22115_v54  ;;  %v22116_v33 = vld [vmem:[#allocation18_spill] sm:$0xff]  ;;  %v19564_v24 = vsub.f32 %v19198_v37, %v22119_v17  ;;  %v22120_v54 = vand.u32 4294901760, %v19203_v40  ;;  %v22121_v1 = vand.u32 4294901760, %v19210_v44 }
 0x2d7   : > { %22113 = vst [vmem:[#allocation16_spill] sm:$0xff] %v19542_v60  ;;  %15931 = vmatprep.subr.bf16.mxu1 %v19517_v34  ;;  %v6859_v2 = vsub.f32 %v19484_v58, %v22117_v11  ;;  %v15968_v11 = vpack.c.bf16 %v19530_v59, %v19525_v32  ;;  %v6851_v58 = vand.u32 4294901760, %v6850_v51  ;;  %v22122_v48 = vand.u32 4294901760, %v19215_v5 }
 0x2d8   : > { %15829 = vmatpush3.bf16.msra.mxu0 %v22116_v33  ;;  %v19569_v34 = vsub.f32 %v19203_v40, %v22120_v54  ;;  %v19574_v53 = vsub.f32 %v19210_v44, %v22121_v1  ;;  %v22123_v40 = vand.u32 4294901760, %v19505_v0  ;;  %v15970_v44 = vpack.c.bf16 %v19550_v43, %v19535_v49  ;;  %v22124_v1 = vld [vmem:[#allocation20_spill] sm:$0xff] }
 0x2d9   : > { %15831 = vmatprep.subr.bf16.mxu0 %v22118_v12  ;;  %v19582_v37 = vsub.f32 %v19215_v5, %v22122_v48  ;;  %v6860_v54 = vand.u32 4294901760, %v6859_v2  ;;  %v22126_v51 = vand.u32 4294901760, %v19239_v7  ;;  %v22127_v5 = vand.u32 4294901760, %v19244_v10 }
 0x2da   : > { %15933 = vmatpush3.bf16.msra.mxu1 %v19542_v60  ;;  %v6865_v17 = vsub.f32 %v19505_v0, %v22123_v40  ;;  %v22125_v60 = vld [vmem:[#allocation21_spill] sm:$0xff]  ;;  %v22128_v2 = vand.u32 4294901760, %v19253_v4  ;;  %v22129_v40 = vand.u32 4294901760, %v19258_v55 }
 0x2db   : > { %15967 = vmatprep.subr.bf16.mxu1 %v15966_v63  ;;  %v19594_v12 = vsub.f32 %v19239_v7, %v22126_v51  ;;  %v19599_v48 = vsub.f32 %v19244_v10, %v22127_v5  ;;  %v15972_v63 = vpack.c.bf16 %v19569_v34, %v19564_v24  ;;  %v15974_v10 = vpack.c.bf16 %v19582_v37, %v19574_v53 }
 0x2dc   : > { %15833 = vmatpush3.bf16.msra.mxu0 %v22124_v1  ;;  %v19611_v7 = vsub.f32 %v19258_v55, %v22129_v40  ;;  %v6866_v51 = vand.u32 4294901760, %v6865_v17  ;;  %v22132_v5 = vand.u32 4294901760, %v19289_v39  ;;  %v22135_v40 = vand.u32 4294901760, %v19071_v42 }
 0x2dd   : > { %6852 = vmatmul.mubr.f32.vlgmr.msra.gmra.mrb[30].mxu1 %v6851_v58  ;;  %15835 = vmatprep.subr.bf16.mxu0 %v22125_v60  ;;  %v19606_v58 = vsub.f32 %v19253_v4, %v22128_v2  ;;  %v15976_v17 = vpack.c.bf16 %v19599_v48, %v19594_v12  ;;  %v22134_v2 = vand.u32 4294901760, %v19300_v35 }
 0x2de   : > { %6861 = vmatprep.mubr.f32.mxu1 %v6860_v54  ;;  %15969 = vmatpush3.bf16.msra.mxu1 %v15968_v11  ;;  %v22130_v54 = vld [vmem:[#allocation22_spill] sm:$0xff]  ;;  %v22131_v11 = vand.u32 4294901760, %v19284_v23  ;;  %v19625_v55 = vsub.f32 %v19289_v39, %v22132_v5 }
 0x2df   : > { %15971 = vmatprep.subr.bf16.mxu1 %v15970_v44  ;;  %v22133_v44 = vand.u32 4294901760, %v19295_v30  ;;  %v15978_v39 = vpack.c.bf16 %v19611_v7, %v19606_v58 }
 0x2e0   : > { %15837 = vmatpush3.bf16.msra.mxu0 %v22130_v54  ;;  %v19620_v4 = vsub.f32 %v19284_v23, %v22131_v11  ;;  %v19638_v23 = vsub.f32 %v19300_v35, %v22134_v2  ;;  %v22138_v35 = vand.u32 4294901760, %v19321_v52 }
 0x2e1   : > { %6867 = vmatmul.mubr.f32.gmra.mrb[32].mxu1 %v6866_v51  ;;  %15871 = vmatprep.subr.bf16.mxu0 %v18716_v18  ;;  %v19633_v18 = vsub.f32 %v19295_v30, %v22133_v44  ;;  %v22137_v30 = vand.u32 4294901760, %v19316_v36 }
 0x2e2   : > { %15973 = vmatpush3.bf16.msra.mxu1 %v15972_v63  ;;  %7241 = vmatprep.mubr.f32.mxu1 %v19169_v8  ;;  %v22136_v63 = vand.u32 4294901760, %v19093_v31  ;;  %v19656_v42 = vsub.f32 %v19321_v52, %v22138_v35  ;;  %v22139_v31 = vand.u32 4294901760, %v19338_v27 }
 0x2e3   : > { %6443 = vmatmul.mubr.f32.vlgmr.msra.gmra.mrb[26].mxu0 %v22135_v40  ;;  %15975 = vmatprep.subr.bf16.mxu1 %v15974_v10  ;;  %v19651_v51 = vsub.f32 %v19316_v36, %v22137_v30  ;;  %v15980_v10 = vpack.c.bf16 %v19625_v55, %v19620_v4  ;;  %v22141_v36 = vand.u32 4294901760, %v19089_v13  ;;  %v15982_v52 = vpack.c.bf16 %v19638_v23, %v19633_v18 }
 0x2e4   : > { %6450 = vmatprep.mubr.f32.mxu0 %v22136_v63  ;;  %15873 = vmatpush3.bf16.msra.mxu0 %v18722_v47  ;;  %v19663_v47 = vsub.f32 %v19338_v27, %v22139_v31  ;;  %v22142_v27 = vand.u32 4294901760, %v19364_v22  ;;  %v22149_v63 = vand.u32 4294901760, %v19444_v38  ;;  %v6882_v31 = vand.u32 4294901760, %v19530_v59 }
 0x2e5   : > { %15875 = vmatprep.subr.bf16.mxu0 %v22068_v26  ;;  %v22140_v26 = vand.u32 4294901760, %v19343_v16 }
 0x2e6   : > { %15977 = vmatpush3.bf16.msra.mxu1 %v15976_v17  ;;  %v19680_v5 = vsub.f32 %v19364_v22, %v22142_v27  ;;  %v15984_v17 = vpack.c.bf16 %v19656_v42, %v19651_v51 }
 0x2e7   : > { %v19668_v11 = vsub.f32 %v19343_v16, %v22140_v26  ;;  %6454 = vmatmul.mubr.f32.gmra.mrb[28].mxu0 %v22141_v36  ;;  %15979 = vmatprep.subr.bf16.mxu1 %v15978_v39  ;;  %v22143_v16 = vand.u32 4294901760, %v19379_v19  ;;  %v7008_v26 = vand.u32 4294901760, %v19550_v43 }
 0x2e8   : > { %15877 = vmatpush3.bf16.msra.mxu0 %v22072_v21  ;;  %6731 = vmatprep.mubr.f32.mxu0 %v19068_v57  ;;  %v22144_v21 = vand.u32 4294901760, %v19384_v50 }
 0x2e9   : > { %15879 = vmatprep.subr.bf16.mxu0 %v22075_v61  ;;  %v19685_v13 = vsub.f32 %v19379_v19, %v22143_v16  ;;  %v22145_v61 = vand.u32 4294901760, %v19389_v45  ;;  %v15986_v22 = vpack.c.bf16 %v19668_v11, %v19663_v47  ;;  %v22146_v19 = vand.u32 4294901760, %v19425_v9 }
 0x2ea   : > { %15981 = vmatpush3.bf16.msra.mxu1 %v15980_v10  ;;  %v19692_v57 = vsub.f32 %v19384_v50, %v22144_v21  ;;  %v22147_v50 = vand.u32 4294901760, %v19430_v41  ;;  %v6883_v16 = vsub.f32 %v19530_v59, %v6882_v31 }
 0x2eb   : > { %v19697_v44 = vsub.f32 %v19389_v45, %v22145_v61  ;;  %15983 = vmatprep.subr.bf16.mxu1 %v15982_v52  ;;  %v19705_v2 = vsub.f32 %v19425_v9, %v22146_v19  ;;  %v22148_v45 = vand.u32 4294901760, %v19439_v62  ;;  %v15988_v9 = vpack.c.bf16 %v19685_v13, %v19680_v5 }
 0x2ec   : > { %15881 = vmatpush3.bf16.msra.mxu0 %v22085_v29  ;;  %v19711_v40 = vsub.f32 %v19430_v41, %v22147_v50  ;;  %v19721_v29 = vsub.f32 %v19444_v38, %v22149_v63  ;;  %v22150_v41 = vand.u32 4294901760, %v19475_v14  ;;  %v22151_v38 = vand.u32 4294901760, %v19480_v25 }
 0x2ed   : > { %15883 = vmatprep.subr.bf16.mxu0 %v22086_v20  ;;  %v19716_v39 = vsub.f32 %v19439_v62, %v22148_v45  ;;  %v15990_v20 = vpack.c.bf16 %v19697_v44, %v19692_v57  ;;  %v7009_v61 = vsub.f32 %v19550_v43, %v7008_v26  ;;  %v6884_v45 = vand.u32 4294901760, %v6883_v16 }
 0x2ee   : > { %15985 = vmatpush3.bf16.msra.mxu1 %v15984_v17  ;;  %v19732_v62 = vsub.f32 %v19475_v14, %v22150_v41  ;;  %v19737_v30 = vsub.f32 %v19480_v25, %v22151_v38  ;;  %v15992_v35 = vpack.c.bf16 %v19711_v40, %v19705_v2  ;;  %v6875_v14 = vand.u32 4294901760, %v19525_v32 }
 0x2ef   : > { %15987 = vmatprep.subr.bf16.mxu1 %v15986_v22  ;;  %v15994_v10 = vpack.c.bf16 %v19721_v29, %v19716_v39  ;;  %v7001_v25 = vand.u32 4294901760, %v19535_v49  ;;  %v22152_v22 = vld [vmem:[#allocation19_spill] sm:$0xff]  ;;  %v7015_v63 = vand.u32 4294901760, %v19574_v53  ;;  %v6903_v43 = vand.u32 4294901760, %v19594_v12 }
 0x2f0   : > { %15885 = vmatpush3.bf16.msra.mxu0 %v22096_v6  ;;  %v6987_v6 = vand.u32 4294901760, %v19491_v15  ;;  %v6876_v27 = vsub.f32 %v19525_v32, %v6875_v14  ;;  %v15996_v17 = vpack.c.bf16 %v19737_v30, %v19732_v62  ;;  %v6896_v32 = vand.u32 4294901760, %v19569_v34 }
 0x2f1   : > { %15887 = vmatprep.subr.bf16.mxu0 %v22097_v28  ;;  %v6994_v28 = vand.u32 4294901760, %v19510_v3  ;;  %v7002_v21 = vsub.f32 %v19535_v49, %v7001_v25  ;;  %v7022_v49 = vand.u32 4294901760, %v19582_v37  ;;  %v6924_v16 = vand.u32 4294901760, %v19625_v55 }
 0x2f2   : > { %15989 = vmatpush3.bf16.msra.mxu1 %v15988_v9  ;;  %v6988_v36 = vsub.f32 %v19491_v15, %v6987_v6  ;;  %v16034_v15 = vpack.c.bf16 %v7008_v26, %v7001_v25  ;;  %v6877_v50 = vand.u32 4294901760, %v6876_v27  ;;  %v6897_v38 = vsub.f32 %v19569_v34, %v6896_v32 }
 0x2f3   : > { %15991 = vmatprep.subr.bf16.mxu1 %v15990_v20  ;;  %v6995_v52 = vsub.f32 %v19510_v3, %v6994_v28  ;;  %v6889_v3 = vand.u32 4294901760, %v19564_v24  ;;  %v7003_v9 = vand.u32 4294901760, %v7002_v21  ;;  %v7010_v20 = vand.u32 4294901760, %v7009_v61  ;;  %v22155_v61 = vld [vmem:[#allocation28_spill] sm:$0xff] }
 0x2f4   : > { %15889 = vmatpush3.bf16.msra.mxu0 %v22106_v56  ;;  %v16030_v56 = vpack.c.bf16 %v6994_v28, %v6987_v6  ;;  %v6989_v59 = vand.u32 4294901760, %v6988_v36  ;;  %v7023_v6 = vsub.f32 %v19582_v37, %v7022_v49  ;;  %v22153_v28 = vld [vmem:[#allocation45_spill] sm:$0xff]  ;;  %v7029_v25 = vand.u32 4294901760, %v19606_v58 }
 0x2f5   : > { %15891 = vmatprep.subr.bf16.mxu0 %v22107_v46  ;;  %v16032_v46 = vpack.c.bf16 %v6882_v31, %v6875_v14  ;;  %v6996_v19 = vand.u32 4294901760, %v6995_v52  ;;  %v6890_v41 = vsub.f32 %v19564_v24, %v6889_v3  ;;  %v15936_v31 = vpack.c.bf16 %v6884_v45, %v6877_v50  ;;  %v22154_v24 = vld [vmem:[#allocation47_spill] sm:$0xff] }
 0x2f6   : > { %15993 = vmatpush3.bf16.msra.mxu1 %v15992_v35  ;;  %v16036_v35 = vpack.c.bf16 %v6896_v32, %v6889_v3  ;;  %v7036_v26 = vand.u32 4294901760, %v19611_v7  ;;  %v16038_v34 = vpack.c.bf16 %v7022_v49, %v7015_v63  ;;  %v15938_v36 = vpack.c.bf16 %v7010_v20, %v7003_v9  ;;  %v22156_v32 = vld [vmem:[#allocation23_spill] sm:$0xff] }
 0x2f7   : > { %15995 = vmatprep.subr.bf16.mxu1 %v15994_v10  ;;  %v7016_v10 = vsub.f32 %v19574_v53, %v7015_v63  ;;  %v15934_v14 = vpack.c.bf16 %v6996_v19, %v6989_v59  ;;  %v6891_v52 = vand.u32 4294901760, %v6890_v41  ;;  %v6898_v27 = vand.u32 4294901760, %v6897_v38  ;;  %v22158_v38 = vld [vmem:[#allocation24_spill] sm:$0xff] }
 0x2f8   : > { %15893 = vmatpush3.bf16.msra.mxu0 %v22116_v33  ;;  %v6910_v33 = vand.u32 4294901760, %v19599_v48  ;;  %v16042_v21 = vpack.c.bf16 %v7036_v26, %v7029_v25  ;;  %v7050_v3 = vand.u32 4294901760, %v19638_v23  ;;  %v6925_v19 = vsub.f32 %v19625_v55, %v6924_v16 }
 0x2f9   : > { %15895 = vmatprep.subr.bf16.mxu0 %v22152_v22  ;;  %v15940_v22 = vpack.c.bf16 %v6898_v27, %v6891_v52  ;;  %v6931_v45 = vand.u32 4294901760, %v19651_v51  ;;  %v6938_v63 = vand.u32 4294901760, %v19656_v42  ;;  %v7057_v55 = vand.u32 4294901760, %v19663_v47 }
 0x2fa   : > { %15997 = vmatpush3.bf16.msra.mxu1 %v15996_v17  ;;  %v6911_v53 = vsub.f32 %v19599_v48, %v6910_v33  ;;  %v16040_v37 = vpack.c.bf16 %v6910_v33, %v6903_v43  ;;  %v7017_v17 = vand.u32 4294901760, %v7016_v10  ;;  %v7037_v48 = vsub.f32 %v19611_v7, %v7036_v26 }
 0x2fb   : > { %16031 = vmatprep.subr.bf16.mxu1 %v16030_v56  ;;  %v7024_v56 = vand.u32 4294901760, %v7023_v6  ;;  %v7051_v9 = vsub.f32 %v19638_v23, %v7050_v3  ;;  %v7064_v41 = vand.u32 4294901760, %v19668_v11  ;;  %v6926_v10 = vand.u32 4294901760, %v6925_v19 }
 0x2fc   : > { %15897 = vmatpush3.bf16.msra.mxu0 %v22124_v1  ;;  %v6904_v1 = vsub.f32 %v19594_v12, %v6903_v43  ;;  %v7030_v12 = vsub.f32 %v19606_v58, %v7029_v25  ;;  %v22157_v58 = vld [vmem:[#allocation25_spill] sm:$0xff]  ;;  %v7038_v43 = vand.u32 4294901760, %v7037_v48  ;;  %v6945_v6 = vand.u32 4294901760, %v19680_v5 }
 0x2fd   : > { %7244 = vmatmul.mubr.f32.vlgmr.msra.gmra.mrb[34].mxu1 %v22153_v28  ;;  %15899 = vmatprep.subr.bf16.mxu0 %v22125_v60  ;;  %v6917_v60 = vand.u32 4294901760, %v19620_v4  ;;  %v15942_v50 = vpack.c.bf16 %v7024_v56, %v7017_v17  ;;  %v6939_v23 = vsub.f32 %v19656_v42, %v6938_v63  ;;  %v7065_v25 = vsub.f32 %v19668_v11, %v7064_v41 }
 0x2fe   : > { %7250 = vmatprep.mubr.f32.mxu1 %v22154_v24  ;;  %16033 = vmatpush3.bf16.msra.mxu1 %v16032_v46  ;;  %v6905_v46 = vand.u32 4294901760, %v6904_v1  ;;  %v7031_v49 = vand.u32 4294901760, %v7030_v12  ;;  %v7052_v1 = vand.u32 4294901760, %v7051_v9  ;;  %v16050_v52 = vpack.c.bf16 %v7064_v41, %v7057_v55 }
 0x2ff   : > { %16035 = vmatprep.subr.bf16.mxu1 %v16034_v15  ;;  %v6912_v15 = vand.u32 4294901760, %v6911_v53  ;;  %v6918_v59 = vsub.f32 %v19620_v4, %v6917_v60  ;;  %v16044_v7 = vpack.c.bf16 %v6924_v16, %v6917_v60  ;;  %v16048_v53 = vpack.c.bf16 %v6938_v63, %v6931_v45 }
 0x300   : > { %15901 = vmatpush3.bf16.msra.mxu0 %v22130_v54  ;;  %v7043_v54 = vand.u32 4294901760, %v19633_v18  ;;  %v15946_v26 = vpack.c.bf16 %v7038_v43, %v7031_v49  ;;  %v7071_v27 = vand.u32 4294901760, %v19692_v57  ;;  %v7078_v42 = vand.u32 4294901760, %v19697_v44 }
 0x301   : > { %7253 = vmatmul.mubr.f32.gmra.mrb[36].mxu1 %v19505_v0  ;;  %15935 = vmatprep.subr.bf16.mxu0 %v15934_v14  ;;  %v15944_v4 = vpack.c.bf16 %v6912_v15, %v6905_v46  ;;  %v6932_v14 = vsub.f32 %v19651_v51, %v6931_v45  ;;  %v6940_v11 = vand.u32 4294901760, %v6939_v23  ;;  %v7066_v16 = vand.u32 4294901760, %v7065_v25 }
 0x302   : > { %16037 = vmatpush3.bf16.msra.mxu1 %v16036_v35  ;;  %7538 = vmatprep.mubr.f32.mxu1 %v22155_v61  ;;  %v7044_v33 = vsub.f32 %v19633_v18, %v7043_v54  ;;  %v16046_v20 = vpack.c.bf16 %v7050_v3, %v7043_v54  ;;  %v6919_v35 = vand.u32 4294901760, %v6918_v59  ;;  %v6952_v18 = vand.u32 4294901760, %v19685_v13 }
 0x303   : > { %6733 = vmatmul.mubr.f32.vlgmr.msra.gmra.mrb[30].mxu0 %v22156_v32  ;;  %16039 = vmatprep.subr.bf16.mxu1 %v16038_v34  ;;  %v6959_v56 = vand.u32 4294901760, %v19705_v2  ;;  %v6966_v12 = vand.u32 4294901760, %v19711_v40  ;;  %v16054_v15 = vpack.c.bf16 %v7078_v42, %v7071_v27  ;;  %v7085_v54 = vand.u32 4294901760, %v19716_v39 }
 0x304   : > { %6738 = vmatprep.mubr.f32.mxu0 %v22157_v58  ;;  %15937 = vmatpush3.bf16.msra.mxu0 %v15936_v31  ;;  %v7058_v31 = vsub.f32 %v19663_v47, %v7057_v55  ;;  %v7045_v34 = vand.u32 4294901760, %v7044_v33  ;;  %v6953_v51 = vsub.f32 %v19685_v13, %v6952_v18  ;;  %v6933_v47 = vand.u32 4294901760, %v6932_v14  ;;  %v19824_v58 = vld [vmem:[%s21773_s7 + $0x280] sm:$0xff]  ;;  %v19861_v14 = vld [vmem:[%s21773_s7 + $0x298] sm:$0xff] }
 0x305   : > { %15939 = vmatprep.subr.bf16.mxu0 %v15938_v36  ;;  %v15948_v36 = vpack.c.bf16 %v6926_v10, %v6919_v35  ;;  %v7079_v13 = vsub.f32 %v19697_v44, %v7078_v42  ;;  %v7092_v3 = vand.u32 4294901760, %v19721_v29  ;;  %v6960_v32 = vsub.f32 %v19705_v2, %v6959_v56  ;;  %v19887_v42 = vld [vmem:[%s21773_s7 + $0x2a0] sm:$0xff] }
 0x306   : > { %16041 = vmatpush3.bf16.msra.mxu1 %v16040_v37  ;;  %v6946_v37 = vsub.f32 %v19680_v5, %v6945_v6  ;;  %v7059_v60 = vand.u32 4294901760, %v7058_v31  ;;  %v15950_v17 = vpack.c.bf16 %v7052_v1, %v7045_v34  ;;  %v7072_v5 = vsub.f32 %v19692_v57, %v7071_v27 }
 0x307   : > { %6740 = vmatmul.mubr.f32.gmra.mrb[32].mxu0 %v22158_v38  ;;  %16043 = vmatprep.subr.bf16.mxu1 %v16042_v21  ;;  %v16052_v21 = vpack.c.bf16 %v6952_v18, %v6945_v6  ;;  %v6954_v46 = vand.u32 4294901760, %v6953_v51  ;;  %v15952_v57 = vpack.c.bf16 %v6940_v11, %v6933_v47  ;;  %v6967_v19 = vsub.f32 %v19711_v40, %v6966_v12  ;;  %v19856_v6 = vld [vmem:[%s21773_s7 + $0x290] sm:$0xff]  ;;  %v19892_v47 = vld [vmem:[%s21773_s7 + $0x2a8] sm:$0xff] }
 0x308   : > { %15941 = vmatpush3.bf16.msra.mxu0 %v15940_v22  ;;  %7097 = vmatprep.mubr.f32.mxu0 %v22155_v61  ;;  %v6947_v48 = vand.u32 4294901760, %v6946_v37  ;;  %v22159_v22 = vld [vmem:[#allocation9_spill] sm:$0xff]  ;;  %v15954_v44 = vpack.c.bf16 %v7066_v16, %v7059_v60  ;;  %v7073_v2 = vand.u32 4294901760, %v7072_v5  ;;  %v7086_v45 = vsub.f32 %v19716_v39, %v7085_v54  ;;  %v19881_v37 = vld [vmem:[%s21773_s7 + $0x218] sm:$0xff] }
 0x309   : > { %15943 = vmatprep.subr.bf16.mxu0 %v15942_v50  ;;  %v19818_v59 = vand.u32 4294901760, %v22159_v22  ;;  %v7080_v50 = vand.u32 4294901760, %v7079_v13  ;;  %v7093_v63 = vsub.f32 %v19721_v29, %v7092_v3  ;;  %v16056_v49 = vpack.c.bf16 %v6966_v12, %v6959_v56  ;;  %v19840_v39 = vld [vmem:[%s21773_s7 + $0x200] sm:$0xff]  ;;  %v19845_v29 = vld [vmem:[%s21773_s7 + $0x208] sm:$0xff] }
 0x30a   : > { %16045 = vmatpush3.bf16.msra.mxu1 %v16044_v7  ;;  %v19829_v7 = vld [vmem:[%s21773_s7 + $0x288] sm:$0xff]  ;;  %v15956_v40 = vpack.c.bf16 %v6954_v46, %v6947_v48  ;;  %v6973_v43 = vand.u32 4294901760, %v19732_v62  ;;  %v6980_v33 = vand.u32 4294901760, %v19737_v30  ;;  %v16058_v9 = vpack.c.bf16 %v7092_v3, %v7085_v54  ;;  %v19932_v54 = vld [vmem:[%s21773_s7 + $0x2b8] sm:$0xff] }
 0x30b   : > { %16047 = vmatprep.subr.bf16.mxu1 %v16046_v20  ;;  %22160 = vst [vmem:[#allocation17_spill] sm:$0xff] %v19818_v59  ;;  %v21906_v20 = vand.u32 4294901760, %v19824_v58  ;;  %v21905_v55 = vand.u32 4294901760, %v19829_v7  ;;  %v19849_v41 = vsub.f32 %v22159_v22, %v19818_v59  ;;  %v6968_v38 = vand.u32 4294901760, %v6967_v19  ;;  %v19919_v12 = vld [vmem:[%s21773_s7 + $0x228] sm:$0xff] }
 0x30c   : > { %15945 = vmatpush3.bf16.msra.mxu0 %v15944_v4  ;;  %v6961_v4 = vand.u32 4294901760, %v6960_v32  ;;  %v6974_v35 = vsub.f32 %v19732_v62, %v6973_v43  ;;  %v6981_v10 = vsub.f32 %v19737_v30, %v6980_v33  ;;  %v15958_v18 = vpack.c.bf16 %v7080_v50, %v7073_v2  ;;  %v22164_v3 = vld [vmem:[#allocation42_spill] sm:$0xff]  ;;  %v22165_v32 = vld [vmem:[#allocation44_spill] sm:$0xff] }
 0x30d   : > { %15947 = vmatprep.subr.bf16.mxu0 %v15946_v26  ;;  %v7087_v23 = vand.u32 4294901760, %v7086_v45  ;;  %v7094_v31 = vand.u32 4294901760, %v7093_v63  ;;  %v16060_v25 = vpack.c.bf16 %v6980_v33, %v6973_v43  ;;  %v21904_v62 = vand.u32 4294901760, %v19840_v39  ;;  %v19957_v45 = vld [vmem:[%s21773_s7 + $0x230] sm:$0xff]  ;;  %v19962_v63 = vld [vmem:[%s21773_s7 + $0x238] sm:$0xff]  ;;  %v19972_v43 = vld [vmem:[%s21773_s7 + $0x2c8] sm:$0xff] }
 0x30e   : > { %16049 = vmatpush3.bf16.msra.mxu1 %v16048_v53  ;;  %v21903_v30 = vand.u32 4294901760, %v19845_v29  ;;  %v19869_v26 = vpack.c.bf16 %v21905_v55, %v21906_v20  ;;  %v21900_v34 = vand.u32 4294901760, %v19856_v6  ;;  %v21899_v1 = vand.u32 4294901760, %v19861_v14  ;;  %v19876_v53 = vld [vmem:[%s21773_s7 + $0x210] sm:$0xff]  ;;  %v22185_v20 = vld [vmem:[#allocation36_spill] sm:$0xff] }
 0x30f   : > { %16051 = vmatprep.subr.bf16.mxu1 %v16050_v52  ;;  %v15960_v51 = vpack.c.bf16 %v6968_v38, %v6961_v4  ;;  %v6982_v52 = vand.u32 4294901760, %v6981_v10  ;;  %v21886_v27 = vand.u32 4294901760, %v19849_v41  ;;  %v15962_v11 = vpack.c.bf16 %v7094_v31, %v7087_v23  ;;  %v22168_v33 = vld [vmem:[#allocation46_spill] sm:$0xff]  ;;  %v19988_v10 = vld [vmem:[%s21773_s7 + $0x240] sm:$0xff] }
 0x310   : > { %15949 = vmatpush3.bf16.msra.mxu0 %v15948_v36  ;;  %22161 = vst [vmem:[#allocation18_spill] sm:$0xff] %v19869_v26  ;;  %v6975_v36 = vand.u32 4294901760, %v6974_v35  ;;  %v19898_v60 = vpack.c.bf16 %v21903_v30, %v21904_v62  ;;  %v21898_v16 = vand.u32 4294901760, %v19876_v53  ;;  %v19907_v56 = vpack.c.bf16 %v21899_v1, %v21900_v34  ;;  %v20090_v30 = vld [vmem:[%s21773_s7 + $0x268] sm:$0xff] }
 0x311   : > { %15951 = vmatprep.subr.bf16.mxu0 %v15950_v17  ;;  %v21897_v17 = vand.u32 4294901760, %v19881_v37  ;;  %v21896_v5 = vand.u32 4294901760, %v19887_v42  ;;  %v21895_v13 = vand.u32 4294901760, %v19892_v47  ;;  %v7762_v46 = vsub.f32 %v19849_v41, %v21886_v27  ;;  %v20030_v27 = vld [vmem:[%s21773_s7 + $0x250] sm:$0xff]  ;;  %v22183_v62 = vld [vmem:[#allocation41_spill] sm:$0xff] }
 0x312   : > { %16053 = vmatpush3.bf16.msra.mxu1 %v16052_v21  ;;  %22162 = vst [vmem:[#allocation20_spill] sm:$0xff] %v19898_v60  ;;  %22163 = vst [vmem:[#allocation21_spill] sm:$0xff] %v19907_v56  ;;  %v19914_v21 = vld [vmem:[%s21773_s7 + $0x220] sm:$0xff]  ;;  %v15964_v48 = vpack.c.bf16 %v6982_v52, %v6975_v36  ;;  %v21887_v50 = vand.u32 4294901760, %v19932_v54  ;;  %v21890_v38 = vand.u32 4294901760, %v19957_v45  ;;  %v21889_v35 = vand.u32 4294901760, %v19962_v63 }
 0x313   : > { %16055 = vmatprep.subr.bf16.mxu1 %v16054_v15  ;;  %v19927_v15 = vld [vmem:[%s21773_s7 + $0x2b0] sm:$0xff]  ;;  %v19941_v22 = vpack.c.bf16 %v21897_v17, %v21898_v16  ;;  %v19950_v19 = vpack.c.bf16 %v21895_v13, %v21896_v5  ;;  %v20015_v52 = vld [vmem:[%s21773_s7 + $0x2d8] sm:$0xff]  ;;  %v21926_v17 = vand.u32 4294901760, %v20030_v27  ;;  %v20093_v55 = vand.u32 4294901760, %v22183_v62  ;;  %v22186_v34 = vld [vmem:[#allocation37_spill] sm:$0xff] }
 0x314   : > { %15953 = vmatpush3.bf16.msra.mxu0 %v15952_v57  ;;  %v21892_v57 = vand.u32 4294901760, %v19914_v21  ;;  %v21888_v2 = vand.u32 4294901760, %v19927_v15  ;;  %v20010_v36 = vld [vmem:[%s21773_s7 + $0x2d0] sm:$0xff] }
 0x315   : > { %15955 = vmatprep.subr.bf16.mxu0 %v15954_v44  ;;  %22166 = vst [vmem:[#allocation22_spill] sm:$0xff] %v19941_v22  ;;  %v21891_v44 = vand.u32 4294901760, %v19919_v12  ;;  %22167 = vst [vmem:[#allocation19_spill] sm:$0xff] %v19950_v19  ;;  %v22178_v13 = vld [vmem:[#allocation35_spill] sm:$0xff] }
 0x316   : > { %16057 = vmatpush3.bf16.msra.mxu1 %v16056_v49  ;;  %v7763_v49 = vand.u32 4294901760, %v7762_v46  ;;  %v20001_v23 = vpack.c.bf16 %v21887_v50, %v21888_v2  ;;  %v21908_v2 = vand.u32 4294901760, %v20010_v36 }
 0x317   : > { %16059 = vmatprep.subr.bf16.mxu1 %v16058_v9  ;;  %v22169_v9 = vld [vmem:[#allocation31_spill] sm:$0xff]  ;;  %v19981_v4 = vpack.c.bf16 %v21891_v44, %v21892_v57  ;;  %v20050_v44 = vld [vmem:[%s21773_s7 + $0x2e0] sm:$0xff]  ;;  %v20055_v57 = vld [vmem:[%s21773_s7 + $0x2e8] sm:$0xff] }
 0x318   : > { %15957 = vmatpush3.bf16.msra.mxu0 %v15956_v40  ;;  %v19967_v40 = vld [vmem:[%s21773_s7 + $0x2c0] sm:$0xff]  ;;  %22171 = vst [vmem:[#allocation47_spill] sm:$0xff] %v20001_v23  ;;  %22184 = vst [vmem:[#allocation31_spill] sm:$0xff] %v20093_v55 }
 0x319   : > { %15959 = vmatprep.subr.bf16.mxu0 %v15958_v18  ;;  %22170 = vst [vmem:[#allocation45_spill] sm:$0xff] %v19981_v4  ;;  %v19993_v18 = vld [vmem:[%s21773_s7 + $0x248] sm:$0xff]  ;;  %v21894_v31 = vand.u32 4294901760, %v19967_v40 }
 0x31a   : > { %16061 = vmatpush3.bf16.msra.mxu1 %v16060_v25  ;;  %v21893_v25 = vand.u32 4294901760, %v19972_v43  ;;  %v21901_v46 = vand.u32 4294901760, %v19993_v18 }
 0x31b   : > { %16095 = vmatprep.subr.bf16.mxu1 %v19869_v26 }
 0x31c   : > { %15961 = vmatpush3.bf16.msra.mxu0 %v15960_v51  ;;  %v22172_v51 = vld [vmem:[#allocation32_spill] sm:$0xff]  ;;  %v20038_v50 = vpack.c.bf16 %v21893_v25, %v21894_v31  ;;  %v22176_v25 = vld [vmem:[#allocation34_spill] sm:$0xff]  ;;  %v22177_v31 = vand.u32 4294901760, %v19169_v8 }
 0x31d   : > { %7540 = vmatmul.mubr.f32.vlgmr.msra.gmra.mrb[38].mxu1 %v22164_v3  ;;  %15963 = vmatprep.subr.bf16.mxu0 %v15962_v11  ;;  %v22173_v11 = vld [vmem:[#allocation33_spill] sm:$0xff]  ;;  %v22180_v8 = vld [vmem:[#allocation38_spill] sm:$0xff] }
 0x31e   : > { %7545 = vmatprep.mubr.f32.mxu1 %v22165_v32  ;;  %16097 = vmatpush3.bf16.msra.mxu1 %v19898_v60  ;;  %22175 = vst [vmem:[#allocation23_spill] sm:$0xff] %v20038_v50  ;;  %v22199_v60 = vand.u32 4294901760, %v20090_v30 }
 0x31f   : > { %16099 = vmatprep.subr.bf16.mxu1 %v19907_v56 }
 0x320   : > { %15965 = vmatpush3.bf16.msra.mxu0 %v15964_v48  ;;  %v21902_v48 = vand.u32 4294901760, %v19988_v10 }
 0x321   : > { %7547 = vmatmul.mubr.f32.gmra.mrb[40].mxu1 %v22168_v33  ;;  %15999 = vmatprep.subr.bf16.mxu0 %v22169_v9 }
 0x322   : > { %16101 = vmatpush3.bf16.msra.mxu1 %v19941_v22  ;;  %7764 = vmatprep.mubr.f32.mxu1 %v7763_v49  ;;  %v20025_v49 = vpack.c.bf16 %v21889_v35, %v21890_v38  ;;  %v21907_v35 = vand.u32 4294901760, %v20015_v52  ;;  %v20045_v38 = vld [vmem:[%s21773_s7 + $0x258] sm:$0xff]  ;;  %v20065_v5 = vpack.c.bf16 %v21901_v46, %v21902_v48  ;;  %v20085_v48 = vld [vmem:[%s21773_s7 + $0x260] sm:$0xff] }
 0x323   : > { %7099 = vmatmul.mubr.f32.vlgmr.msra.gmra.mrb[34].mxu0 %v22164_v3  ;;  %16103 = vmatprep.subr.bf16.mxu1 %v19950_v19  ;;  %v21925_v16 = vand.u32 4294901760, %v20045_v38  ;;  %v22195_v19 = vld [vmem:[#allocation39_spill] sm:$0xff]  ;;  %v22217_v3 = vld [vmem:[#allocation13_spill] sm:$0xff] }
 0x324   : > { %7104 = vmatprep.mubr.f32.mxu0 %v22165_v32  ;;  %16001 = vmatpush3.bf16.msra.mxu0 %v22172_v51  ;;  %22174 = vst [vmem:[#allocation28_spill] sm:$0xff] %v20025_v49  ;;  %22179 = vst [vmem:[#allocation25_spill] sm:$0xff] %v20065_v5  ;;  %v20080_v46 = vpack.c.bf16 %v21907_v35, %v21908_v2  ;;  %v20099_v35 = vld [vmem:[%s21773_s7 + $0x2f0] sm:$0xff]  ;;  %v20104_v2 = vld [vmem:[%s21773_s7 + $0x2f8] sm:$0xff] }
 0x325   : > { %16003 = vmatprep.subr.bf16.mxu0 %v22173_v11  ;;  %v20112_v1 = vpack.c.bf16 %v21925_v16, %v21926_v17  ;;  %v22197_v17 = vand.u32 4294901760, %v19824_v58 }
 0x326   : > { %16105 = vmatpush3.bf16.msra.mxu1 %v19981_v4  ;;  %22182 = vst [vmem:[#allocation9_spill] sm:$0xff] %v20080_v46  ;;  %v22196_v4 = vld [vmem:[#allocation40_spill] sm:$0xff] }
 0x327   : > { %7106 = vmatmul.mubr.f32.gmra.mrb[36].mxu0 %v22168_v33  ;;  %16107 = vmatprep.subr.bf16.mxu1 %v20001_v23  ;;  %22187 = vst [vmem:[#allocation32_spill] sm:$0xff] %v20112_v1  ;;  %v20151_v16 = vsub.f32 %v19824_v58, %v22197_v17  ;;  %v22201_v58 = vand.u32 4294901760, %v19829_v7 }
 0x328   : > { %16005 = vmatpush3.bf16.msra.mxu0 %v22176_v25  ;;  %7357 = vmatprep.mubr.f32.mxu0 %v22177_v31  ;;  %v20073_v31 = vand.u32 4294901760, %v22180_v8 }
 0x329   : > { %16007 = vmatprep.subr.bf16.mxu0 %v22178_v13  ;;  %v20170_v17 = vsub.f32 %v19829_v7, %v22201_v58  ;;  %v22208_v7 = vand.u32 4294901760, %v19845_v29 }
 0x32a   : > { %16109 = vmatpush3.bf16.msra.mxu1 %v20025_v49  ;;  %22181 = vst [vmem:[#allocation24_spill] sm:$0xff] %v20073_v31  ;;  %v22189_v49 = vand.u32 4294901760, %v20055_v57  ;;  %v20124_v22 = vsub.f32 %v22180_v8, %v20073_v31  ;;  %v20144_v8 = vsub.f32 %v22183_v62, %v20093_v55  ;;  %v22205_v55 = vld [vmem:[#allocation11_spill] sm:$0xff] }
 0x32b   : > { %16111 = vmatprep.subr.bf16.mxu1 %v20038_v50  ;;  %v22188_v50 = vand.u32 4294901760, %v20050_v44  ;;  %v20190_v58 = vsub.f32 %v19845_v29, %v22208_v7  ;;  %v22214_v29 = vand.u32 4294901760, %v19861_v14 }
 0x32c   : > { %16009 = vmatpush3.bf16.msra.mxu0 %v22185_v20  ;;  %22191 = vst [vmem:[#allocation34_spill] sm:$0xff] %v20124_v22  ;;  %22194 = vst [vmem:[#allocation38_spill] sm:$0xff] %v20144_v8 }
 0x32d   : > { %16011 = vmatprep.subr.bf16.mxu0 %v22186_v34  ;;  %v20118_v23 = vpack.c.bf16 %v22189_v49, %v22188_v50  ;;  %v20135_v50 = vld [vmem:[%s21773_s7 + $0x270] sm:$0xff]  ;;  %v20140_v49 = vld [vmem:[%s21773_s7 + $0x278] sm:$0xff]  ;;  %v20210_v7 = vsub.f32 %v19861_v14, %v22214_v29  ;;  %v22219_v29 = vand.u32 4294901760, %v19881_v37 }
 0x32e   : > { %16113 = vmatpush3.bf16.msra.mxu1 %v20065_v5  ;;  %v22192_v5 = vld [vmem:[#allocation10_spill] sm:$0xff]  ;;  %v22211_v31 = vand.u32 4294901760, %v20140_v49 }
 0x32f   : > { %22190 = vst [vmem:[#allocation33_spill] sm:$0xff] %v20118_v23  ;;  %v20127_v56 = vand.u32 4294901760, %v22192_v5  ;;  %16115 = vmatprep.subr.bf16.mxu1 %v20080_v46  ;;  %v22198_v46 = vand.u32 4294901760, %v20085_v48 }
 0x330   : > { %16013 = vmatpush3.bf16.msra.mxu0 %v22195_v19 }
 0x331   : > { %22193 = vst [vmem:[#allocation35_spill] sm:$0xff] %v20127_v56  ;;  %16015 = vmatprep.subr.bf16.mxu0 %v22196_v4  ;;  %v20158_v26 = vpack.c.bf16 %v22199_v60, %v22198_v46  ;;  %v20165_v33 = vsub.f32 %v22192_v5, %v20127_v56  ;;  %v22202_v60 = vand.u32 4294901760, %v20099_v35  ;;  %v22203_v46 = vand.u32 4294901760, %v20104_v2 }
 0x332   : > { %16117 = vmatpush3.bf16.msra.mxu1 %v20112_v1  ;;  %v22206_v1 = vld [vmem:[#allocation43_spill] sm:$0xff]  ;;  %v22207_v5 = vand.u32 4294901760, %v19840_v39 }
 0x333   : > { %22200 = vst [vmem:[#allocation41_spill] sm:$0xff] %v20158_v26  ;;  %16119 = vmatprep.subr.bf16.mxu1 %v20118_v23  ;;  %v20177_v62 = vpack.c.bf16 %v22203_v46, %v22202_v60  ;;  %v22209_v23 = vand.u32 4294901760, %v19856_v6  ;;  %v22210_v46 = vand.u32 4294901760, %v20135_v50 }
 0x334   : > { %16017 = vmatpush3.bf16.msra.mxu0 %v22205_v55  ;;  %v20185_v56 = vsub.f32 %v19840_v39, %v22207_v5  ;;  %v22213_v39 = vand.u32 4294901760, %v20124_v22 }
 0x335   : > { %22204 = vst [vmem:[#allocation36_spill] sm:$0xff] %v20177_v62  ;;  %16019 = vmatprep.subr.bf16.mxu0 %v22206_v1  ;;  %v20195_v60 = vsub.f32 %v19856_v6, %v22209_v23  ;;  %v20202_v32 = vpack.c.bf16 %v22211_v31, %v22210_v46  ;;  %v16158_v6 = vpack.c.bf16 %v20170_v17, %v20151_v16  ;;  %v22216_v31 = vand.u32 4294901760, %v20144_v8 }
 0x336   : > { %16121 = vmatpush3.bf16.msra.mxu1 %v20158_v26  ;;  %v7768_v5 = vsub.f32 %v20124_v22, %v22213_v39  ;;  %v22215_v26 = vld [vmem:[#allocation12_spill] sm:$0xff]  ;;  %v22218_v39 = vand.u32 4294901760, %v19876_v53  ;;  %v22220_v23 = vand.u32 4294901760, %v19887_v42  ;;  %v22221_v22 = vand.u32 4294901760, %v19892_v47 }
 0x337   : > { %22212 = vst [vmem:[#allocation37_spill] sm:$0xff] %v20202_v32  ;;  %16123 = vmatprep.subr.bf16.mxu1 %v20177_v62  ;;  %v7777_v46 = vsub.f32 %v20144_v8, %v22216_v31  ;;  %v20229_v62 = vsub.f32 %v19881_v37, %v22219_v29  ;;  %v16160_v31 = vpack.c.bf16 %v20190_v58, %v20185_v56  ;;  %v22222_v37 = vand.u32 4294901760, %v20165_v33 }
 0x338   : > { %16021 = vmatpush3.bf16.msra.mxu0 %v22215_v26  ;;  %v20224_v14 = vsub.f32 %v19876_v53, %v22218_v39  ;;  %v20234_v59 = vsub.f32 %v19887_v42, %v22220_v23  ;;  %v7769_v8 = vand.u32 4294901760, %v7768_v5  ;;  %v20242_v53 = vsub.f32 %v19892_v47, %v22221_v22  ;;  %v22223_v23 = vld [vmem:[#allocation14_spill] sm:$0xff] }
 0x339   : > { %16023 = vmatprep.subr.bf16.mxu0 %v22217_v3  ;;  %v7783_v39 = vsub.f32 %v20165_v33, %v22222_v37  ;;  %v16162_v42 = vpack.c.bf16 %v20210_v7, %v20195_v60  ;;  %v7778_v29 = vand.u32 4294901760, %v7777_v46  ;;  %v22225_v5 = vand.u32 4294901760, %v19914_v21 }
 0x33a   : > { %16125 = vmatpush3.bf16.msra.mxu1 %v20202_v32  ;;  %v22224_v32 = vld [vmem:[#allocation15_spill] sm:$0xff]  ;;  %v22226_v47 = vand.u32 4294901760, %v19919_v12  ;;  %v22227_v46 = vand.u32 4294901760, %v19927_v15  ;;  %v22228_v37 = vand.u32 4294901760, %v19932_v54 }
 0x33b   : > { %16159 = vmatprep.subr.bf16.mxu1 %v16158_v6  ;;  %v20254_v3 = vsub.f32 %v19914_v21, %v22225_v5  ;;  %v16164_v6 = vpack.c.bf16 %v20229_v62, %v20224_v14  ;;  %v7784_v5 = vand.u32 4294901760, %v7783_v39 }
 0x33c   : > { %16025 = vmatpush3.bf16.msra.mxu0 %v22223_v23  ;;  %v20259_v22 = vsub.f32 %v19919_v12, %v22226_v47  ;;  %v20271_v21 = vsub.f32 %v19932_v54, %v22228_v37  ;;  %v16166_v12 = vpack.c.bf16 %v20242_v53, %v20234_v59  ;;  %v22231_v47 = vand.u32 4294901760, %v19962_v63 }
 0x33d   : > { %7770 = vmatmul.mubr.f32.vlgmr.msra.gmra.mrb[42].mxu1 %v7769_v8  ;;  %16027 = vmatprep.subr.bf16.mxu0 %v22224_v32  ;;  %v20266_v8 = vsub.f32 %v19927_v15, %v22227_v46  ;;  %v22233_v46 = vand.u32 4294901760, %v19972_v43  ;;  %v22234_v37 = vand.u32 4294901760, %v22153_v28 }
 0x33e   : > { %7779 = vmatprep.mubr.f32.mxu1 %v7778_v29  ;;  %16161 = vmatpush3.bf16.msra.mxu1 %v16160_v31  ;;  %v22229_v29 = vld [vmem:[#allocation16_spill] sm:$0xff]  ;;  %v22230_v31 = vand.u32 4294901760, %v19957_v45  ;;  %v20285_v54 = vsub.f32 %v19962_v63, %v22231_v47  ;;  %v16168_v39 = vpack.c.bf16 %v20259_v22, %v20254_v3 }
 0x33f   : > { %16163 = vmatprep.subr.bf16.mxu1 %v16162_v42  ;;  %v22232_v42 = vand.u32 4294901760, %v19967_v40  ;;  %v16170_v63 = vpack.c.bf16 %v20271_v21, %v20266_v8 }
 0x340   : > { %16029 = vmatpush3.bf16.msra.mxu0 %v22229_v29  ;;  %v20280_v15 = vsub.f32 %v19957_v45, %v22230_v31  ;;  %v20298_v45 = vsub.f32 %v19972_v43, %v22233_v46  ;;  %v22237_v43 = vand.u32 4294901760, %v19993_v18 }
 0x341   : > { %7785 = vmatmul.mubr.f32.gmra.mrb[44].mxu1 %v7784_v5  ;;  %16063 = vmatprep.subr.bf16.mxu0 %v22169_v9  ;;  %v20293_v9 = vsub.f32 %v19967_v40, %v22232_v42  ;;  %v22236_v40 = vand.u32 4294901760, %v19988_v10 }
 0x342   : > { %16165 = vmatpush3.bf16.msra.mxu1 %v16164_v6  ;;  %8159 = vmatprep.mubr.f32.mxu1 %v19849_v41  ;;  %v22235_v6 = vand.u32 4294901760, %v22154_v24  ;;  %v20316_v28 = vsub.f32 %v19993_v18, %v22237_v43  ;;  %v22238_v24 = vand.u32 4294901760, %v20010_v36 }
 0x343   : > { %7361 = vmatmul.mubr.f32.vlgmr.msra.gmra.mrb[38].mxu0 %v22234_v37  ;;  %16167 = vmatprep.subr.bf16.mxu1 %v16166_v12  ;;  %v20311_v5 = vsub.f32 %v19988_v10, %v22236_v40  ;;  %v16172_v12 = vpack.c.bf16 %v20285_v54, %v20280_v15  ;;  %v22240_v10 = vand.u32 4294901760, %v19505_v0  ;;  %v16174_v18 = vpack.c.bf16 %v20298_v45, %v20293_v9 }
 0x344   : > { %7368 = vmatprep.mubr.f32.mxu0 %v22235_v6  ;;  %16065 = vmatpush3.bf16.msra.mxu0 %v22172_v51  ;;  %v20323_v51 = vsub.f32 %v20010_v36, %v22238_v24  ;;  %v22241_v36 = vand.u32 4294901760, %v20030_v27  ;;  %v7800_v24 = vand.u32 4294901760, %v20190_v58 }
 0x345   : > { %16067 = vmatprep.subr.bf16.mxu0 %v22173_v11  ;;  %v22239_v11 = vand.u32 4294901760, %v20015_v52 }
 0x346   : > { %16169 = vmatpush3.bf16.msra.mxu1 %v16168_v39  ;;  %v20340_v47 = vsub.f32 %v20030_v27, %v22241_v36  ;;  %v16176_v39 = vpack.c.bf16 %v20316_v28, %v20311_v5  ;;  %v7801_v36 = vsub.f32 %v20190_v58, %v7800_v24 }
 0x347   : > { %v20328_v31 = vsub.f32 %v20015_v52, %v22239_v11  ;;  %7372 = vmatmul.mubr.f32.gmra.mrb[40].mxu0 %v22240_v10  ;;  %16171 = vmatprep.subr.bf16.mxu1 %v16170_v63  ;;  %v22242_v52 = vand.u32 4294901760, %v20045_v38  ;;  %v22247_v63 = vand.u32 4294901760, %v20099_v35 }
 0x348   : > { %16069 = vmatpush3.bf16.msra.mxu0 %v22176_v25  ;;  %7649 = vmatprep.mubr.f32.mxu0 %v22155_v61  ;;  %v22243_v25 = vand.u32 4294901760, %v20050_v44 }
 0x349   : > { %16071 = vmatprep.subr.bf16.mxu0 %v22178_v13  ;;  %v20345_v0 = vsub.f32 %v20045_v38, %v22242_v52  ;;  %v22244_v13 = vand.u32 4294901760, %v20055_v57  ;;  %v16178_v27 = vpack.c.bf16 %v20328_v31, %v20323_v51  ;;  %v22245_v38 = vand.u32 4294901760, %v20085_v48 }
 0x34a   : > { %16173 = vmatpush3.bf16.msra.mxu1 %v16172_v12  ;;  %v20352_v61 = vsub.f32 %v20050_v44, %v22243_v25  ;;  %v22246_v44 = vand.u32 4294901760, %v20090_v30  ;;  %v7905_v12 = vand.u32 4294901760, %v20151_v16  ;;  %v7919_v52 = vand.u32 4294901760, %v20195_v60 }
 0x34b   : > { %v20357_v42 = vsub.f32 %v20055_v57, %v22244_v13  ;;  %16175 = vmatprep.subr.bf16.mxu1 %v16174_v18  ;;  %v20366_v46 = vsub.f32 %v20085_v48, %v22245_v38  ;;  %v16180_v57 = vpack.c.bf16 %v20345_v0, %v20340_v47  ;;  %v22251_v13 = vld [vmem:[#allocation13_spill] sm:$0xff] }
 0x34c   : > { %16073 = vmatpush3.bf16.msra.mxu0 %v22185_v20  ;;  %v20371_v37 = vsub.f32 %v20090_v30, %v22246_v44  ;;  %v20378_v20 = vsub.f32 %v20099_v35, %v22247_v63  ;;  %v22249_v30 = vand.u32 4294901760, %v20135_v50  ;;  %v22250_v35 = vand.u32 4294901760, %v20140_v49 }
 0x34d   : > { %16075 = vmatprep.subr.bf16.mxu0 %v22186_v34  ;;  %v22248_v34 = vand.u32 4294901760, %v20104_v2  ;;  %v16182_v48 = vpack.c.bf16 %v20357_v42, %v20352_v61  ;;  %v7802_v44 = vand.u32 4294901760, %v7801_v36 }
 0x34e   : > { %16177 = vmatpush3.bf16.msra.mxu1 %v16176_v39  ;;  %v20391_v40 = vsub.f32 %v20135_v50, %v22249_v30  ;;  %v20397_v43 = vsub.f32 %v20140_v49, %v22250_v35  ;;  %v7906_v49 = vsub.f32 %v20151_v16, %v7905_v12  ;;  %v7926_v39 = vand.u32 4294901760, %v20210_v7 }
 0x34f   : > { %v20383_v6 = vsub.f32 %v20104_v2, %v22248_v34  ;;  %16179 = vmatprep.subr.bf16.mxu1 %v16178_v27  ;;  %v16184_v2 = vpack.c.bf16 %v20371_v37, %v20366_v46  ;;  %v7807_v16 = vand.u32 4294901760, %v20224_v14 }
 0x350   : > { %16077 = vmatpush3.bf16.msra.mxu0 %v22195_v19  ;;  %v7912_v19 = vand.u32 4294901760, %v20170_v17  ;;  %v16188_v10 = vpack.c.bf16 %v20397_v43, %v20391_v40  ;;  %v7927_v58 = vsub.f32 %v20210_v7, %v7926_v39  ;;  %v16226_v63 = vpack.c.bf16 %v7926_v39, %v7919_v52 }
 0x351   : > { %16079 = vmatprep.subr.bf16.mxu0 %v22196_v4  ;;  %v16186_v50 = vpack.c.bf16 %v20383_v6, %v20378_v20  ;;  %v7793_v4 = vand.u32 4294901760, %v20185_v56  ;;  %v7808_v34 = vsub.f32 %v20224_v14, %v7807_v16 }
 0x352   : > { %16181 = vmatpush3.bf16.msra.mxu1 %v16180_v57  ;;  %v7913_v11 = vsub.f32 %v20170_v17, %v7912_v19  ;;  %v7907_v17 = vand.u32 4294901760, %v7906_v49  ;;  %v7933_v57 = vand.u32 4294901760, %v20234_v59  ;;  %v7928_v14 = vand.u32 4294901760, %v7927_v58 }
 0x353   : > { %16183 = vmatprep.subr.bf16.mxu1 %v16182_v48  ;;  %v7794_v18 = vsub.f32 %v20185_v56, %v7793_v4  ;;  %v16224_v27 = vpack.c.bf16 %v7800_v24, %v7793_v4  ;;  %v7920_v56 = vsub.f32 %v20195_v60, %v7919_v52  ;;  %v22253_v4 = vld [vmem:[#allocation38_spill] sm:$0xff]  ;;  %v7947_v24 = vand.u32 4294901760, %v20266_v8  ;;  %v22254_v52 = vld [vmem:[#allocation27_spill] sm:$0xff] }
 0x354   : > { %16081 = vmatpush3.bf16.msra.mxu0 %v22205_v55  ;;  %v16222_v55 = vpack.c.bf16 %v7912_v19, %v7905_v12  ;;  %v7914_v25 = vand.u32 4294901760, %v7913_v11  ;;  %v7934_v60 = vsub.f32 %v20234_v59, %v7933_v57  ;;  %v7821_v12 = vand.u32 4294901760, %v20254_v3 }
 0x355   : > { %16083 = vmatprep.subr.bf16.mxu0 %v22206_v1  ;;  %v7814_v1 = vand.u32 4294901760, %v20229_v62  ;;  %v7795_v38 = vand.u32 4294901760, %v7794_v18  ;;  %v7828_v19 = vand.u32 4294901760, %v20259_v22  ;;  %v7954_v59 = vand.u32 4294901760, %v20271_v21 }
 0x356   : > { %16185 = vmatpush3.bf16.msra.mxu1 %v16184_v2  ;;  %v16126_v35 = vpack.c.bf16 %v7914_v25, %v7907_v17  ;;  %v22252_v2 = vld [vmem:[#allocation34_spill] sm:$0xff]  ;;  %v7842_v18 = vand.u32 4294901760, %v20285_v54  ;;  %v7935_v36 = vand.u32 4294901760, %v7934_v60  ;;  %v20443_v39 = vand.u32 4294901760, %v22254_v52 }
 0x357   : > { %16187 = vmatprep.subr.bf16.mxu1 %v16186_v50  ;;  %v7815_v48 = vsub.f32 %v20229_v62, %v7814_v1  ;;  %v16228_v30 = vpack.c.bf16 %v7814_v1, %v7807_v16  ;;  %v7921_v50 = vand.u32 4294901760, %v7920_v56  ;;  %v16128_v62 = vpack.c.bf16 %v7802_v44, %v7795_v38  ;;  %v22258_v44 = vld [vmem:[#allocation44_spill] sm:$0xff] }
 0x358   : > { %16085 = vmatpush3.bf16.msra.mxu0 %v22215_v26  ;;  %v7940_v26 = vand.u32 4294901760, %v20242_v53  ;;  %v7829_v11 = vsub.f32 %v20259_v22, %v7828_v19  ;;  %22255 = vst [vmem:[#allocation10_spill] sm:$0xff] %v20443_v39  ;;  %v7948_v1 = vsub.f32 %v20266_v8, %v7947_v24  ;;  %v22256_v22 = vld [vmem:[#allocation17_spill] sm:$0xff]  ;;  %v16234_v17 = vpack.c.bf16 %v7954_v59, %v7947_v24 }
 0x359   : > { %16087 = vmatprep.subr.bf16.mxu0 %v22251_v13  ;;  %v7816_v49 = vand.u32 4294901760, %v7815_v48  ;;  %v16130_v16 = vpack.c.bf16 %v7928_v14, %v7921_v50  ;;  %v7961_v25 = vand.u32 4294901760, %v20293_v9  ;;  %v7968_v13 = vand.u32 4294901760, %v20298_v45 }
 0x35a   : > { %16189 = vmatpush3.bf16.msra.mxu1 %v16188_v10  ;;  %v7941_v7 = vsub.f32 %v20242_v53, %v7940_v26  ;;  %v7809_v53 = vand.u32 4294901760, %v7808_v34  ;;  %v7835_v10 = vand.u32 4294901760, %v20280_v15  ;;  %v7830_v58 = vand.u32 4294901760, %v7829_v11 }
 0x35b   : > { %16223 = vmatprep.subr.bf16.mxu1 %v16222_v55  ;;  %v7843_v8 = vsub.f32 %v20285_v54, %v7842_v18  ;;  %v7949_v34 = vand.u32 4294901760, %v7948_v1  ;;  %v16238_v60 = vpack.c.bf16 %v7968_v13, %v7961_v25  ;;  %v7975_v54 = vand.u32 4294901760, %v20323_v51 }
 0x35c   : > { %16089 = vmatpush3.bf16.msra.mxu0 %v22223_v23  ;;  %v16230_v23 = vpack.c.bf16 %v7940_v26, %v7933_v57  ;;  %v7942_v55 = vand.u32 4294901760, %v7941_v7  ;;  %v7836_v38 = vsub.f32 %v20280_v15, %v7835_v10  ;;  %v16236_v57 = vpack.c.bf16 %v7842_v18, %v7835_v10 }
 0x35d   : > { %8162 = vmatmul.mubr.f32.vlgmr.msra.gmra.mrb[46].mxu1 %v22252_v2  ;;  %16091 = vmatprep.subr.bf16.mxu0 %v22224_v32  ;;  %v7822_v32 = vsub.f32 %v20254_v3, %v7821_v12  ;;  %v7955_v3 = vsub.f32 %v20271_v21, %v7954_v59  ;;  %v16132_v21 = vpack.c.bf16 %v7816_v49, %v7809_v53  ;;  %v7856_v15 = vand.u32 4294901760, %v20316_v28 }
 0x35e   : > { %8168 = vmatprep.mubr.f32.mxu1 %v22253_v4  ;;  %16225 = vmatpush3.bf16.msra.mxu1 %v16224_v27  ;;  %v22257_v27 = vld [vmem:[#allocation42_spill] sm:$0xff]  ;;  %v16134_v26 = vpack.c.bf16 %v7942_v55, %v7935_v36  ;;  %v7982_v7 = vand.u32 4294901760, %v20328_v31  ;;  %v7837_v50 = vand.u32 4294901760, %v7836_v38  ;;  %v7844_v14 = vand.u32 4294901760, %v7843_v8 }
 0x35f   : > { %16227 = vmatprep.subr.bf16.mxu1 %v16226_v63  ;;  %v7823_v56 = vand.u32 4294901760, %v7822_v32  ;;  %v7849_v63 = vand.u32 4294901760, %v20311_v5  ;;  %v7956_v48 = vand.u32 4294901760, %v7955_v3  ;;  %v7870_v53 = vand.u32 4294901760, %v20345_v0 }
 0x360   : > { %16093 = vmatpush3.bf16.msra.mxu0 %v22229_v29  ;;  %v16232_v29 = vpack.c.bf16 %v7828_v19, %v7821_v12  ;;  %v22259_v12 = vld [vmem:[#allocation46_spill] sm:$0xff]  ;;  %v7983_v24 = vsub.f32 %v20328_v31, %v7982_v7  ;;  %v7996_v10 = vand.u32 4294901760, %v20357_v42  ;;  %v16140_v18 = vpack.c.bf16 %v7844_v14, %v7837_v50 }
 0x361   : > { %8171 = vmatmul.mubr.f32.gmra.mrb[48].mxu1 %v20165_v33  ;;  %16127 = vmatprep.subr.bf16.mxu0 %v16126_v35  ;;  %v7969_v35 = vsub.f32 %v20298_v45, %v7968_v13  ;;  %v16136_v19 = vpack.c.bf16 %v7830_v58, %v7823_v56  ;;  %v7857_v45 = vsub.f32 %v20316_v28, %v7856_v15  ;;  %v8003_v38 = vand.u32 4294901760, %v20378_v20 }
 0x362   : > { %16229 = vmatpush3.bf16.msra.mxu1 %v16228_v30  ;;  %8456 = vmatprep.mubr.f32.mxu1 %v22256_v22  ;;  %v7962_v30 = vsub.f32 %v20293_v9, %v7961_v25  ;;  %v7863_v9 = vand.u32 4294901760, %v20340_v47  ;;  %v16138_v59 = vpack.c.bf16 %v7956_v48, %v7949_v34  ;;  %v16240_v11 = vpack.c.bf16 %v7856_v15, %v7849_v63 }
 0x363   : > { %7651 = vmatmul.mubr.f32.vlgmr.msra.gmra.mrb[42].mxu0 %v22257_v27  ;;  %16231 = vmatprep.subr.bf16.mxu1 %v16230_v23  ;;  %v7976_v23 = vsub.f32 %v20323_v51, %v7975_v54  ;;  %v7970_v32 = vand.u32 4294901760, %v7969_v35  ;;  %v16242_v36 = vpack.c.bf16 %v7982_v7, %v7975_v54  ;;  %v7871_v51 = vsub.f32 %v20345_v0, %v7870_v53 }
 0x364   : > { %7656 = vmatprep.mubr.f32.mxu0 %v22258_v44  ;;  %16129 = vmatpush3.bf16.msra.mxu0 %v16128_v62  ;;  %v7850_v62 = vsub.f32 %v20311_v5, %v7849_v63  ;;  %v7963_v49 = vand.u32 4294901760, %v7962_v30  ;;  %v7989_v5 = vand.u32 4294901760, %v20352_v61  ;;  %v7864_v28 = vsub.f32 %v20340_v47, %v7863_v9 }
 0x365   : > { %16131 = vmatprep.subr.bf16.mxu0 %v16130_v16  ;;  %v7858_v55 = vand.u32 4294901760, %v7857_v45  ;;  %v7977_v16 = vand.u32 4294901760, %v7976_v23  ;;  %v7984_v1 = vand.u32 4294901760, %v7983_v24  ;;  %v20475_v3 = vsub.f32 %v22254_v52, %v20443_v39  ;;  %v20518_v23 = vld [vmem:[%s21773_s7 + $0x390] sm:$0xff]  ;;  %v20523_v24 = vld [vmem:[%s21773_s7 + $0x398] sm:$0xff] }
 0x366   : > { %16233 = vmatpush3.bf16.msra.mxu1 %v16232_v29  ;;  %v7851_v31 = vand.u32 4294901760, %v7850_v62  ;;  %v16142_v29 = vpack.c.bf16 %v7970_v32, %v7963_v49  ;;  %v7997_v25 = vsub.f32 %v20357_v42, %v7996_v10  ;;  %v16244_v13 = vpack.c.bf16 %v7870_v53, %v7863_v9 }
 0x367   : > { %7658 = vmatmul.mubr.f32.gmra.mrb[44].mxu0 %v22259_v12  ;;  %16235 = vmatprep.subr.bf16.mxu1 %v16234_v17  ;;  %22260 = vst [vmem:[#allocation39_spill] sm:$0xff] %v20475_v3  ;;  %v7990_v17 = vsub.f32 %v20352_v61, %v7989_v5  ;;  %v16246_v47 = vpack.c.bf16 %v7996_v10, %v7989_v5  ;;  %v7877_v0 = vand.u32 4294901760, %v20366_v46  ;;  %v7884_v27 = vand.u32 4294901760, %v20371_v37 }
 0x368   : > { %16133 = vmatpush3.bf16.msra.mxu0 %v16132_v21  ;;  %8015 = vmatprep.mubr.f32.mxu0 %v22256_v22  ;;  %v7865_v56 = vand.u32 4294901760, %v7864_v28  ;;  %v7872_v58 = vand.u32 4294901760, %v7871_v51  ;;  %v8010_v52 = vand.u32 4294901760, %v20383_v6  ;;  %v16144_v44 = vpack.c.bf16 %v7858_v55, %v7851_v31  ;;  %v20540_v31 = vld [vmem:[%s21773_s7 + $0x310] sm:$0xff]  ;;  %v20545_v55 = vld [vmem:[%s21773_s7 + $0x318] sm:$0xff] }
 0x369   : > { %16135 = vmatprep.subr.bf16.mxu0 %v16134_v26  ;;  %v16146_v61 = vpack.c.bf16 %v7984_v1, %v7977_v16  ;;  %v7878_v42 = vsub.f32 %v20366_v46, %v7877_v0  ;;  %v7885_v21 = vsub.f32 %v20371_v37, %v7884_v27  ;;  %v20493_v26 = vld [vmem:[%s21773_s7 + $0x388] sm:$0xff]  ;;  %v7991_v34 = vand.u32 4294901760, %v7990_v17 }
 0x36a   : > { %16237 = vmatpush3.bf16.msra.mxu1 %v16236_v57  ;;  %v20488_v57 = vld [vmem:[%s21773_s7 + $0x380] sm:$0xff]  ;;  %v7998_v48 = vand.u32 4294901760, %v7997_v25  ;;  %v8004_v30 = vsub.f32 %v20378_v20, %v8003_v38  ;;  %v8011_v46 = vsub.f32 %v20383_v6, %v8010_v52  ;;  %v16248_v37 = vpack.c.bf16 %v7884_v27, %v7877_v0  ;;  %v20511_v6 = vld [vmem:[%s21773_s7 + $0x308] sm:$0xff] }
 0x36b   : > { %16239 = vmatprep.subr.bf16.mxu1 %v16238_v60  ;;  %v7891_v60 = vand.u32 4294901760, %v20391_v40  ;;  %v7898_v15 = vand.u32 4294901760, %v20397_v43  ;;  %v16148_v54 = vpack.c.bf16 %v7872_v58, %v7865_v56  ;;  %v16250_v7 = vpack.c.bf16 %v8010_v52, %v8003_v38  ;;  %v20506_v20 = vld [vmem:[%s21773_s7 + $0x300] sm:$0xff] }
 0x36c   : > { %16137 = vmatpush3.bf16.msra.mxu0 %v16136_v19  ;;  %v21976_v12 = vand.u32 4294901760, %v20488_v57  ;;  %v21975_v19 = vand.u32 4294901760, %v20493_v26  ;;  %v7879_v14 = vand.u32 4294901760, %v7878_v42  ;;  %v7886_v62 = vand.u32 4294901760, %v7885_v21  ;;  %v20580_v42 = vld [vmem:[%s21773_s7 + $0x320] sm:$0xff]  ;;  %v20585_v21 = vld [vmem:[%s21773_s7 + $0x328] sm:$0xff] }
 0x36d   : > { %16139 = vmatprep.subr.bf16.mxu0 %v16138_v59  ;;  %v7892_v9 = vsub.f32 %v20391_v40, %v7891_v60  ;;  %v7899_v45 = vsub.f32 %v20397_v43, %v7898_v15  ;;  %v16150_v53 = vpack.c.bf16 %v7998_v48, %v7991_v34  ;;  %v8005_v49 = vand.u32 4294901760, %v8004_v30  ;;  %v20595_v30 = vld [vmem:[%s21773_s7 + $0x3b0] sm:$0xff] }
 0x36e   : > { %16241 = vmatpush3.bf16.msra.mxu1 %v16240_v11  ;;  %v8012_v32 = vand.u32 4294901760, %v8011_v46  ;;  %v16252_v43 = vpack.c.bf16 %v7898_v15, %v7891_v60  ;;  %v21974_v5 = vand.u32 4294901760, %v20506_v20  ;;  %v21973_v10 = vand.u32 4294901760, %v20511_v6  ;;  %v20600_v46 = vld [vmem:[%s21773_s7 + $0x3b8] sm:$0xff] }
 0x36f   : > { %16243 = vmatprep.subr.bf16.mxu1 %v16242_v36  ;;  %v20533_v36 = vpack.c.bf16 %v21975_v19, %v21976_v12  ;;  %v21972_v28 = vand.u32 4294901760, %v20518_v23  ;;  %v21971_v51 = vand.u32 4294901760, %v20523_v24  ;;  %v21958_v16 = vand.u32 4294901760, %v20475_v3  ;;  %v22265_v60 = vld [vmem:[#allocation31_spill] sm:$0xff] }
 0x370   : > { %16141 = vmatpush3.bf16.msra.mxu0 %v16140_v18  ;;  %v13724_v8 = vpop.f32.mrb[22].mxu1  ;;  %v7893_v17 = vand.u32 4294901760, %v7892_v9  ;;  %v7900_v25 = vand.u32 4294901760, %v7899_v45  ;;  %v16154_v0 = vpack.c.bf16 %v8012_v32, %v8005_v49  ;;  %v20564_v56 = vpack.c.bf16 %v21973_v10, %v21974_v5  ;;  %v20625_v9 = vld [vmem:[%s21773_s7 + $0x330] sm:$0xff]  ;;  %v20630_v45 = vld [vmem:[%s21773_s7 + $0x338] sm:$0xff]  ;;  %v20640_v49 = vld [vmem:[%s21773_s7 + $0x3c8] sm:$0xff] }
 0x371   : > { %v13725_v63 = vpop.f32.mrb[23].mxu1  ;;  %16143 = vmatprep.subr.bf16.mxu0 %v16142_v29  ;;  %22261 = vst [vmem:[#allocation40_spill] sm:$0xff] %v20533_v36  ;;  %v16152_v29 = vpack.c.bf16 %v7886_v62, %v7879_v14  ;;  %v21968_v58 = vand.u32 4294901760, %v20540_v31  ;;  %v21967_v38 = vand.u32 4294901760, %v20545_v55  ;;  %v8680_v48 = vsub.f32 %v20475_v3, %v21958_v16  ;;  %v22268_v32 = vld [vmem:[#allocation35_spill] sm:$0xff]  ;;  %v22273_v16 = vld [vmem:[#allocation21_spill] sm:$0xff] }
 0x372   : > { %v20497_v35 = vadd.f32 %v13725_v63, %v13724_v8  ;;  %16245 = vmatpush3.bf16.msra.mxu1 %v16244_v13  ;;  %v20553_v13 = vld [vmem:[%s21773_s7 + $0x3a0] sm:$0xff]  ;;  %22262 = vst [vmem:[#allocation11_spill] sm:$0xff] %v20564_v56  ;;  %v20573_v8 = vpack.c.bf16 %v21971_v51, %v21972_v28  ;;  %v16156_v34 = vpack.c.bf16 %v7900_v25, %v7893_v17  ;;  %v21960_v14 = vand.u32 4294901760, %v20595_v30  ;;  %v22278_v51 = vld [vmem:[#allocation26_spill] sm:$0xff]  ;;  %v22280_v10 = vld [vmem:[#allocation19_spill] sm:$0xff] }
 0x373   : > { %16247 = vmatprep.subr.bf16.mxu1 %v16246_v47  ;;  %v20558_v47 = vld [vmem:[%s21773_s7 + $0x3a8] sm:$0xff]  ;;  %v20609_v15 = vpack.c.bf16 %v21967_v38, %v21968_v58  ;;  %v21959_v62 = vand.u32 4294901760, %v20600_v46  ;;  %v22277_v58 = vand.u32 4294901760, %v19849_v41  ;;  %v20729_v28 = vand.u32 4294901760, %v22278_v51  ;;  %v22287_v12 = vld [vmem:[#allocation47_spill] sm:$0xff] }
 0x374   : > { %16145 = vmatpush3.bf16.msra.mxu0 %v16144_v44  ;;  %v13727_v50 = vpop.f32.mrb[24].mxu1  ;;  %22263 = vst [vmem:[#allocation43_spill] sm:$0xff] %v20573_v8  ;;  %v21964_v44 = vand.u32 4294901760, %v20553_v13  ;;  %v22276_v38 = vld [vmem:[#allocation22_spill] sm:$0xff] }
 0x375   : > { %v13728_v59 = vpop.f32.mrb[25].mxu1  ;;  %16147 = vmatprep.subr.bf16.mxu0 %v16146_v61  ;;  %v21963_v61 = vand.u32 4294901760, %v20558_v47  ;;  %22266 = vst [vmem:[#allocation12_spill] sm:$0xff] %v20609_v15  ;;  %v20659_v17 = vpack.c.bf16 %v21959_v62, %v21960_v14  ;;  %22279 = vst [vmem:[#allocation38_spill] sm:$0xff] %v20729_v28  ;;  %v22283_v5 = vld [vmem:[#allocation30_spill] sm:$0xff] }
 0x376   : > { %v20525_v11 = vadd.f32 %v13728_v59, %v13727_v50  ;;  %16249 = vmatpush3.bf16.msra.mxu1 %v16248_v37  ;;  %v13648_v40 = vpop.f32.mrb[18].mxu0  ;;  %v22264_v37 = vld [vmem:[#allocation24_spill] sm:$0xff]  ;;  %v8681_v59 = vand.u32 4294901760, %v8680_v48  ;;  %v20678_v48 = vld [vmem:[%s21773_s7 + $0x3d0] sm:$0xff] }
 0x377   : > { %v13649_v18 = vpop.f32.mrb[19].mxu0  ;;  %16251 = vmatprep.subr.bf16.mxu1 %v16250_v7  ;;  %v21961_v7 = vand.u32 4294901760, %v20585_v21  ;;  %v20618_v50 = vpack.c.bf16 %v21963_v61, %v21964_v44  ;;  %22271 = vst [vmem:[#allocation16_spill] sm:$0xff] %v20659_v17  ;;  %v21984_v61 = vand.u32 4294901760, %v20678_v48 }
 0x378   : > { %v20548_v1 = vadd.f32 %v13649_v18, %v13648_v40  ;;  %16149 = vmatpush3.bf16.msra.mxu0 %v16148_v54  ;;  %v21962_v54 = vand.u32 4294901760, %v20580_v42  ;;  %v22269_v40 = vld [vmem:[#allocation18_spill] sm:$0xff]  ;;  %v21966_v18 = vand.u32 4294901760, %v20625_v9 }
 0x379   : > { %16151 = vmatprep.subr.bf16.mxu0 %v16150_v53  ;;  %22267 = vst [vmem:[#allocation14_spill] sm:$0xff] %v20618_v50  ;;  %v20635_v53 = vld [vmem:[%s21773_s7 + $0x3c0] sm:$0xff] }
 0x37a   : > { %16253 = vmatpush3.bf16.msra.mxu1 %v16252_v43  ;;  %v13651_v27 = vpop.f32.mrb[20].mxu0  ;;  %v20649_v43 = vpack.c.bf16 %v21961_v7, %v21962_v54  ;;  %v21970_v25 = vand.u32 4294901760, %v20635_v53 }
 0x37b   : > { %v13652_v52 = vpop.f32.mrb[21].mxu0  ;;  %16287 = vmatprep.subr.bf16.mxu1 %v20533_v36 }
 0x37c   : > { %v20587_v63 = vadd.f32 %v13652_v52, %v13651_v27  ;;  %16153 = vmatpush3.bf16.msra.mxu0 %v16152_v29  ;;  %22270 = vst [vmem:[#allocation15_spill] sm:$0xff] %v20649_v43  ;;  %v21965_v29 = vand.u32 4294901760, %v20630_v45  ;;  %v20666_v27 = vld [vmem:[%s21773_s7 + $0x340] sm:$0xff]  ;;  %v20671_v52 = vld [vmem:[%s21773_s7 + $0x348] sm:$0xff] }
 0x37d   : > { %8458 = vmatmul.mubr.f32.vlgmr.msra.gmra.mrb[50].mxu1 %v22264_v37  ;;  %16155 = vmatprep.subr.bf16.mxu0 %v16154_v0  ;;  %v21969_v0 = vand.u32 4294901760, %v20640_v49  ;;  %v21980_v14 = vand.u32 4294901760, %v20666_v27  ;;  %v21979_v7 = vand.u32 4294901760, %v20671_v52 }
 0x37e   : > { %8463 = vmatprep.mubr.f32.mxu1 %v22265_v60  ;;  %16289 = vmatpush3.bf16.msra.mxu1 %v20564_v56  ;;  %v20691_v62 = vpack.c.bf16 %v21965_v29, %v21966_v18  ;;  %v20708_v29 = vld [vmem:[%s21773_s7 + $0x350] sm:$0xff]  ;;  %v20713_v18 = vld [vmem:[%s21773_s7 + $0x358] sm:$0xff]  ;;  %v22291_v56 = vld [vmem:[#allocation29_spill] sm:$0xff] }
 0x37f   : > { %16291 = vmatprep.subr.bf16.mxu1 %v20573_v8  ;;  %v20701_v54 = vpack.c.bf16 %v21969_v0, %v21970_v25  ;;  %v20721_v0 = vld [vmem:[%s21773_s7 + $0x3e0] sm:$0xff]  ;;  %v20726_v25 = vld [vmem:[%s21773_s7 + $0x3e8] sm:$0xff]  ;;  %v20737_v41 = vpack.c.bf16 %v21979_v7, %v21980_v14  ;;  %v20789_v36 = vand.u32 4294901760, %v22291_v56  ;;  %v20808_v8 = vld [vmem:[%s21773_s7 + $0x378] sm:$0xff] }
 0x380   : > { %16157 = vmatpush3.bf16.msra.mxu0 %v16156_v34  ;;  %v22272_v34 = vld [vmem:[#allocation20_spill] sm:$0xff]  ;;  %22274 = vst [vmem:[#allocation13_spill] sm:$0xff] %v20691_v62  ;;  %v20758_v14 = vld [vmem:[%s21773_s7 + $0x368] sm:$0xff] }
 0x381   : > { %8465 = vmatmul.mubr.f32.gmra.mrb[52].mxu1 %v22268_v32  ;;  %16191 = vmatprep.subr.bf16.mxu0 %v22269_v40  ;;  %22275 = vst [vmem:[#allocation34_spill] sm:$0xff] %v20701_v54  ;;  %22281 = vst [vmem:[#allocation27_spill] sm:$0xff] %v20737_v41  ;;  %v20753_v7 = vld [vmem:[%s21773_s7 + $0x360] sm:$0xff]  ;;  %v22301_v39 = vand.u32 4294901760, %v20758_v14 }
 0x382   : > { %16293 = vmatpush3.bf16.msra.mxu1 %v20609_v15  ;;  %8682 = vmatprep.mubr.f32.mxu1 %v8681_v59  ;;  %v20683_v59 = vld [vmem:[%s21773_s7 + $0x3d8] sm:$0xff]  ;;  %22292 = vst [vmem:[#allocation18_spill] sm:$0xff] %v20789_v36 }
 0x383   : > { %8017 = vmatmul.mubr.f32.vlgmr.msra.gmra.mrb[46].mxu0 %v22264_v37  ;;  %16295 = vmatprep.subr.bf16.mxu1 %v20618_v50  ;;  %v21983_v44 = vand.u32 4294901760, %v20683_v59  ;;  %v22300_v37 = vand.u32 4294901760, %v20753_v7 }
 0x384   : > { %8022 = vmatprep.mubr.f32.mxu0 %v22265_v60  ;;  %16193 = vmatpush3.bf16.msra.mxu0 %v22272_v34 }
 0x385   : > { %16195 = vmatprep.subr.bf16.mxu0 %v22273_v16  ;;  %v20746_v19 = vpack.c.bf16 %v21983_v44, %v21984_v61  ;;  %v20767_v44 = vld [vmem:[%s21773_s7 + $0x3f0] sm:$0xff]  ;;  %v20772_v61 = vld [vmem:[%s21773_s7 + $0x3f8] sm:$0xff] }
 0x386   : > { %16297 = vmatpush3.bf16.msra.mxu1 %v20649_v43  ;;  %v22289_v43 = vand.u32 4294901760, %v20713_v18 }
 0x387   : > { %8024 = vmatmul.mubr.f32.gmra.mrb[48].mxu0 %v22268_v32  ;;  %16299 = vmatprep.subr.bf16.mxu1 %v20659_v17  ;;  %22282 = vst [vmem:[#allocation17_spill] sm:$0xff] %v20746_v19  ;;  %v22288_v17 = vand.u32 4294901760, %v20708_v29  ;;  %v20830_v32 = vsub.f32 %v22291_v56, %v20789_v36 }
 0x388   : > { %16197 = vmatpush3.bf16.msra.mxu0 %v22276_v38  ;;  %8275 = vmatprep.mubr.f32.mxu0 %v22277_v58  ;;  %v20761_v58 = vand.u32 4294901760, %v22283_v5 }
 0x389   : > { %16199 = vmatprep.subr.bf16.mxu0 %v22280_v10  ;;  %v20784_v50 = vpack.c.bf16 %v22289_v43, %v22288_v17  ;;  %v20803_v17 = vld [vmem:[%s21773_s7 + $0x370] sm:$0xff] }
 0x38a   : > { %16301 = vmatpush3.bf16.msra.mxu1 %v20691_v62  ;;  %22284 = vst [vmem:[#allocation42_spill] sm:$0xff] %v20761_v58  ;;  %v20776_v62 = vsub.f32 %v22278_v51, %v20729_v28  ;;  %v22293_v51 = vand.u32 4294901760, %v20721_v0  ;;  %v22294_v28 = vand.u32 4294901760, %v20726_v25  ;;  %v20812_v15 = vsub.f32 %v22283_v5, %v20761_v58  ;;  %v22309_v5 = vld [vmem:[#allocation25_spill] sm:$0xff] }
 0x38b   : > { %16303 = vmatprep.subr.bf16.mxu1 %v20701_v54  ;;  %v22285_v54 = vld [vmem:[#allocation45_spill] sm:$0xff]  ;;  %22290 = vst [vmem:[#allocation46_spill] sm:$0xff] %v20784_v50 }
 0x38c   : > { %16201 = vmatpush3.bf16.msra.mxu0 %v22285_v54  ;;  %22286 = vst [vmem:[#allocation44_spill] sm:$0xff] %v20776_v62  ;;  %22296 = vst [vmem:[#allocation21_spill] sm:$0xff] %v20812_v15 }
 0x38d   : > { %16203 = vmatprep.subr.bf16.mxu0 %v22287_v12  ;;  %v20824_v12 = vpack.c.bf16 %v22301_v39, %v22300_v37  ;;  %v22306_v39 = vand.u32 4294901760, %v20767_v44  ;;  %v22307_v37 = vand.u32 4294901760, %v20772_v61 }
 0x38e   : > { %16305 = vmatpush3.bf16.msra.mxu1 %v20737_v41  ;;  %v20796_v41 = vpack.c.bf16 %v22294_v28, %v22293_v51  ;;  %v22297_v51 = vld [vmem:[#allocation28_spill] sm:$0xff] }
 0x38f   : > { %16307 = vmatprep.subr.bf16.mxu1 %v20746_v19  ;;  %v22298_v19 = vld [vmem:[#allocation23_spill] sm:$0xff]  ;;  %22302 = vst [vmem:[#allocation26_spill] sm:$0xff] %v20824_v12  ;;  %v20847_v58 = vpack.c.bf16 %v22307_v37, %v22306_v39  ;;  %v22313_v39 = vand.u32 4294901760, %v20511_v6 }
 0x390   : > { %22295 = vst [vmem:[#allocation20_spill] sm:$0xff] %v20796_v41  ;;  %v13800_v28 = vpop.f32.mrb[26].mxu1  ;;  %16205 = vmatpush3.bf16.msra.mxu0 %v22297_v51  ;;  %v22318_v51 = vand.u32 4294901760, %v20518_v23 }
 0x391   : > { %v13801_v43 = vpop.f32.mrb[27].mxu1  ;;  %16207 = vmatprep.subr.bf16.mxu0 %v22298_v19  ;;  %v22303_v19 = vand.u32 4294901760, %v20488_v57  ;;  %22308 = vst [vmem:[#allocation30_spill] sm:$0xff] %v20847_v58  ;;  %v20863_v37 = vsub.f32 %v20511_v6, %v22313_v39 }
 0x392   : > { %v20817_v60 = vadd.f32 %v13801_v43, %v13800_v28  ;;  %16309 = vmatpush3.bf16.msra.mxu1 %v20784_v50  ;;  %v22304_v28 = vand.u32 4294901760, %v20493_v26 }
 0x393   : > { %v20835_v43 = vsub.f32 %v20488_v57, %v22303_v19  ;;  %16311 = vmatprep.subr.bf16.mxu1 %v20796_v41  ;;  %v22310_v57 = vand.u32 4294901760, %v20776_v62 }
 0x394   : > { %22299 = vst [vmem:[#allocation22_spill] sm:$0xff] %v20817_v60  ;;  %v20840_v50 = vsub.f32 %v20493_v26, %v22304_v28  ;;  %v13803_v56 = vpop.f32.mrb[28].mxu1  ;;  %16209 = vmatpush3.bf16.msra.mxu0 %v22309_v5  ;;  %v22311_v26 = vld [vmem:[#allocation9_spill] sm:$0xff]  ;;  %v22312_v28 = vand.u32 4294901760, %v20506_v20 }
 0x395   : > { %v8686_v19 = vsub.f32 %v20776_v62, %v22310_v57  ;;  %v13804_v60 = vpop.f32.mrb[29].mxu1  ;;  %16211 = vmatprep.subr.bf16.mxu0 %v22311_v26  ;;  %v22315_v57 = vand.u32 4294901760, %v20803_v17  ;;  %v22316_v62 = vand.u32 4294901760, %v20808_v8 }
 0x396   : > { %22305 = vst [vmem:[#allocation19_spill] sm:$0xff] %v20840_v50  ;;  %v20858_v41 = vsub.f32 %v20506_v20, %v22312_v28  ;;  %v20865_v5 = vadd.f32 %v13804_v60, %v13803_v56  ;;  %v13686_v36 = vpop.f32.mrb[22].mxu0  ;;  %16313 = vmatpush3.bf16.msra.mxu1 %v20824_v12  ;;  %v20877_v20 = vsub.f32 %v20518_v23, %v22318_v51  ;;  %v22319_v28 = vand.u32 4294901760, %v20523_v24 }
 0x397   : > { %v20872_v26 = vpack.c.bf16 %v22316_v62, %v22315_v57  ;;  %v13687_v60 = vpop.f32.mrb[23].mxu0  ;;  %16315 = vmatprep.subr.bf16.mxu1 %v20847_v58  ;;  %v16350_v56 = vpack.c.bf16 %v20840_v50, %v20835_v43  ;;  %v22320_v57 = vld [vmem:[#allocation32_spill] sm:$0xff]  ;;  %v22321_v12 = vand.u32 4294901760, %v20812_v15  ;;  %v8687_v51 = vand.u32 4294901760, %v8686_v19 }
 0x398   : > { %22314 = vst [vmem:[#allocation45_spill] sm:$0xff] %v20865_v5  ;;  %v20882_v6 = vsub.f32 %v20523_v24, %v22319_v28  ;;  %v13688_v62 = vadd.f32 %v13687_v60, %v13686_v36  ;;  %16213 = vmatpush3.bf16.msra.mxu0 %v22320_v57  ;;  %v22322_v5 = vld [vmem:[#allocation33_spill] sm:$0xff]  ;;  %v22323_v24 = vand.u32 4294901760, %v20540_v31  ;;  %v22324_v58 = vand.u32 4294901760, %v20545_v55 }
 0x399   : > { %22317 = vst [vmem:[#allocation29_spill] sm:$0xff] %v20872_v26  ;;  %v8695_v23 = vsub.f32 %v20812_v15, %v22321_v12  ;;  %16215 = vmatprep.subr.bf16.mxu0 %v22322_v5  ;;  %v16352_v12 = vpack.c.bf16 %v20863_v37, %v20858_v41  ;;  %v22325_v19 = vand.u32 4294901760, %v20553_v13  ;;  %v22328_v15 = vld [vmem:[#allocation41_spill] sm:$0xff] }
 0x39a   : > { %v20896_v28 = vsub.f32 %v20540_v31, %v22323_v24  ;;  %v20901_v50 = vsub.f32 %v20545_v55, %v22324_v58  ;;  %v6183_v36 = vadd.f32 %v13688_v62, %v20548_v1  ;;  %v13689_v60 = vpop.f32.mrb[24].mxu0  ;;  %16317 = vmatpush3.bf16.msra.mxu1 %v20872_v26  ;;  %v22326_v31 = vand.u32 4294901760, %v20558_v47 }
 0x39b   : > { %v20910_v39 = vsub.f32 %v20553_v13, %v22325_v19  ;;  %v13690_v55 = vpop.f32.mrb[25].mxu0  ;;  %16351 = vmatprep.subr.bf16.mxu1 %v16350_v56  ;;  %v22327_v1 = vand.u32 4294901760, %v20830_v32  ;;  %v16354_v62 = vpack.c.bf16 %v20882_v6, %v20877_v20  ;;  %v8696_v5 = vand.u32 4294901760, %v8695_v23  ;;  %v22330_v56 = vld [vmem:[#allocation36_spill] sm:$0xff] }
 0x39c   : > { %v20915_v24 = vsub.f32 %v20558_v47, %v22326_v31  ;;  %v13691_v26 = vadd.f32 %v13690_v55, %v13689_v60  ;;  %16217 = vmatpush3.bf16.msra.mxu0 %v22328_v15  ;;  %v20924_v13 = vadd.f32 %v20497_v35, %v6183_v36  ;;  %v22329_v19 = vand.u32 4294901760, %v20580_v42 }
 0x39d   : > { %v8701_v58 = vsub.f32 %v20830_v32, %v22327_v1  ;;  %8688 = vmatmul.mubr.f32.vlgmr.msra.gmra.mrb[54].mxu1 %v8687_v51  ;;  %16219 = vmatprep.subr.bf16.mxu0 %v22330_v56  ;;  %v22331_v31 = vand.u32 4294901760, %v20585_v21  ;;  %v16356_v35 = vpack.c.bf16 %v20901_v50, %v20896_v28  ;;  %v22332_v23 = vand.u32 4294901760, %v20595_v30 }
 0x39e   : > { %v20929_v47 = vsub.f32 %v20580_v42, %v22329_v19  ;;  %v6190_v60 = vadd.f32 %v13691_v26, %v20587_v63  ;;  %8697 = vmatprep.mubr.f32.mxu1 %v8696_v5  ;;  %16353 = vmatpush3.bf16.msra.mxu1 %v16352_v12  ;;  %v22333_v51 = vand.u32 4294901760, %v20600_v46  ;;  %v22334_v63 = vld [vmem:[#allocation37_spill] sm:$0xff]  ;;  %v22339_v19 = vand.u32 4294901760, %v22252_v2 }
 0x39f   : > { %v20935_v1 = vsub.f32 %v20585_v21, %v22331_v31  ;;  %v20943_v42 = vsub.f32 %v20595_v30, %v22332_v23  ;;  %v8702_v55 = vand.u32 4294901760, %v8701_v58  ;;  %16355 = vmatprep.subr.bf16.mxu1 %v16354_v62  ;;  %v16358_v21 = vpack.c.bf16 %v20915_v24, %v20910_v39 }
 0x3a0   : > { %v20948_v36 = vsub.f32 %v20600_v46, %v22333_v51  ;;  %16221 = vmatpush3.bf16.msra.mxu0 %v22334_v63  ;;  %v20954_v5 = vadd.f32 %v20525_v11, %v6190_v60  ;;  %v22335_v30 = vand.u32 4294901760, %v20625_v9  ;;  %v22336_v46 = vand.u32 4294901760, %v20630_v45 }
 0x3a1   : > { %8703 = vmatmul.mubr.f32.gmra.mrb[56].mxu1 %v8702_v55  ;;  %16255 = vmatprep.subr.bf16.mxu0 %v22269_v40  ;;  %v16360_v11 = vpack.c.bf16 %v20935_v1, %v20929_v47  ;;  %v22337_v58 = vand.u32 4294901760, %v20635_v53  ;;  %v22338_v62 = vand.u32 4294901760, %v20640_v49  ;;  %v22340_v31 = vand.u32 4294901760, %v22253_v4 }
 0x3a2   : > { %v20960_v26 = vsub.f32 %v20625_v9, %v22335_v30  ;;  %v20965_v12 = vsub.f32 %v20630_v45, %v22336_v46  ;;  %16357 = vmatpush3.bf16.msra.mxu1 %v16356_v35  ;;  %9077 = vmatprep.mubr.f32.mxu1 %v20475_v3  ;;  %v16362_v45 = vpack.c.bf16 %v20948_v36, %v20943_v42  ;;  %v22343_v4 = vand.u32 4294901760, %v20678_v48 }
 0x3a3   : > { %v20973_v40 = vsub.f32 %v20635_v53, %v22337_v58  ;;  %v20978_v9 = vsub.f32 %v20640_v49, %v22338_v62  ;;  %8279 = vmatmul.mubr.f32.vlgmr.msra.gmra.mrb[50].mxu0 %v22339_v19  ;;  %16359 = vmatprep.subr.bf16.mxu1 %v16358_v21  ;;  %v22341_v53 = vand.u32 4294901760, %v20666_v27  ;;  %v22342_v49 = vand.u32 4294901760, %v20671_v52 }
 0x3a4   : > { %8286 = vmatprep.mubr.f32.mxu0 %v22340_v31  ;;  %16257 = vmatpush3.bf16.msra.mxu0 %v22272_v34  ;;  %v16364_v35 = vpack.c.bf16 %v20965_v12, %v20960_v26  ;;  %v21003_v34 = vsub.f32 %v20678_v48, %v22343_v4  ;;  %v22346_v48 = vand.u32 4294901760, %v20708_v29  ;;  %v22351_v46 = vand.u32 4294901760, %v20758_v14 }
 0x3a5   : > { %16259 = vmatprep.subr.bf16.mxu0 %v22273_v16  ;;  %v20991_v60 = vsub.f32 %v20666_v27, %v22341_v53  ;;  %v20996_v2 = vsub.f32 %v20671_v52, %v22342_v49  ;;  %v22344_v16 = vand.u32 4294901760, %v20683_v59  ;;  %v22345_v27 = vand.u32 4294901760, %v20165_v33  ;;  %v22358_v49 = vld [vmem:[#allocation28_spill] sm:$0xff] }
 0x3a6   : > { %16361 = vmatpush3.bf16.msra.mxu1 %v16360_v11  ;;  %v16366_v52 = vpack.c.bf16 %v20978_v9, %v20973_v40  ;;  %v21020_v51 = vsub.f32 %v20708_v29, %v22346_v48  ;;  %v21049_v11 = vsub.f32 %v20758_v14, %v22351_v46  ;;  %v22353_v58 = vand.u32 4294901760, %v20767_v44 }
 0x3a7   : > { %v21008_v23 = vsub.f32 %v20683_v59, %v22344_v16  ;;  %8290 = vmatmul.mubr.f32.gmra.mrb[52].mxu0 %v22345_v27  ;;  %16363 = vmatprep.subr.bf16.mxu1 %v16362_v45  ;;  %v22347_v59 = vand.u32 4294901760, %v20713_v18  ;;  %v16368_v55 = vpack.c.bf16 %v20996_v2, %v20991_v60  ;;  %v22355_v14 = vand.u32 4294901760, %v20803_v17  ;;  %v22359_v16 = vld [vmem:[#allocation23_spill] sm:$0xff] }
 0x3a8   : > { %16261 = vmatpush3.bf16.msra.mxu0 %v22276_v38  ;;  %8567 = vmatprep.mubr.f32.mxu0 %v22256_v22  ;;  %v22348_v38 = vand.u32 4294901760, %v20721_v0  ;;  %v21058_v62 = vsub.f32 %v20767_v44, %v22353_v58  ;;  %v22356_v31 = vand.u32 4294901760, %v20808_v8  ;;  %v22360_v27 = vld [vmem:[#allocation19_spill] sm:$0xff]  ;;  %v8718_v48 = vand.u32 4294901760, %v20863_v37 }
 0x3a9   : > { %16263 = vmatprep.subr.bf16.mxu0 %v22280_v10  ;;  %v21025_v33 = vsub.f32 %v20713_v18, %v22347_v59  ;;  %v22349_v10 = vand.u32 4294901760, %v20726_v25  ;;  %v16370_v29 = vpack.c.bf16 %v21008_v23, %v21003_v34  ;;  %v22350_v18 = vand.u32 4294901760, %v20753_v7 }
 0x3aa   : > { %16365 = vmatpush3.bf16.msra.mxu1 %v16364_v35  ;;  %v21032_v22 = vsub.f32 %v20721_v0, %v22348_v38  ;;  %v22352_v0 = vld [vmem:[#allocation47_spill] sm:$0xff]  ;;  %v21070_v45 = vsub.f32 %v20803_v17, %v22355_v14  ;;  %v21075_v53 = vsub.f32 %v20808_v8, %v22356_v31  ;;  %v8823_v35 = vand.u32 4294901760, %v20835_v43 }
 0x3ab   : > { %v21037_v21 = vsub.f32 %v20726_v25, %v22349_v10  ;;  %16367 = vmatprep.subr.bf16.mxu1 %v16366_v52  ;;  %v21044_v30 = vsub.f32 %v20753_v7, %v22350_v18  ;;  %v16372_v25 = vpack.c.bf16 %v21025_v33, %v21020_v51  ;;  %v22354_v7 = vand.u32 4294901760, %v20772_v61 }
 0x3ac   : > { %16265 = vmatpush3.bf16.msra.mxu0 %v22285_v54  ;;  %22357 = vst [vmem:[#allocation32_spill] sm:$0xff] %v21075_v53  ;;  %v8830_v52 = vand.u32 4294901760, %v22360_v27  ;;  %v8711_v17 = vand.u32 4294901760, %v20858_v41  ;;  %v8837_v8 = vand.u32 4294901760, %v20877_v20  ;;  %v8725_v38 = vand.u32 4294901760, %v20896_v28 }
 0x3ad   : > { %16267 = vmatprep.subr.bf16.mxu0 %v22352_v0  ;;  %v21063_v19 = vsub.f32 %v20772_v61, %v22354_v7  ;;  %v16374_v54 = vpack.c.bf16 %v21037_v21, %v21032_v22  ;;  %v16376_v61 = vpack.c.bf16 %v21049_v11, %v21044_v30  ;;  %v8732_v10 = vand.u32 4294901760, %v20901_v50  ;;  %v22362_v0 = vld [vmem:[#allocation25_spill] sm:$0xff] }
 0x3ae   : > { %16369 = vmatpush3.bf16.msra.mxu1 %v16368_v55  ;;  %v8844_v55 = vand.u32 4294901760, %v20882_v6  ;;  %v8824_v18 = vsub.f32 %v20835_v43, %v8823_v35  ;;  %v16380_v58 = vpack.c.bf16 %v21075_v53, %v21070_v45  ;;  %v8712_v7 = vsub.f32 %v20858_v41, %v8711_v17 }
 0x3af   : > { %16371 = vmatprep.subr.bf16.mxu1 %v16370_v29  ;;  %v16378_v29 = vpack.c.bf16 %v21063_v19, %v21058_v62  ;;  %v8719_v14 = vsub.f32 %v20863_v37, %v8718_v48  ;;  %v8858_v43 = vand.u32 4294901760, %v20915_v24  ;;  %v8838_v41 = vsub.f32 %v20877_v20, %v8837_v8 }
 0x3b0   : > { %v13876_v44 = vpop.f32.mrb[30].mxu1  ;;  %16269 = vmatpush3.bf16.msra.mxu0 %v22358_v49  ;;  %v16416_v49 = vpack.c.bf16 %v8718_v48, %v8711_v17  ;;  %v16418_v3 = vpack.c.bf16 %v8844_v55, %v8837_v8  ;;  %v8825_v37 = vand.u32 4294901760, %v8824_v18  ;;  %v8726_v20 = vsub.f32 %v20896_v28, %v8725_v38 }
 0x3b1   : > { %v13877_v4 = vpop.f32.mrb[31].mxu1  ;;  %16271 = vmatprep.subr.bf16.mxu0 %v22359_v16  ;;  %v8733_v8 = vsub.f32 %v20901_v50, %v8732_v10  ;;  %v8753_v28 = vand.u32 4294901760, %v20960_v26  ;;  %v8760_v50 = vand.u32 4294901760, %v20965_v12 }
 0x3b2   : > { %v21086_v59 = vadd.f32 %v13877_v4, %v13876_v44  ;;  %16373 = vmatpush3.bf16.msra.mxu1 %v16372_v25  ;;  %v8831_v25 = vsub.f32 %v22360_v27, %v8830_v52  ;;  %v22363_v44 = vld [vmem:[#allocation9_spill] sm:$0xff]  ;;  %v8851_v4 = vand.u32 4294901760, %v20910_v39 }
 0x3b3   : > { %16375 = vmatprep.subr.bf16.mxu1 %v16374_v54  ;;  %v16414_v54 = vpack.c.bf16 %v8830_v52, %v8823_v35  ;;  %v8746_v35 = vand.u32 4294901760, %v20935_v1  ;;  %v8845_v52 = vsub.f32 %v20882_v6, %v8844_v55  ;;  %v8839_v6 = vand.u32 4294901760, %v8838_v41 }
 0x3b4   : > { %22361 = vst [vmem:[#allocation41_spill] sm:$0xff] %v21086_v59  ;;  %v13879_v46 = vpop.f32.mrb[32].mxu1  ;;  %16273 = vmatpush3.bf16.msra.mxu0 %v22362_v0  ;;  %v21105_v59 = vpack.c.bf16 %v8732_v10, %v8725_v38  ;;  %v8832_v48 = vand.u32 4294901760, %v8831_v25  ;;  %v8852_v55 = vsub.f32 %v20910_v39, %v8851_v4 }
 0x3b5   : > { %v13880_v31 = vpop.f32.mrb[33].mxu1  ;;  %16275 = vmatprep.subr.bf16.mxu0 %v22363_v44  ;;  %v8739_v44 = vand.u32 4294901760, %v20929_v47  ;;  %v8747_v10 = vsub.f32 %v20935_v1, %v8746_v35 }
 0x3b6   : > { %v21103_v16 = vadd.f32 %v13880_v31, %v13879_v46  ;;  %v13762_v0 = vpop.f32.mrb[26].mxu0  ;;  %16377 = vmatpush3.bf16.msra.mxu1 %v16376_v61  ;;  %v8713_v46 = vand.u32 4294901760, %v8712_v7  ;;  %v8720_v61 = vand.u32 4294901760, %v8719_v14  ;;  %v22365_v31 = vld [vmem:[#allocation33_spill] sm:$0xff]  ;;  %v8846_v7 = vand.u32 4294901760, %v8845_v52 }
 0x3b7   : > { %v13763_v27 = vpop.f32.mrb[27].mxu0  ;;  %16379 = vmatprep.subr.bf16.mxu1 %v16378_v29  ;;  %v8865_v29 = vand.u32 4294901760, %v20943_v42  ;;  %v8872_v14 = vand.u32 4294901760, %v20948_v36 }
 0x3b8   : > { %22364 = vst [vmem:[#allocation36_spill] sm:$0xff] %v21103_v16  ;;  %v13764_v17 = vadd.f32 %v13763_v27, %v13762_v0  ;;  %16277 = vmatpush3.bf16.msra.mxu0 %v22320_v57  ;;  %v16422_v16 = vpack.c.bf16 %v8858_v43, %v8851_v4  ;;  %v8859_v57 = vsub.f32 %v20915_v24, %v8858_v43  ;;  %v22367_v24 = vld [vmem:[#allocation44_spill] sm:$0xff]  ;;  %v8727_v43 = vand.u32 4294901760, %v8726_v20 }
 0x3b9   : > { %16279 = vmatprep.subr.bf16.mxu0 %v22365_v31  ;;  %v16424_v4 = vpack.c.bf16 %v8746_v35, %v8739_v44  ;;  %v8734_v0 = vand.u32 4294901760, %v8733_v8  ;;  %v16322_v1 = vpack.c.bf16 %v8846_v7, %v8839_v6  ;;  %v16426_v52 = vpack.c.bf16 %v8872_v14, %v8865_v29  ;;  %v22369_v35 = vld [vmem:[#allocation45_spill] sm:$0xff]  ;;  %v22371_v6 = vld [vmem:[#allocation24_spill] sm:$0xff] }
 0x3ba   : > { %v6445_v18 = vadd.f32 %v13764_v17, %v20924_v13  ;;  %v13765_v53 = vpop.f32.mrb[28].mxu0  ;;  %16381 = vmatpush3.bf16.msra.mxu1 %v16380_v58  ;;  %v8740_v13 = vsub.f32 %v20929_v47, %v8739_v44  ;;  %v22366_v58 = vld [vmem:[#allocation22_spill] sm:$0xff]  ;;  %v8853_v47 = vand.u32 4294901760, %v8852_v55  ;;  %v8860_v27 = vand.u32 4294901760, %v8859_v57 }
 0x3bb   : > { %v13766_v25 = vpop.f32.mrb[29].mxu0  ;;  %16415 = vmatprep.subr.bf16.mxu1 %v16414_v54  ;;  %v16318_v54 = vpack.c.bf16 %v8832_v48, %v8825_v37  ;;  %v8879_v17 = vand.u32 4294901760, %v20973_v40  ;;  %v8886_v31 = vand.u32 4294901760, %v20978_v9  ;;  %v8748_v44 = vand.u32 4294901760, %v8747_v10 }
 0x3bc   : > { %v13767_v38 = vadd.f32 %v13766_v25, %v13765_v53  ;;  %16281 = vmatpush3.bf16.msra.mxu0 %v22328_v15  ;;  %v21126_v39 = vadd.f32 %v22366_v58, %v6445_v18  ;;  %v22368_v53 = vld [vmem:[#allocation21_spill] sm:$0xff]  ;;  %v16320_v15 = vpack.c.bf16 %v8720_v61, %v8713_v46  ;;  %v8741_v37 = vand.u32 4294901760, %v8740_v13  ;;  %v22370_v61 = vld [vmem:[#allocation10_spill] sm:$0xff] }
 0x3bd   : > { %9080 = vmatmul.mubr.f32.vlgmr.msra.gmra.mrb[58].mxu1 %v22367_v24  ;;  %16283 = vmatprep.subr.bf16.mxu0 %v22330_v56  ;;  %v16428_v56 = vpack.c.bf16 %v8760_v50, %v8753_v28  ;;  %v8866_v48 = vsub.f32 %v20943_v42, %v8865_v29  ;;  %v8873_v46 = vsub.f32 %v20948_v36, %v8872_v14  ;;  %v8774_v20 = vand.u32 4294901760, %v20996_v2  ;;  %v22372_v36 = vld [vmem:[#allocation31_spill] sm:$0xff] }
 0x3be   : > { %v6456_v41 = vadd.f32 %v13767_v38, %v20954_v5  ;;  %9086 = vmatprep.mubr.f32.mxu1 %v22368_v53  ;;  %16417 = vmatpush3.bf16.msra.mxu1 %v16416_v49  ;;  %v16324_v49 = vpack.c.bf16 %v8734_v0, %v8727_v43  ;;  %v8754_v8 = vsub.f32 %v20960_v26, %v8753_v28  ;;  %v8788_v28 = vand.u32 4294901760, %v21025_v33 }
 0x3bf   : > { %16419 = vmatprep.subr.bf16.mxu1 %v16418_v3  ;;  %v8767_v3 = vand.u32 4294901760, %v20991_v60  ;;  %v8761_v18 = vsub.f32 %v20965_v12, %v8760_v50  ;;  %v16430_v55 = vpack.c.bf16 %v8886_v31, %v8879_v17  ;;  %v8880_v57 = vsub.f32 %v20973_v40, %v8879_v17  ;;  %v22373_v50 = vld [vmem:[#allocation35_spill] sm:$0xff] }
 0x3c0   : > { %16285 = vmatpush3.bf16.msra.mxu0 %v22334_v63  ;;  %v21136_v5 = vadd.f32 %v22369_v35, %v6456_v41  ;;  %v16326_v63 = vpack.c.bf16 %v8860_v27, %v8853_v47  ;;  %v8887_v42 = vsub.f32 %v20978_v9, %v8886_v31  ;;  %v8775_v25 = vsub.f32 %v20996_v2, %v8774_v20  ;;  %v21168_v27 = vld [vmem:[%s21769_s3] sm:$0xff] }
 0x3c1   : > { %9089 = vmatmul.mubr.f32.gmra.mrb[60].mxu1 %v20830_v32  ;;  %16319 = vmatprep.subr.bf16.mxu0 %v16318_v54  ;;  %v8768_v29 = vsub.f32 %v20991_v60, %v8767_v3  ;;  %v8867_v26 = vand.u32 4294901760, %v8866_v48  ;;  %v8874_v7 = vand.u32 4294901760, %v8873_v46  ;;  %v8893_v12 = vand.u32 4294901760, %v21003_v34 }
 0x3c2   : > { %16421 = vmatpush3.bf16.msra.mxu1 %v21105_v59  ;;  %9374 = vmatprep.mubr.f32.mxu1 %v22370_v61  ;;  %v16328_v59 = vpack.c.bf16 %v8748_v44, %v8741_v37  ;;  %v8755_v14 = vand.u32 4294901760, %v8754_v8  ;;  %v8762_v40 = vand.u32 4294901760, %v8761_v18  ;;  %v8781_v9 = vand.u32 4294901760, %v21020_v51  ;;  %v9504_v37 = vld [vmem:[#allocation2] sm:$0x3] }
 0x3c3   : > { %8569 = vmatmul.mubr.f32.vlgmr.msra.gmra.mrb[54].mxu0 %v22371_v6  ;;  %16423 = vmatprep.subr.bf16.mxu1 %v16422_v16  ;;  %v8900_v16 = vand.u32 4294901760, %v21008_v23  ;;  %v8881_v60 = vand.u32 4294901760, %v8880_v57  ;;  %v8888_v38 = vand.u32 4294901760, %v8887_v42  ;;  %v8894_v2 = vsub.f32 %v21003_v34, %v8893_v12  ;;  %v22374_v57 = vld [vmem:[#allocation32_spill] sm:$0xff] }
 0x3c4   : > { %8574 = vmatprep.mubr.f32.mxu0 %v22372_v36  ;;  %16321 = vmatpush3.bf16.msra.mxu0 %v16320_v15  ;;  %v8769_v10 = vand.u32 4294901760, %v8768_v29  ;;  %v8776_v58 = vand.u32 4294901760, %v8775_v25  ;;  %v8907_v54 = vand.u32 4294901760, %v21032_v22  ;;  %v16330_v43 = vpack.c.bf16 %v8874_v7, %v8867_v26  ;;  %v21194_v36 = vld [vmem:[%s21769_s3 + $0x18] sm:$0xff] }
 0x3c5   : > { %16323 = vmatprep.subr.bf16.mxu0 %v16322_v1  ;;  %v8901_v13 = vsub.f32 %v21008_v23, %v8900_v16  ;;  %v8795_v0 = vand.u32 4294901760, %v21044_v30  ;;  %v8802_v41 = vand.u32 4294901760, %v21049_v11  ;;  %v16432_v15 = vpack.c.bf16 %v8774_v20, %v8767_v3 }
 0x3c6   : > { %16425 = vmatpush3.bf16.msra.mxu1 %v16424_v4  ;;  %v8914_v4 = vand.u32 4294901760, %v21037_v21  ;;  %v16332_v34 = vpack.c.bf16 %v8762_v40, %v8755_v14  ;;  %v16434_v47 = vpack.c.bf16 %v8900_v16, %v8893_v12  ;;  %v16436_v23 = vpack.c.bf16 %v8788_v28, %v8781_v9 }
 0x3c7   : > { %8576 = vmatmul.mubr.f32.gmra.mrb[56].mxu0 %v22373_v50  ;;  %16427 = vmatprep.subr.bf16.mxu1 %v16426_v52  ;;  %v8895_v1 = vand.u32 4294901760, %v8894_v2  ;;  %v8902_v52 = vand.u32 4294901760, %v8901_v13  ;;  %v8782_v17 = vsub.f32 %v21020_v51, %v8781_v9  ;;  %v8789_v31 = vsub.f32 %v21025_v33, %v8788_v28 }
 0x3c8   : > { %16325 = vmatpush3.bf16.msra.mxu0 %v16324_v49  ;;  %8933 = vmatprep.mubr.f32.mxu0 %v22370_v61  ;;  %v16334_v44 = vpack.c.bf16 %v8888_v38, %v8881_v60  ;;  %v16336_v35 = vpack.c.bf16 %v8776_v58, %v8769_v10  ;;  %v16438_v49 = vpack.c.bf16 %v8914_v4, %v8907_v54  ;;  %v8921_v46 = vand.u32 4294901760, %v21058_v62 }
 0x3c9   : > { %16327 = vmatprep.subr.bf16.mxu0 %v16326_v63  ;;  %v8908_v3 = vsub.f32 %v21032_v22, %v8907_v54  ;;  %v16440_v48 = vpack.c.bf16 %v8802_v41, %v8795_v0  ;;  %v8915_v51 = vsub.f32 %v21037_v21, %v8914_v4  ;;  %v9515_v33 = vand.u32 4294901760, %v21168_v27  ;;  %v21189_v21 = vld [vmem:[%s21769_s3 + $0x10] sm:$0xff] }
 0x3ca   : > { %16429 = vmatpush3.bf16.msra.mxu1 %v16428_v56  ;;  %v21175_v56 = vld [vmem:[%s21769_s3 + $0x8] sm:$0xff]  ;;  %v8928_v63 = vand.u32 4294901760, %v21063_v19  ;;  %v8809_v20 = vand.u32 4294901760, %v21070_v45  ;;  %v9512_v18 = vsel %vm1036_vm3, %v9504_v37, 0  ;;  %v16338_v6 = vpack.c.bf16 %v8902_v52, %v8895_v1 }
 0x3cb   : > { %16431 = vmatprep.subr.bf16.mxu1 %v16430_v55  ;;  %v9518_v8 = vand.u32 4294901760, %v21175_v56  ;;  %v8783_v22 = vand.u32 4294901760, %v8782_v17  ;;  %v8790_v55 = vand.u32 4294901760, %v8789_v31  ;;  %v8816_v42 = vand.u32 4294901760, %v22374_v57 }
 0x3cc   : > { %16329 = vmatpush3.bf16.msra.mxu0 %v16328_v59  ;;  %v8909_v29 = vand.u32 4294901760, %v8908_v3  ;;  %v8796_v25 = vsub.f32 %v21044_v30, %v8795_v0  ;;  %v8803_v26 = vsub.f32 %v21049_v11, %v8802_v41  ;;  %v8922_v7 = vsub.f32 %v21058_v62, %v8921_v46 }
 0x3cd   : > { %16331 = vmatprep.subr.bf16.mxu0 %v16330_v43  ;;  %v8916_v16 = vand.u32 4294901760, %v8915_v51  ;;  %v8929_v14 = vsub.f32 %v21063_v19, %v8928_v63  ;;  %v21200_v40 = vand.u32 4294901760, %v9512_v18  ;;  %v21203_v9 = vsub.f32 %v21168_v27, %v9515_v33 }
 0x3ce   : > { %16433 = vmatpush3.bf16.msra.mxu1 %v16432_v15  ;;  %v9521_v50 = vand.u32 4294901760, %v21189_v21  ;;  %v9524_v30 = vand.u32 4294901760, %v21194_v36  ;;  %v21210_v11 = vsub.f32 %v21175_v56, %v9518_v8  ;;  %v16340_v62 = vpack.c.bf16 %v8790_v55, %v8783_v22 }
 0x3cf   : > { %16435 = vmatprep.subr.bf16.mxu1 %v16434_v47  ;;  %v16442_v60 = vpack.c.bf16 %v8928_v63, %v8921_v46  ;;  %v16444_v38 = vpack.c.bf16 %v8816_v42, %v8809_v20  ;;  %v8810_v19 = vsub.f32 %v21070_v45, %v8809_v20  ;;  %v8797_v13 = vand.u32 4294901760, %v8796_v25 }
 0x3d0   : > { %v13952_v59 = vpop.f32.mrb[34].mxu1  ;;  %16333 = vmatpush3.bf16.msra.mxu0 %v16332_v34  ;;  %v8804_v10 = vand.u32 4294901760, %v8803_v26  ;;  %v8923_v58 = vand.u32 4294901760, %v8922_v7  ;;  %v8817_v54 = vsub.f32 %v22374_v57, %v8816_v42  ;;  %v16342_v43 = vpack.c.bf16 %v8916_v16, %v8909_v29  ;;  %v22378_v26 = vld [vmem:[#allocation36_spill] sm:$0xff] }
 0x3d1   : > { %v13953_v12 = vpop.f32.mrb[35].mxu1  ;;  %16335 = vmatprep.subr.bf16.mxu0 %v16334_v44  ;;  %v8930_v0 = vand.u32 4294901760, %v8929_v14  ;;  %v21215_v41 = vsub.f32 %v9512_v18, %v21200_v40  ;;  %v9596_v15 = vand.u32 4294901760, %v21203_v9  ;;  %v9603_v45 = vand.u32 4294901760, %v21210_v11 }
 0x3d2   : > { %v21205_v28 = vadd.f32 %v13953_v12, %v13952_v59  ;;  %16437 = vmatpush3.bf16.msra.mxu1 %v16436_v23  ;;  %v21222_v23 = vsub.f32 %v21189_v21, %v9521_v50  ;;  %v21225_v27 = vsub.f32 %v21194_v36, %v9524_v30  ;;  %v8811_v52 = vand.u32 4294901760, %v8810_v19  ;;  %v22377_v36 = vld [vmem:[#allocation42_spill] sm:$0xff]  ;;  %v22380_v12 = vld [vmem:[#allocation40_spill] sm:$0xff] }
 0x3d3   : > { %16439 = vmatprep.subr.bf16.mxu1 %v16438_v49  ;;  %v16344_v31 = vpack.c.bf16 %v8804_v10, %v8797_v13  ;;  %v8818_v56 = vand.u32 4294901760, %v8817_v54  ;;  %v16346_v37 = vpack.c.bf16 %v8930_v0, %v8923_v58  ;;  %v21227_v44 = vpack.c.bf16 %v9518_v8, %v9515_v33  ;;  %v22385_v13 = vld [vmem:[#allocation39_spill] sm:$0xff]  ;;  %v22387_v58 = vld [vmem:[#allocation14_spill] sm:$0xff] }
 0x3d4   : > { %v13955_v2 = vpop.f32.mrb[36].mxu1  ;;  %16337 = vmatpush3.bf16.msra.mxu0 %v16336_v35  ;;  %v9585_v35 = vand.u32 4294901760, %v21215_v41  ;;  %v9597_v49 = vsub.f32 %v21203_v9, %v9596_v15  ;;  %v9604_v46 = vsub.f32 %v21210_v11, %v9603_v45  ;;  %v9610_v51 = vand.u32 4294901760, %v21222_v23 }
 0x3d5   : > { %v13956_v4 = vpop.f32.mrb[37].mxu1  ;;  %16339 = vmatprep.subr.bf16.mxu0 %v16338_v6  ;;  %v9617_v63 = vand.u32 4294901760, %v21225_v27  ;;  %v17152_v20 = vmov 0.0|0.0   ;;  %v16348_v18 = vpack.c.bf16 %v8818_v56, %v8811_v52  ;;  %v22375_v6 = vld [vmem:[#allocation41_spill] sm:$0xff]  ;;  %v21244_v55 = vpack.c.bf16 %v9524_v30, %v9521_v50 }
 0x3d6   : > { %v21218_v34 = vadd.f32 %v13956_v4, %v13955_v2  ;;  %v13838_v47 = vpop.f32.mrb[30].mxu0  ;;  %16441 = vmatpush3.bf16.msra.mxu1 %v16440_v48  ;;  %v9586_v57 = vsub.f32 %v21215_v41, %v9585_v35  ;;  %v9598_v42 = vand.u32 4294901760, %v9597_v49  ;;  %v9605_v59 = vand.u32 4294901760, %v9604_v46  ;;  %v22384_v2 = vld [vmem:[#allocation12_spill] sm:$0xff]  ;;  %v22388_v4 = vld [vmem:[#allocation15_spill] sm:$0xff] }
 0x3d7   : > { %v13839_v1 = vpop.f32.mrb[31].mxu0  ;;  %16443 = vmatprep.subr.bf16.mxu1 %v16442_v60  ;;  %v9611_v29 = vsub.f32 %v21222_v23, %v9610_v51  ;;  %v9618_v25 = vsub.f32 %v21225_v27, %v9617_v63  ;;  %v22381_v14 = vmov 0.0   ;;  %v22382_v60 = vld [vmem:[#allocation11_spill] sm:$0xff]  ;;  %v22386_v10 = vand.u32 4294901760, %v22385_v13 }
 0x3d8   : > { %v13840_v17 = vadd.f32 %v13839_v1, %v13838_v47  ;;  %16341 = vmatpush3.bf16.msra.mxu0 %v16340_v62  ;;  %v9587_v16 = vand.u32 4294901760, %v9586_v57  ;;  %v21267_v50 = vpack.c.bf16 %v9605_v59, %v9598_v42  ;;  %v21288_v54 = vpack.c.bf16 %v21210_v11, %v21203_v9  ;;  %v22390_v1 = vld [vmem:[#allocation13_spill] sm:$0xff]  ;;  %v22392_v49 = vld [vmem:[#allocation27_spill] sm:$0xff]  ;;  %v22397_v57 = vld [vmem:[#allocation30_spill] sm:$0xff] }
 0x3d9   : > { %16343 = vmatprep.subr.bf16.mxu0 %v16342_v43  ;;  %v9612_v30 = vand.u32 4294901760, %v9611_v29  ;;  %v9619_v62 = vand.u32 4294901760, %v9618_v25  ;;  %v22389_v43 = vld [vmem:[#allocation16_spill] sm:$0xff]  ;;  %v21297_v0 = vpack.c.bf16 %v21225_v27, %v21222_v23  ;;  %v21311_v56 = vpack.c.bf16 %v9603_v45, %v9596_v15  ;;  %v22394_v45 = vld [vmem:[#allocation46_spill] sm:$0xff] }
 0x3da   : > { %v6735_v3 = vadd.f32 %v13840_v17, %v21126_v39  ;;  %v13841_v48 = vpop.f32.mrb[32].mxu0  ;;  %16445 = vmatpush3.bf16.msra.mxu1 %v16444_v38  ;;  %v22376_v39 = vld [vmem:[#allocation38_spill] sm:$0xff]  ;;  %v22383_v38 = vld [vmem:[#allocation43_spill] sm:$0xff]  ;;  %v21324_v9 = vpack.c.bf16 %v9617_v63, %v9610_v51  ;;  %v22400_v59 = vand.u32 4294901760, %v22368_v53  ;;  %v22401_v29 = vand.u32 4294901760, %v20830_v32 }
 0x3db   : > { %v13842_v33 = vpop.f32.mrb[33].mxu0  ;;  %16478 = vmatprep.subr.bf16.mxu1 %v17152_v20  ;;  %v21275_v19 = vpack.c.bf16 %v9619_v62, %v9612_v30  ;;  %v22391_v17 = vld [vmem:[#allocation34_spill] sm:$0xff] }
 0x3dc   : > { %v13843_v8 = vadd.f32 %v13842_v33, %v13841_v48  ;;  %16345 = vmatpush3.bf16.msra.mxu0 %v16344_v31  ;;  %v21241_v22 = vadd.f32 %v22375_v6, %v6735_v3  ;;  %v22393_v48 = vld [vmem:[#allocation17_spill] sm:$0xff]  ;;  %v22396_v51 = vld [vmem:[#allocation26_spill] sm:$0xff] }
 0x3dd   : > { %9376 = vmatmul.mubr.f32.vlgmr.msra.gmra.mrb[62].mxu1 %v22376_v39  ;;  %16347 = vmatprep.subr.bf16.mxu0 %v16346_v37 }
 0x3de   : > { %v6742_v21 = vadd.f32 %v13843_v8, %v21136_v5  ;;  %9381 = vmatprep.mubr.f32.mxu1 %v22377_v36  ;;  %16480 = vmatpush3.bf16.msra.mxu1 %v21227_v44  ;;  %v22379_v5 = vld [vmem:[#allocation18_spill] sm:$0xff]  ;;  %v22395_v8 = vld [vmem:[#allocation20_spill] sm:$0xff] }
 0x3df   : > { %16481 = vmatprep.subr.bf16.mxu1 %v17152_v20 }
 0x3e0   : > { %16349 = vmatpush3.bf16.msra.mxu0 %v16348_v18  ;;  %v21260_v7 = vadd.f32 %v22378_v26, %v6742_v21 }
 0x3e1   : > { %9383 = vmatmul.mubr.f32.gmra.mrb[64].mxu1 %v22379_v5  ;;  %16383 = vmatprep.subr.bf16.mxu0 %v22380_v12 }
 0x3e2   : > { %16483 = vmatpush3.bf16.msra.mxu1 %v21244_v55  ;;  %14806 = vmatprep.mubr.msk.f32.mxu1 %vm17153_vm4, %v22381_v14 }
 0x3e3   : > { %8935 = vmatmul.mubr.f32.vlgmr.msra.gmra.mrb[58].mxu0 %v22376_v39  ;;  %16484 = vmatprep.subr.bf16.mxu1 %v17152_v20 }
 0x3e4   : > { %8940 = vmatprep.mubr.f32.mxu0 %v22377_v36  ;;  %16385 = vmatpush3.bf16.msra.mxu0 %v22382_v60 }
 0x3e5   : > { %16387 = vmatprep.subr.bf16.mxu0 %v22383_v38  ;;  %14807 = vmatmul.mubr.f32.vlgmr.msra.gmra.mrb[66].mxu1 %v9587_v16 }
 0x3e6   : > { %16486 = vmatpush3.bf16.msra.mxu1 %v21267_v50  ;;  %14817 = vmatprep.mubr.msk.f32.mxu1 %vm17153_vm4, %v22381_v14 }
 0x3e7   : > { %8942 = vmatmul.mubr.f32.gmra.mrb[60].mxu0 %v22379_v5  ;;  %16487 = vmatprep.subr.bf16.mxu1 %v17152_v20 }
 0x3e8   : > { %16389 = vmatpush3.bf16.msra.mxu0 %v22384_v2  ;;  %9193 = vmatprep.mubr.f32.mxu0 %v22386_v10 }
 0x3e9   : > { %16391 = vmatprep.subr.bf16.mxu0 %v22387_v58 }
 0x3ea   : > { %16489 = vmatpush3.bf16.msra.mxu1 %v21275_v19 }
 0x3eb   : > { %16490 = vmatprep.subr.bf16.mxu1 %v17152_v20 }
 0x3ec   : > { %16393 = vmatpush3.bf16.msra.mxu0 %v22388_v4 }
 0x3ed   : > { %16395 = vmatprep.subr.bf16.mxu0 %v22389_v43  ;;  %14818 = vmatmul.mubr.f32.vlgmr.msra.gmra.mrb[68].mxu1 %v21200_v40 }
 0x3ee   : > { %16492 = vmatpush3.bf16.msra.mxu1 %v21288_v54  ;;  %14828 = vmatprep.mubr.msk.f32.mxu1 %vm17153_vm4, %v22381_v14 }
 0x3ef   : > { %16493 = vmatprep.subr.bf16.mxu1 %v17152_v20 }
 0x3f0   : > { %v14028_v47 = vpop.f32.mrb[38].mxu1  ;;  %16397 = vmatpush3.bf16.msra.mxu0 %v22390_v1 }
 0x3f1   : > { %v14029_v52 = vpop.f32.mrb[39].mxu1  ;;  %16399 = vmatprep.subr.bf16.mxu0 %v22391_v17 }
 0x3f2   : > { %v21304_v31 = vadd.f32 %v14029_v52, %v14028_v47  ;;  %16495 = vmatpush3.bf16.msra.mxu1 %v21297_v0 }
 0x3f3   : > { %16502 = vmatprep.subr.bf16.mxu1 %v17152_v20 }
 0x3f4   : > { %v14031_v37 = vpop.f32.mrb[40].mxu1  ;;  %16401 = vmatpush3.bf16.msra.mxu0 %v22392_v49 }
 0x3f5   : > { %v14032_v3 = vpop.f32.mrb[41].mxu1  ;;  %16403 = vmatprep.subr.bf16.mxu0 %v22393_v48  ;;  %14829 = vmatmul.mubr.f32.vlgmr.msra.gmra.mrb[70].mxu1 %v21215_v41 }
 0x3f6   : > { %v21317_v46 = vadd.f32 %v14032_v3, %v14031_v37  ;;  %v13914_v33 = vpop.f32.mrb[34].mxu0  ;;  %16504 = vmatpush3.bf16.msra.mxu1 %v21311_v56  ;;  %14850 = vmatprep.mubr.msk.f32.mxu1 %vm17153_vm4, %v22381_v14 }
 0x3f7   : > { %v13915_v11 = vpop.f32.mrb[35].mxu0  ;;  %16505 = vmatprep.subr.bf16.mxu1 %v17152_v20 }
 0x3f8   : > { %v13916_v15 = vadd.f32 %v13915_v11, %v13914_v33  ;;  %16405 = vmatpush3.bf16.msra.mxu0 %v22394_v45 }
 0x3f9   : > { %16407 = vmatprep.subr.bf16.mxu0 %v22395_v8 }
 0x3fa   : > { %v7101_v18 = vadd.f32 %v13916_v15, %v21241_v22  ;;  %v13917_v6 = vpop.f32.mrb[36].mxu0  ;;  %16507 = vmatpush3.bf16.msra.mxu1 %v21324_v9  ;;  %v22398_v22 = vld [vmem:[#allocation29_spill] sm:$0xff] }
 0x3fb   : > { %v13918_v23 = vpop.f32.mrb[37].mxu0  ;;  %16514 = vmatprep.subr.bf16.mxu1 %v17152_v20 }
 0x3fc   : > { %v13919_v27 = vadd.f32 %v13918_v23, %v13917_v6  ;;  %16409 = vmatpush3.bf16.msra.mxu0 %v22396_v51  ;;  %v7246_v63 = vadd.f32 %v21205_v28, %v7101_v18  ;;  %v22399_v28 = vand.u32 4294901760, %v22367_v24 }
 0x3fd   : > { %16411 = vmatprep.subr.bf16.mxu0 %v22397_v57  ;;  %14851 = vmatmul.mubr.f32.vlgmr.msra.gmra.mrb[72].mxu1 %v21200_v40 }
 0x3fe   : > { %v7108_v42 = vadd.f32 %v13919_v27, %v21260_v7  ;;  %16516 = vmatpush3.bf16.msra.mxu1 %v21227_v44  ;;  %14872 = vmatprep.mubr.msk.f32.mxu1 %vm17153_vm4, %v22381_v14 }
 0x3ff   : > { %16517 = vmatprep.subr.bf16.mxu1 %v17152_v20 }
 0x400   : > { %16413 = vmatpush3.bf16.msra.mxu0 %v22398_v22  ;;  %v7255_v21 = vadd.f32 %v21218_v34, %v7108_v42 }
 0x401   : > { %16447 = vmatprep.subr.bf16.mxu0 %v22380_v12 }
 0x402   : > { %16519 = vmatpush3.bf16.msra.mxu1 %v21244_v55 }
 0x403   : > { %9197 = vmatmul.mubr.f32.vlgmr.msra.gmra.mrb[62].mxu0 %v22399_v28  ;;  %16520 = vmatprep.subr.bf16.mxu1 %v17152_v20 }
 0x404   : > { %9204 = vmatprep.mubr.f32.mxu0 %v22400_v59  ;;  %16449 = vmatpush3.bf16.msra.mxu0 %v22382_v60 }
 0x405   : > { %16451 = vmatprep.subr.bf16.mxu0 %v22383_v38 }
 0x407   : > { %9208 = vmatmul.mubr.f32.gmra.mrb[64].mxu0 %v22401_v29 }
 0x408   : > { %16453 = vmatpush3.bf16.msra.mxu0 %v22384_v2  ;;  %9485 = vmatprep.mubr.f32.mxu0 %v22370_v61 }
 0x409   : > { %16455 = vmatprep.subr.bf16.mxu0 %v22387_v58 }
 0x40c   : > { %16457 = vmatpush3.bf16.msra.mxu0 %v22388_v4 }
 0x40d   : > { %16459 = vmatprep.subr.bf16.mxu0 %v22389_v43 }
 0x410   : > { %v14104_v24 = vpop.f32.mrb[42].mxu1  ;;  %16461 = vmatpush3.bf16.msra.mxu0 %v22390_v1 }
 0x411   : > { %v14105_v53 = vpop.f32.mrb[43].mxu1  ;;  %16463 = vmatprep.subr.bf16.mxu0 %v22391_v17 }
 0x412   : > { %v14106_v34 = vadd.f32 %v14105_v53, %v14104_v24 }
 0x414   : > { %v14107_v25 = vpop.f32.mrb[44].mxu1  ;;  %16465 = vmatpush3.bf16.msra.mxu0 %v22392_v49 }
 0x415   : > { %v14108_v32 = vpop.f32.mrb[45].mxu1  ;;  %16467 = vmatprep.subr.bf16.mxu0 %v22393_v48 }
 0x416   : > { %v14109_v61 = vadd.f32 %v14108_v32, %v14107_v25  ;;  %v13990_v26 = vpop.f32.mrb[38].mxu0 }
 0x417   : > { %v13991_v7 = vpop.f32.mrb[39].mxu0 }
 0x418   : > { %v13992_v12 = vadd.f32 %v13991_v7, %v13990_v26  ;;  %16469 = vmatpush3.bf16.msra.mxu0 %v22394_v45 }
 0x419   : > { %16471 = vmatprep.subr.bf16.mxu0 %v22395_v8 }
 0x41a   : > { %v7363_v16 = vadd.f32 %v13992_v12, %v7246_v63  ;;  %v13993_v30 = vpop.f32.mrb[40].mxu0 }
 0x41b   : > { %v13994_v62 = vpop.f32.mrb[41].mxu0 }
 0x41c   : > { %v13995_v60 = vadd.f32 %v13994_v62, %v13993_v30  ;;  %16473 = vmatpush3.bf16.msra.mxu0 %v22396_v51  ;;  %v7542_v38 = vadd.f32 %v21304_v31, %v7363_v16 }
 0x41d   : > { %16475 = vmatprep.subr.bf16.mxu0 %v22397_v57 }
 0x41e   : > { %v7374_v2 = vadd.f32 %v13995_v60, %v7255_v21 }
 0x420   : > { %16477 = vmatpush3.bf16.msra.mxu0 %v22398_v22  ;;  %v7549_v13 = vadd.f32 %v21317_v46, %v7374_v2 }
 0x421   : > { %16496 = vmatprep.subr.bf16.mxu0 %v17152_v20 }
 0x423   : > { %9487 = vmatmul.mubr.f32.vlgmr.msra.gmra.mrb[66].mxu0 %v22376_v39 }
 0x424   : > { %9492 = vmatprep.mubr.f32.mxu0 %v22377_v36  ;;  %16498 = vmatpush3.bf16.msra.mxu0 %v21227_v44 }
 0x425   : > { %16499 = vmatprep.subr.bf16.mxu0 %v17152_v20 }
 0x427   : > { %9494 = vmatmul.mubr.f32.gmra.mrb[68].mxu0 %v22379_v5 }
 0x428   : > { %16501 = vmatpush3.bf16.msra.mxu0 %v21244_v55  ;;  %14839 = vmatprep.mubr.msk.f32.mxu0 %vm17153_vm4, %v22381_v14 }
 0x429   : > { %16508 = vmatprep.subr.bf16.mxu0 %v17152_v20 }
 0x42b   : > { %14840 = vmatmul.mubr.f32.vlgmr.msra.gmra.mrb[70].mxu0 %v9585_v35 }
 0x42c   : > { %16510 = vmatpush3.bf16.msra.mxu0 %v21227_v44  ;;  %14861 = vmatprep.mubr.msk.f32.mxu0 %vm17153_vm4, %v22381_v14 }
 0x42d   : > { %16511 = vmatprep.subr.bf16.mxu0 %v17152_v20 }
 0x430   : > { %v14180_v39 = vpop.f32.mrb[46].mxu1  ;;  %16513 = vmatpush3.bf16.msra.mxu0 %v21244_v55 }
 0x431   : > { %v14181_v36 = vpop.f32.mrb[47].mxu1  ;;  %16550 = vmatprep.subr.bf16.mxu0 %v17152_v20 }
 0x432   : > { %v14182_v5 = vadd.f32 %v14181_v36, %v14180_v39 }
 0x433   : > { %14862 = vmatmul.mubr.f32.vlgmr.msra.gmra.mrb[72].mxu0 %v21200_v40 }
 0x434   : > { %v14183_v10 = vpop.f32.mrb[48].mxu1  ;;  %16552 = vmatpush3.bf16.msra.mxu0 %v21227_v44  ;;  %14938 = vmatprep.mubr.msk.f32.mxu0 %vm17153_vm4, %v22381_v14 }
 0x435   : > { %v14184_v41 = vpop.f32.mrb[49].mxu1  ;;  %16553 = vmatprep.subr.bf16.mxu0 %v17152_v20 }
 0x436   : > { %v14185_v35 = vadd.f32 %v14184_v41, %v14183_v10  ;;  %v14066_v58 = vpop.f32.mrb[42].mxu0 }
 0x437   : > { %v14067_v4 = vpop.f32.mrb[43].mxu0 }
 0x438   : > { %v14068_v43 = vadd.f32 %v14067_v4, %v14066_v58  ;;  %16555 = vmatpush3.bf16.msra.mxu0 %v21244_v55 }
 0x439   : > { %16556 = vmatprep.subr.bf16.mxu0 %v17152_v20 }
 0x43a   : > { %v7653_v47 = vadd.f32 %v14068_v43, %v7542_v38  ;;  %v14069_v1 = vpop.f32.mrb[44].mxu0 }
 0x43b   : > { %v14070_v40 = vpop.f32.mrb[45].mxu0 }
 0x43c   : > { %v14071_v52 = vadd.f32 %v14070_v40, %v14069_v1  ;;  %v7772_v17 = vadd.f32 %v14106_v34, %v7653_v47 }
 0x43e   : > { %v7660_v31 = vadd.f32 %v14071_v52, %v7549_v13 }
 0x440   : > { %v7787_v37 = vadd.f32 %v14109_v61, %v7660_v31 }
 0x450   : > { %v14256_v49 = vpop.f32.mrb[50].mxu1 }
 0x451   : > { %v14257_v3 = vpop.f32.mrb[51].mxu1 }
 0x452   : > { %v14258_v48 = vadd.f32 %v14257_v3, %v14256_v49 }
 0x454   : > { %v14259_v46 = vpop.f32.mrb[52].mxu1 }
 0x455   : > { %v14260_v33 = vpop.f32.mrb[53].mxu1 }
 0x456   : > { %v14261_v11 = vadd.f32 %v14260_v33, %v14259_v46  ;;  %v14142_v15 = vpop.f32.mrb[46].mxu0 }
 0x457   : > { %v14143_v45 = vpop.f32.mrb[47].mxu0 }
 0x458   : > { %v14144_v8 = vadd.f32 %v14143_v45, %v14142_v15  ;;  %v21400_v45 = vld [vmem:[%s21770_s4] ss:$0 sm:$0xff] }
 0x45a   : > { %v8019_v18 = vadd.f32 %v14144_v8, %v7772_v17  ;;  %v14145_v6 = vpop.f32.mrb[48].mxu0 }
 0x45b   : > { %v14146_v23 = vpop.f32.mrb[49].mxu0 }
 0x45c   : > { %v14147_v27 = vadd.f32 %v14146_v23, %v14145_v6  ;;  %v8164_v51 = vadd.f32 %v14182_v5, %v8019_v18 }
 0x45e   : > { %v8026_v63 = vadd.f32 %v14147_v27, %v7787_v37 }
 0x460   : > { %v8173_v57 = vadd.f32 %v14185_v35, %v8026_v63 }
 0x470   : > { %v14332_v42 = vpop.f32.mrb[54].mxu1 }
 0x471   : > { %v14333_v22 = vpop.f32.mrb[55].mxu1 }
 0x472   : > { %v14334_v21 = vadd.f32 %v14333_v22, %v14332_v42 }
 0x474   : > { %v14335_v28 = vpop.f32.mrb[56].mxu1 }
 0x475   : > { %v14336_v59 = vpop.f32.mrb[57].mxu1 }
 0x476   : > { %v14337_v29 = vadd.f32 %v14336_v59, %v14335_v28  ;;  %v14218_v24 = vpop.f32.mrb[50].mxu0 }
 0x477   : > { %v14219_v53 = vpop.f32.mrb[51].mxu0 }
 0x478   : > { %v14220_v34 = vadd.f32 %v14219_v53, %v14218_v24 }
 0x47a   : > { %v8281_v25 = vadd.f32 %v14220_v34, %v8164_v51  ;;  %v14221_v32 = vpop.f32.mrb[52].mxu0 }
 0x47b   : > { %v14222_v61 = vpop.f32.mrb[53].mxu0 }
 0x47c   : > { %v14223_v26 = vadd.f32 %v14222_v61, %v14221_v32  ;;  %v8460_v7 = vadd.f32 %v14258_v48, %v8281_v25 }
 0x47e   : > { %v8292_v12 = vadd.f32 %v14223_v26, %v8173_v57 }
 0x480   : > { %v8467_v16 = vadd.f32 %v14261_v11, %v8292_v12 }
 0x490   : > { %v14408_v30 = vpop.f32.mrb[58].mxu1 }
 0x491   : > { %v14409_v62 = vpop.f32.mrb[59].mxu1 }
 0x492   : > { %v14410_v60 = vadd.f32 %v14409_v62, %v14408_v30 }
 0x494   : > { %v14411_v38 = vpop.f32.mrb[60].mxu1 }
 0x495   : > { %v14412_v2 = vpop.f32.mrb[61].mxu1 }
 0x496   : > { %v14413_v13 = vadd.f32 %v14412_v2, %v14411_v38  ;;  %v14294_v39 = vpop.f32.mrb[54].mxu0 }
 0x497   : > { %v14295_v36 = vpop.f32.mrb[55].mxu0 }
 0x498   : > { %v14296_v5 = vadd.f32 %v14295_v36, %v14294_v39 }
 0x49a   : > { %v8571_v10 = vadd.f32 %v14296_v5, %v8460_v7  ;;  %v14297_v41 = vpop.f32.mrb[56].mxu0 }
 0x49b   : > { %v14298_v35 = vpop.f32.mrb[57].mxu0 }
 0x49c   : > { %v14299_v58 = vadd.f32 %v14298_v35, %v14297_v41  ;;  %v8690_v4 = vadd.f32 %v14334_v21, %v8571_v10 }
 0x49e   : > { %v8578_v43 = vadd.f32 %v14299_v58, %v8467_v16 }
 0x4a0   : > { %v8705_v47 = vadd.f32 %v14337_v29, %v8578_v43 }
 0x4b0   : > { %v14484_v1 = vpop.f32.mrb[62].mxu1 }
 0x4b1   : > { %v14485_v40 = vpop.f32.mrb[63].mxu1 }
 0x4b2   : > { %v14486_v52 = vadd.f32 %v14485_v40, %v14484_v1 }
 0x4b4   : > { %v14487_v17 = vpop.f32.mrb[64].mxu1 }
 0x4b5   : > { %v14488_v31 = vpop.f32.mrb[65].mxu1 }
 0x4b6   : > { %v14489_v37 = vadd.f32 %v14488_v31, %v14487_v17  ;;  %v14370_v49 = vpop.f32.mrb[58].mxu0 }
 0x4b7   : > { %v14371_v3 = vpop.f32.mrb[59].mxu0 }
 0x4b8   : > { %v14372_v48 = vadd.f32 %v14371_v3, %v14370_v49  ;;  %v9589_v46 = vpop.f32.mrb[66].mxu1 }
 0x4b9   : > { %v14808_v33 = vpop.f32.mrb[67].mxu1  ;;  %v9590_v23 = vadd.f32 %v21400_v45, %v9589_v46 }
 0x4ba   : > { %v8937_v11 = vadd.f32 %v14372_v48, %v8690_v4  ;;  %v14373_v15 = vpop.f32.mrb[60].mxu0 }
 0x4bb   : > { %v14374_v8 = vpop.f32.mrb[61].mxu0 }
 0x4bc   : > { %v14375_v18 = vadd.f32 %v14374_v8, %v14373_v15  ;;  %v9082_v6 = vadd.f32 %v14410_v60, %v8937_v11 }
 0x4be   : > { %v8944_v27 = vadd.f32 %v14375_v18, %v8705_v47 }
 0x4c0   : > { %v9091_v51 = vadd.f32 %v14413_v13, %v8944_v27  ;;  %v9680_v63 = vpop.f32.mrb[68].mxu1 }
 0x4c1   : > { %v9681_v57 = vadd.f32 %v9680_v63, %v9590_v23  ;;  %v14819_v42 = vpop.f32.mrb[69].mxu1 }
 0x4c8   : > { %v9760_v22 = vpop.f32.mrb[70].mxu1 }
 0x4c9   : > { %v9761_v21 = vadd.f32 %v9760_v22, %v9681_v57  ;;  %v14830_v28 = vpop.f32.mrb[71].mxu1 }
 0x4d0   : > { %v9920_v59 = vpop.f32.mrb[72].mxu1 }
 0x4d1   : > { %v14852_v29 = vpop.f32.mrb[73].mxu1 }
 0x4d6   : > { %v14446_v24 = vpop.f32.mrb[62].mxu0 }
 0x4d7   : > { %v14447_v53 = vpop.f32.mrb[63].mxu0 }
 0x4d8   : > { %v14448_v34 = vadd.f32 %v14447_v53, %v14446_v24 }
 0x4da   : > { %v9199_v25 = vadd.f32 %v14448_v34, %v9082_v6  ;;  %v14449_v32 = vpop.f32.mrb[64].mxu0 }
 0x4db   : > { %v14450_v61 = vpop.f32.mrb[65].mxu0 }
 0x4dc   : > { %v14451_v26 = vadd.f32 %v14450_v61, %v14449_v32  ;;  %v9378_v7 = vadd.f32 %v14486_v52, %v9199_v25 }
 0x4de   : > { %v9210_v12 = vadd.f32 %v14451_v26, %v9091_v51 }
 0x4e0   : > { %v9385_v16 = vadd.f32 %v14489_v37, %v9210_v12 }
 0x4f6   : > { %v14522_v30 = vpop.f32.mrb[66].mxu0 }
 0x4f7   : > { %v14523_v62 = vpop.f32.mrb[67].mxu0 }
 0x4f8   : > { %v14524_v60 = vadd.f32 %v14523_v62, %v14522_v30 }
 0x4fa   : > { %v21403_v38 = vadd.f32 %v14524_v60, %v9378_v7  ;;  %v14525_v2 = vpop.f32.mrb[68].mxu0 }
 0x4fb   : > { %v14526_v13 = vpop.f32.mrb[69].mxu0 }
 0x4fc   : > { %v14527_v39 = vadd.f32 %v14526_v13, %v14525_v2 }
 0x4fe   : > { %v21405_v36 = vadd.f32 %v14527_v39, %v9385_v16  ;;  %v9837_v5 = vpop.f32.mrb[70].mxu0 }
 0x4ff   : > { %v9838_v10 = vadd.f32 %v9837_v5, %v9761_v21  ;;  %v14841_v41 = vpop.f32.mrb[71].mxu0 }
 0x501   : > { %v9921_v35 = vadd.f32 %v9920_v59, %v9838_v10 }
 0x506   : > { %v9995_v58 = vpop.f32.mrb[72].mxu0 }
 0x507   : > { %v9996_v4 = vadd.f32 %v9995_v58, %v9921_v35  ;;  %v14863_v43 = vpop.f32.mrb[73].mxu0 }
 0x509   : > { %v9999_v47 = vadd.f32 %v9996_v4, %v21403_v38 }
 0x50b   : > { %v10000_v1 = vmax.f32 %v9999_v47, 0.0 }
 0x50d   : > { %10002 = vst.msk [vmem:[%s17270_s11] sm:$0x3] %vm10001_vm5, %v10000_v1  ;;  %v10004_v40 = vsel %vm1036_vm3, %v10000_v1, 0 }
 0x50e   : > { %v10075_v52 = vand.u32 4294901760, %v10004_v40 }
 0x510   : > { %v10076_v17 = vsub.f32 %v10004_v40, %v10075_v52 }
 0x512   : > { %v10077_v31 = vand.u32 4294901760, %v10076_v17 }
 0x514   : > { %v10078_v37 = vsub.f32 %v10076_v17, %v10077_v31 }
 0x516   : > { %v10079_v49 = vand.u32 4294901760, %v10078_v37 }
 0x518   : > { %14873 = vmatmul.mubr.f32.vlgmr.msra.gmra.mrb[74].mxu1 %v10079_v49 }
 0x519   : > { %16522 = vmatpush3.bf16.msra.mxu1 %v21267_v50  ;;  %14883 = vmatprep.mubr.msk.f32.mxu1 %vm17153_vm4, %v22381_v14 }
 0x51a   : > { %16523 = vmatprep.subr.bf16.mxu1 %v17152_v20 }
 0x51d   : > { %16525 = vmatpush3.bf16.msra.mxu1 %v21275_v19 }
 0x51e   : > { %16526 = vmatprep.subr.bf16.mxu1 %v17152_v20 }
 0x520   : > { %14884 = vmatmul.mubr.f32.vlgmr.msra.gmra.mrb[74].mxu1 %v10075_v52 }
 0x521   : > { %16528 = vmatpush3.bf16.msra.mxu1 %v21288_v54  ;;  %14894 = vmatprep.mubr.msk.f32.mxu1 %vm17153_vm4, %v22381_v14 }
 0x522   : > { %16529 = vmatprep.subr.bf16.mxu1 %v17152_v20 }
 0x525   : > { %16531 = vmatpush3.bf16.msra.mxu1 %v21297_v0 }
 0x526   : > { %16532 = vmatprep.subr.bf16.mxu1 %v17152_v20 }
 0x528   : > { %14895 = vmatmul.mubr.f32.vlgmr.msra.gmra.mrb[74].mxu1 %v10076_v17 }
 0x529   : > { %16534 = vmatpush3.bf16.msra.mxu1 %v21227_v44  ;;  %14905 = vmatprep.mubr.msk.f32.mxu1 %vm17153_vm4, %v22381_v14 }
 0x52a   : > { %16535 = vmatprep.subr.bf16.mxu1 %v17152_v20 }
 0x52d   : > { %16537 = vmatpush3.bf16.msra.mxu1 %v21244_v55 }
 0x52e   : > { %16538 = vmatprep.subr.bf16.mxu1 %v17152_v20 }
 0x530   : > { %14906 = vmatmul.mubr.f32.vlgmr.msra.gmra.mrb[74].mxu1 %v10077_v31 }
 0x531   : > { %16540 = vmatpush3.bf16.msra.mxu1 %v21311_v56  ;;  %14916 = vmatprep.mubr.msk.f32.mxu1 %vm17153_vm4, %v22381_v14 }
 0x532   : > { %16541 = vmatprep.subr.bf16.mxu1 %v17152_v20 }
 0x535   : > { %16543 = vmatpush3.bf16.msra.mxu1 %v21324_v9 }
 0x536   : > { %16544 = vmatprep.subr.bf16.mxu1 %v17152_v20 }
 0x538   : > { %14917 = vmatmul.mubr.f32.vlgmr.msra.gmra.mrb[74].mxu1 %v10075_v52 }
 0x539   : > { %16546 = vmatpush3.bf16.msra.mxu1 %v21227_v44  ;;  %14927 = vmatprep.mubr.msk.f32.mxu1 %vm17153_vm4, %v22381_v14 }
 0x53a   : > { %16547 = vmatprep.subr.bf16.mxu1 %v17152_v20 }
 0x53d   : > { %16549 = vmatpush3.bf16.msra.mxu1 %v21244_v55 }
 0x53e   : > { %16586 = vmatprep.subr.bf16.mxu1 %v17152_v20 }
 0x540   : > { %14928 = vmatmul.mubr.f32.vlgmr.msra.gmra.mrb[74].mxu1 %v10075_v52 }
 0x541   : > { %16588 = vmatpush3.bf16.msra.mxu1 %v21227_v44  ;;  %15004 = vmatprep.mubr.msk.f32.mxu1 %vm17153_vm4, %v22381_v14 }
 0x542   : > { %16589 = vmatprep.subr.bf16.mxu1 %v17152_v20 }
 0x545   : > { %16591 = vmatpush3.bf16.msra.mxu1 %v21244_v55 }
 0x546   : > { %16592 = vmatprep.subr.bf16.mxu1 %v17152_v20 }
 0x613   : > { %v10487_v3 = vpop.f32.mrb[74].mxu1 }
 0x614   : > { %v16774_v48 = vadd.f32 %v21400_v45, %v10487_v3  ;;  %v14929_v46 = vpop.f32.mrb[75].mxu1 }
 0x616   : > { %v10492_v33 = vrot.slane %v16774_v48, 6 }
 0x618   : > { %v10494_v11 = vadd.f32 %v10492_v33, %v21403_v38 }
 0x61a   : > { %v10495_v15 = vmax.f32 %v10494_v11, 0.0 }
 0x61c   : > { %13583 = vst.msk [vmem:[%s17270_s11] sm:$0xc] %vm10497_vm6, %v10495_v15  ;;  %v10500_v8 = vrot.slane %v10495_v15, 2 }
 0x61e   : > { %v10501_v18 = vsel %vm1036_vm3, %v10500_v8, 0 }
 0x61f   : > { %v10572_v6 = vand.u32 4294901760, %v10501_v18 }
 0x621   : > { %v10573_v23 = vsub.f32 %v10501_v18, %v10572_v6 }
 0x623   : > { %v10574_v27 = vand.u32 4294901760, %v10573_v23 }
 0x625   : > { %v10575_v51 = vsub.f32 %v10573_v23, %v10574_v27 }
 0x627   : > { %v10576_v63 = vand.u32 4294901760, %v10575_v51 }
 0x629   : > { %14939 = vmatmul.mubr.f32.vlgmr.msra.gmra.mrb[74].mxu0 %v10576_v63 }
 0x62a   : > { %16558 = vmatpush3.bf16.msra.mxu0 %v21267_v50  ;;  %14949 = vmatprep.mubr.msk.f32.mxu0 %vm17153_vm4, %v22381_v14 }
 0x62b   : > { %16559 = vmatprep.subr.bf16.mxu0 %v17152_v20 }
 0x62e   : > { %16561 = vmatpush3.bf16.msra.mxu0 %v21275_v19 }
 0x62f   : > { %16562 = vmatprep.subr.bf16.mxu0 %v17152_v20 }
 0x631   : > { %14950 = vmatmul.mubr.f32.vlgmr.msra.gmra.mrb[74].mxu0 %v10572_v6 }
 0x632   : > { %16564 = vmatpush3.bf16.msra.mxu0 %v21288_v54  ;;  %14960 = vmatprep.mubr.msk.f32.mxu0 %vm17153_vm4, %v22381_v14 }
 0x633   : > { %16565 = vmatprep.subr.bf16.mxu0 %v17152_v20 }
 0x636   : > { %16567 = vmatpush3.bf16.msra.mxu0 %v21297_v0 }
 0x637   : > { %16568 = vmatprep.subr.bf16.mxu0 %v17152_v20 }
 0x639   : > { %14961 = vmatmul.mubr.f32.vlgmr.msra.gmra.mrb[74].mxu0 %v10573_v23 }
 0x63a   : > { %16570 = vmatpush3.bf16.msra.mxu0 %v21227_v44  ;;  %14971 = vmatprep.mubr.msk.f32.mxu0 %vm17153_vm4, %v22381_v14 }
 0x63b   : > { %16571 = vmatprep.subr.bf16.mxu0 %v17152_v20 }
 0x63e   : > { %16573 = vmatpush3.bf16.msra.mxu0 %v21244_v55 }
 0x63f   : > { %16574 = vmatprep.subr.bf16.mxu0 %v17152_v20 }
 0x641   : > { %14972 = vmatmul.mubr.f32.vlgmr.msra.gmra.mrb[74].mxu0 %v10574_v27 }
 0x642   : > { %16576 = vmatpush3.bf16.msra.mxu0 %v21311_v56  ;;  %14982 = vmatprep.mubr.msk.f32.mxu0 %vm17153_vm4, %v22381_v14 }
 0x643   : > { %16577 = vmatprep.subr.bf16.mxu0 %v17152_v20 }
 0x646   : > { %16579 = vmatpush3.bf16.msra.mxu0 %v21324_v9 }
 0x647   : > { %16580 = vmatprep.subr.bf16.mxu0 %v17152_v20 }
 0x649   : > { %14983 = vmatmul.mubr.f32.vlgmr.msra.gmra.mrb[74].mxu0 %v10572_v6 }
 0x64a   : > { %16582 = vmatpush3.bf16.msra.mxu0 %v21227_v44  ;;  %14993 = vmatprep.mubr.msk.f32.mxu0 %vm17153_vm4, %v22381_v14 }
 0x64b   : > { %16583 = vmatprep.subr.bf16.mxu0 %v17152_v20 }
 0x64e   : > { %16585 = vmatpush3.bf16.msra.mxu0 %v21244_v55 }
 0x64f   : > { %16622 = vmatprep.subr.bf16.mxu0 %v17152_v20 }
 0x651   : > { %14994 = vmatmul.mubr.f32.vlgmr.msra.gmra.mrb[74].mxu0 %v10572_v6 }
 0x652   : > { %16624 = vmatpush3.bf16.msra.mxu0 %v21227_v44  ;;  %15070 = vmatprep.mubr.msk.f32.mxu0 %vm17153_vm4, %v22381_v14 }
 0x653   : > { %16625 = vmatprep.subr.bf16.mxu0 %v17152_v20 }
 0x656   : > { %16627 = vmatpush3.bf16.msra.mxu0 %v21244_v55 }
 0x657   : > { %16628 = vmatprep.subr.bf16.mxu0 %v17152_v20 }
 0x724   : > { %v10984_v57 = vpop.f32.mrb[74].mxu0 }
 0x725   : > { %v16775_v42 = vadd.f32 %v21400_v45, %v10984_v57  ;;  %v14995_v22 = vpop.f32.mrb[75].mxu0 }
 0x727   : > { %v10989_v21 = vrot.slane %v16775_v42, 4 }
 0x729   : > { %v10991_v28 = vadd.f32 %v10989_v21, %v21403_v38 }
 0x72b   : > { %v10992_v59 = vmax.f32 %v10991_v28, 0.0 }
 0x72d   : > { %13584 = vst.msk [vmem:[%s17270_s11] sm:$0x30] %vm10994_vm7, %v10992_v59  ;;  %v10997_v29 = vrot.slane %v10992_v59, 4 }
 0x72f   : > { %v10998_v24 = vsel %vm1036_vm3, %v10997_v29, 0 }
 0x730   : > { %v11069_v53 = vand.u32 4294901760, %v10998_v24 }
 0x732   : > { %v11070_v34 = vsub.f32 %v10998_v24, %v11069_v53 }
 0x734   : > { %v11071_v25 = vand.u32 4294901760, %v11070_v34 }
 0x736   : > { %v11072_v32 = vsub.f32 %v11070_v34, %v11071_v25 }
 0x738   : > { %v11073_v61 = vand.u32 4294901760, %v11072_v32 }
 0x73a   : > { %15005 = vmatmul.mubr.f32.vlgmr.msra.gmra.mrb[76].mxu1 %v11073_v61 }
 0x73b   : > { %16594 = vmatpush3.bf16.msra.mxu1 %v21267_v50  ;;  %15015 = vmatprep.mubr.msk.f32.mxu1 %vm17153_vm4, %v22381_v14 }
 0x73c   : > { %16595 = vmatprep.subr.bf16.mxu1 %v17152_v20 }
 0x73f   : > { %16597 = vmatpush3.bf16.msra.mxu1 %v21275_v19 }
 0x740   : > { %16598 = vmatprep.subr.bf16.mxu1 %v17152_v20 }
 0x742   : > { %15016 = vmatmul.mubr.f32.vlgmr.msra.gmra.mrb[76].mxu1 %v11069_v53 }
 0x743   : > { %16600 = vmatpush3.bf16.msra.mxu1 %v21288_v54  ;;  %15026 = vmatprep.mubr.msk.f32.mxu1 %vm17153_vm4, %v22381_v14 }
 0x744   : > { %16601 = vmatprep.subr.bf16.mxu1 %v17152_v20 }
 0x747   : > { %16603 = vmatpush3.bf16.msra.mxu1 %v21297_v0 }
 0x748   : > { %16604 = vmatprep.subr.bf16.mxu1 %v17152_v20 }
 0x74a   : > { %15027 = vmatmul.mubr.f32.vlgmr.msra.gmra.mrb[76].mxu1 %v11070_v34 }
 0x74b   : > { %16606 = vmatpush3.bf16.msra.mxu1 %v21227_v44  ;;  %15037 = vmatprep.mubr.msk.f32.mxu1 %vm17153_vm4, %v22381_v14 }
 0x74c   : > { %16607 = vmatprep.subr.bf16.mxu1 %v17152_v20 }
 0x74f   : > { %16609 = vmatpush3.bf16.msra.mxu1 %v21244_v55 }
 0x750   : > { %16610 = vmatprep.subr.bf16.mxu1 %v17152_v20 }
 0x752   : > { %15038 = vmatmul.mubr.f32.vlgmr.msra.gmra.mrb[76].mxu1 %v11071_v25 }
 0x753   : > { %16612 = vmatpush3.bf16.msra.mxu1 %v21311_v56  ;;  %15048 = vmatprep.mubr.msk.f32.mxu1 %vm17153_vm4, %v22381_v14 }
 0x754   : > { %16613 = vmatprep.subr.bf16.mxu1 %v17152_v20 }
 0x757   : > { %16615 = vmatpush3.bf16.msra.mxu1 %v21324_v9 }
 0x758   : > { %16616 = vmatprep.subr.bf16.mxu1 %v17152_v20 }
 0x75a   : > { %15049 = vmatmul.mubr.f32.vlgmr.msra.gmra.mrb[76].mxu1 %v11069_v53 }
 0x75b   : > { %16618 = vmatpush3.bf16.msra.mxu1 %v21227_v44  ;;  %15059 = vmatprep.mubr.msk.f32.mxu1 %vm17153_vm4, %v22381_v14 }
 0x75c   : > { %16619 = vmatprep.subr.bf16.mxu1 %v17152_v20 }
 0x75f   : > { %16621 = vmatpush3.bf16.msra.mxu1 %v21244_v55 }
 0x760   : > { %16658 = vmatprep.subr.bf16.mxu1 %v17152_v20 }
 0x762   : > { %15060 = vmatmul.mubr.f32.vlgmr.msra.gmra.mrb[76].mxu1 %v11069_v53 }
 0x763   : > { %16660 = vmatpush3.bf16.msra.mxu1 %v21227_v44  ;;  %15136 = vmatprep.mubr.msk.f32.mxu1 %vm17153_vm4, %v22381_v14 }
 0x764   : > { %16661 = vmatprep.subr.bf16.mxu1 %v17152_v20 }
 0x767   : > { %16663 = vmatpush3.bf16.msra.mxu1 %v21244_v55 }
 0x768   : > { %16664 = vmatprep.subr.bf16.mxu1 %v17152_v20 }
 0x835   : > { %v11481_v26 = vpop.f32.mrb[76].mxu1 }
 0x836   : > { %v16776_v7 = vadd.f32 %v21400_v45, %v11481_v26  ;;  %v15061_v12 = vpop.f32.mrb[77].mxu1 }
 0x838   : > { %v11486_v16 = vrot.slane %v16776_v7, 2 }
 0x83a   : > { %v11488_v30 = vadd.f32 %v11486_v16, %v21403_v38 }
 0x83c   : > { %v11489_v62 = vmax.f32 %v11488_v30, 0.0 }
 0x83e   : > { %13585 = vst.msk [vmem:[%s17270_s11] sm:$0xc0] %vm11491_vm8, %v11489_v62  ;;  %v11494_v60 = vrot.slane %v11489_v62, 6 }
 0x840   : > { %v11495_v2 = vsel %vm1036_vm3, %v11494_v60, 0 }
 0x841   : > { %v11566_v13 = vand.u32 4294901760, %v11495_v2 }
 0x843   : > { %v11567_v39 = vsub.f32 %v11495_v2, %v11566_v13 }
 0x845   : > { %v11568_v5 = vand.u32 4294901760, %v11567_v39 }
 0x847   : > { %v11569_v10 = vsub.f32 %v11567_v39, %v11568_v5 }
 0x849   : > { %v11570_v41 = vand.u32 4294901760, %v11569_v10 }
 0x84b   : > { %15071 = vmatmul.mubr.f32.vlgmr.msra.gmra.mrb[76].mxu0 %v11570_v41 }
 0x84c   : > { %16630 = vmatpush3.bf16.msra.mxu0 %v21267_v50  ;;  %15081 = vmatprep.mubr.msk.f32.mxu0 %vm17153_vm4, %v22381_v14 }
 0x84d   : > { %16631 = vmatprep.subr.bf16.mxu0 %v17152_v20 }
 0x850   : > { %16633 = vmatpush3.bf16.msra.mxu0 %v21275_v19 }
 0x851   : > { %16634 = vmatprep.subr.bf16.mxu0 %v17152_v20 }
 0x853   : > { %15082 = vmatmul.mubr.f32.vlgmr.msra.gmra.mrb[78].mxu0 %v11566_v13 }
 0x854   : > { %16636 = vmatpush3.bf16.msra.mxu0 %v21288_v54  ;;  %15092 = vmatprep.mubr.msk.f32.mxu0 %vm17153_vm4, %v22381_v14 }
 0x855   : > { %16637 = vmatprep.subr.bf16.mxu0 %v17152_v20 }
 0x858   : > { %16639 = vmatpush3.bf16.msra.mxu0 %v21297_v0 }
 0x859   : > { %16640 = vmatprep.subr.bf16.mxu0 %v17152_v20 }
 0x85b   : > { %15093 = vmatmul.mubr.f32.vlgmr.msra.gmra.mrb[80].mxu0 %v11567_v39 }
 0x85c   : > { %16642 = vmatpush3.bf16.msra.mxu0 %v21227_v44  ;;  %15103 = vmatprep.mubr.msk.f32.mxu0 %vm17153_vm4, %v22381_v14 }
 0x85d   : > { %16643 = vmatprep.subr.bf16.mxu0 %v17152_v20 }
 0x860   : > { %16645 = vmatpush3.bf16.msra.mxu0 %v21244_v55 }
 0x861   : > { %16646 = vmatprep.subr.bf16.mxu0 %v17152_v20 }
 0x863   : > { %15104 = vmatmul.mubr.f32.vlgmr.msra.gmra.mrb[82].mxu0 %v11568_v5 }
 0x864   : > { %16648 = vmatpush3.bf16.msra.mxu0 %v21311_v56  ;;  %15114 = vmatprep.mubr.msk.f32.mxu0 %vm17153_vm4, %v22381_v14 }
 0x865   : > { %16649 = vmatprep.subr.bf16.mxu0 %v17152_v20 }
 0x868   : > { %16651 = vmatpush3.bf16.msra.mxu0 %v21324_v9 }
 0x869   : > { %16652 = vmatprep.subr.bf16.mxu0 %v17152_v20 }
 0x86b   : > { %15115 = vmatmul.mubr.f32.vlgmr.msra.gmra.mrb[84].mxu0 %v11566_v13 }
 0x86c   : > { %16654 = vmatpush3.bf16.msra.mxu0 %v21227_v44  ;;  %15125 = vmatprep.mubr.msk.f32.mxu0 %vm17153_vm4, %v22381_v14 }
 0x86d   : > { %16655 = vmatprep.subr.bf16.mxu0 %v17152_v20 }
 0x870   : > { %16657 = vmatpush3.bf16.msra.mxu0 %v21244_v55 }
 0x871   : > { %16694 = vmatprep.subr.bf16.mxu0 %v17152_v20 }
 0x873   : > { %15126 = vmatmul.mubr.f32.vlgmr.msra.gmra.mrb[86].mxu0 %v11566_v13 }
 0x874   : > { %16696 = vmatpush3.bf16.msra.mxu0 %v21227_v44  ;;  %15202 = vmatprep.mubr.msk.f32.mxu0 %vm17153_vm4, %v22381_v14 }
 0x875   : > { %16697 = vmatprep.subr.bf16.mxu0 %v17152_v20 }
 0x878   : > { %16699 = vmatpush3.bf16.msra.mxu0 %v21244_v55 }
 0x879   : > { %16700 = vmatprep.subr.bf16.mxu0 %v17152_v20 }
 0x91e   : > { %v11572_v38 = vpop.f32.mrb[76].mxu0 }
 0x91f   : > { %v15072_v35 = vpop.f32.mrb[77].mxu0  ;;  %v11573_v58 = vadd.f32 %v21400_v45, %v11572_v38 }
 0x926   : > { %v11663_v4 = vpop.f32.mrb[78].mxu0 }
 0x927   : > { %v11664_v43 = vadd.f32 %v11663_v4, %v11573_v58  ;;  %v15083_v47 = vpop.f32.mrb[79].mxu0 }
 0x92e   : > { %v11743_v1 = vpop.f32.mrb[80].mxu0 }
 0x92f   : > { %v11744_v40 = vadd.f32 %v11743_v1, %v11664_v43  ;;  %v15094_v52 = vpop.f32.mrb[81].mxu0 }
 0x936   : > { %v11820_v17 = vpop.f32.mrb[82].mxu0 }
 0x937   : > { %v11821_v31 = vadd.f32 %v11820_v17, %v11744_v40  ;;  %v15105_v37 = vpop.f32.mrb[83].mxu0 }
 0x93e   : > { %v11903_v49 = vpop.f32.mrb[84].mxu0 }
 0x93f   : > { %v11904_v3 = vadd.f32 %v11903_v49, %v11821_v31  ;;  %v15116_v48 = vpop.f32.mrb[85].mxu0 }
 0x946   : > { %v11978_v46 = vpop.f32.mrb[86].mxu0 }
 0x947   : > { %v11979_v33 = vadd.f32 %v11978_v46, %v11904_v3  ;;  %v15127_v11 = vpop.f32.mrb[87].mxu0 }
 0x949   : > { %v11982_v15 = vadd.f32 %v11979_v33, %v21405_v36 }
 0x94b   : > { %v11983_v8 = vmax.f32 %v11982_v15, 0.0 }
 0x94d   : > { %13586 = vst.msk [vmem:[%s17270_s11 + $0x8] sm:$0x3] %vm10001_vm5, %v11983_v8  ;;  %v11987_v18 = vsel %vm1036_vm3, %v11983_v8, 0 }
 0x94e   : > { %v12058_v6 = vand.u32 4294901760, %v11987_v18 }
 0x950   : > { %v12059_v23 = vsub.f32 %v11987_v18, %v12058_v6 }
 0x952   : > { %v12060_v27 = vand.u32 4294901760, %v12059_v23 }
 0x954   : > { %v12061_v51 = vsub.f32 %v12059_v23, %v12060_v27 }
 0x956   : > { %v12062_v63 = vand.u32 4294901760, %v12061_v51 }
 0x958   : > { %15137 = vmatmul.mubr.f32.vlgmr.msra.gmra.mrb[78].mxu1 %v12062_v63 }
 0x959   : > { %16666 = vmatpush3.bf16.msra.mxu1 %v21267_v50  ;;  %15147 = vmatprep.mubr.msk.f32.mxu1 %vm17153_vm4, %v22381_v14 }
 0x95a   : > { %16667 = vmatprep.subr.bf16.mxu1 %v17152_v20 }
 0x95d   : > { %16669 = vmatpush3.bf16.msra.mxu1 %v21275_v19 }
 0x95e   : > { %16670 = vmatprep.subr.bf16.mxu1 %v17152_v20 }
 0x960   : > { %15148 = vmatmul.mubr.f32.vlgmr.msra.gmra.mrb[78].mxu1 %v12058_v6 }
 0x961   : > { %16672 = vmatpush3.bf16.msra.mxu1 %v21288_v54  ;;  %15158 = vmatprep.mubr.msk.f32.mxu1 %vm17153_vm4, %v22381_v14 }
 0x962   : > { %16673 = vmatprep.subr.bf16.mxu1 %v17152_v20 }
 0x965   : > { %16675 = vmatpush3.bf16.msra.mxu1 %v21297_v0 }
 0x966   : > { %16676 = vmatprep.subr.bf16.mxu1 %v17152_v20 }
 0x968   : > { %15159 = vmatmul.mubr.f32.vlgmr.msra.gmra.mrb[78].mxu1 %v12059_v23 }
 0x969   : > { %16678 = vmatpush3.bf16.msra.mxu1 %v21227_v44  ;;  %15169 = vmatprep.mubr.msk.f32.mxu1 %vm17153_vm4, %v22381_v14 }
 0x96a   : > { %16679 = vmatprep.subr.bf16.mxu1 %v17152_v20 }
 0x96d   : > { %16681 = vmatpush3.bf16.msra.mxu1 %v21244_v55 }
 0x96e   : > { %16682 = vmatprep.subr.bf16.mxu1 %v17152_v20 }
 0x970   : > { %15170 = vmatmul.mubr.f32.vlgmr.msra.gmra.mrb[78].mxu1 %v12060_v27 }
 0x971   : > { %16684 = vmatpush3.bf16.msra.mxu1 %v21311_v56  ;;  %15180 = vmatprep.mubr.msk.f32.mxu1 %vm17153_vm4, %v22381_v14 }
 0x972   : > { %16685 = vmatprep.subr.bf16.mxu1 %v17152_v20 }
 0x975   : > { %16687 = vmatpush3.bf16.msra.mxu1 %v21324_v9 }
 0x976   : > { %16688 = vmatprep.subr.bf16.mxu1 %v17152_v20 }
 0x978   : > { %15181 = vmatmul.mubr.f32.vlgmr.msra.gmra.mrb[78].mxu1 %v12058_v6 }
 0x979   : > { %16690 = vmatpush3.bf16.msra.mxu1 %v21227_v44  ;;  %15191 = vmatprep.mubr.msk.f32.mxu1 %vm17153_vm4, %v22381_v14 }
 0x97a   : > { %16691 = vmatprep.subr.bf16.mxu1 %v17152_v20 }
 0x97d   : > { %16693 = vmatpush3.bf16.msra.mxu1 %v21244_v55 }
 0x97e   : > { %16730 = vmatprep.subr.bf16.mxu1 %v17152_v20 }
 0x980   : > { %15192 = vmatmul.mubr.f32.vlgmr.msra.gmra.mrb[78].mxu1 %v12058_v6 }
 0x981   : > { %16732 = vmatpush3.bf16.msra.mxu1 %v21227_v44  ;;  %15268 = vmatprep.mubr.msk.f32.mxu1 %vm17153_vm4, %v22381_v14 }
 0x982   : > { %16733 = vmatprep.subr.bf16.mxu1 %v17152_v20 }
 0x985   : > { %16735 = vmatpush3.bf16.msra.mxu1 %v21244_v55 }
 0x986   : > { %16736 = vmatprep.subr.bf16.mxu1 %v17152_v20 }
 0xa53   : > { %v12470_v57 = vpop.f32.mrb[78].mxu1 }
 0xa54   : > { %v16777_v42 = vadd.f32 %v21400_v45, %v12470_v57  ;;  %v15193_v22 = vpop.f32.mrb[79].mxu1 }
 0xa56   : > { %v12475_v21 = vrot.slane %v16777_v42, 6 }
 0xa58   : > { %v12477_v28 = vadd.f32 %v12475_v21, %v21405_v36 }
 0xa5a   : > { %v12478_v59 = vmax.f32 %v12477_v28, 0.0 }
 0xa5c   : > { %13587 = vst.msk [vmem:[%s17270_s11 + $0x8] sm:$0xc] %vm10497_vm6, %v12478_v59  ;;  %v12482_v29 = vrot.slane %v12478_v59, 2 }
 0xa5e   : > { %v12483_v24 = vsel %vm1036_vm3, %v12482_v29, 0 }
 0xa5f   : > { %v12554_v53 = vand.u32 4294901760, %v12483_v24 }
 0xa61   : > { %v12555_v34 = vsub.f32 %v12483_v24, %v12554_v53 }
 0xa63   : > { %v12556_v25 = vand.u32 4294901760, %v12555_v34 }
 0xa65   : > { %v12557_v32 = vsub.f32 %v12555_v34, %v12556_v25 }
 0xa67   : > { %v12558_v61 = vand.u32 4294901760, %v12557_v32 }
 0xa69   : > { %15203 = vmatmul.mubr.f32.vlgmr.msra.gmra.mrb[88].mxu0 %v12558_v61 }
 0xa6a   : > { %16702 = vmatpush3.bf16.msra.mxu0 %v21267_v50  ;;  %15213 = vmatprep.mubr.msk.f32.mxu0 %vm17153_vm4, %v22381_v14 }
 0xa6b   : > { %16703 = vmatprep.subr.bf16.mxu0 %v17152_v20 }
 0xa6e   : > { %16705 = vmatpush3.bf16.msra.mxu0 %v21275_v19 }
 0xa6f   : > { %16706 = vmatprep.subr.bf16.mxu0 %v17152_v20 }
 0xa71   : > { %15214 = vmatmul.mubr.f32.vlgmr.msra.gmra.mrb[88].mxu0 %v12554_v53 }
 0xa72   : > { %16708 = vmatpush3.bf16.msra.mxu0 %v21288_v54  ;;  %15224 = vmatprep.mubr.msk.f32.mxu0 %vm17153_vm4, %v22381_v14 }
 0xa73   : > { %16709 = vmatprep.subr.bf16.mxu0 %v17152_v20 }
 0xa76   : > { %16711 = vmatpush3.bf16.msra.mxu0 %v21297_v0 }
 0xa77   : > { %16712 = vmatprep.subr.bf16.mxu0 %v17152_v20 }
 0xa79   : > { %15225 = vmatmul.mubr.f32.vlgmr.msra.gmra.mrb[88].mxu0 %v12555_v34 }
 0xa7a   : > { %16714 = vmatpush3.bf16.msra.mxu0 %v21227_v44  ;;  %15235 = vmatprep.mubr.msk.f32.mxu0 %vm17153_vm4, %v22381_v14 }
 0xa7b   : > { %16715 = vmatprep.subr.bf16.mxu0 %v17152_v20 }
 0xa7e   : > { %16717 = vmatpush3.bf16.msra.mxu0 %v21244_v55 }
 0xa7f   : > { %16718 = vmatprep.subr.bf16.mxu0 %v17152_v20 }
 0xa81   : > { %15236 = vmatmul.mubr.f32.vlgmr.msra.gmra.mrb[88].mxu0 %v12556_v25 }
 0xa82   : > { %16720 = vmatpush3.bf16.msra.mxu0 %v21311_v56  ;;  %15246 = vmatprep.mubr.msk.f32.mxu0 %vm17153_vm4, %v22381_v14 }
 0xa83   : > { %16721 = vmatprep.subr.bf16.mxu0 %v17152_v20 }
 0xa86   : > { %16723 = vmatpush3.bf16.msra.mxu0 %v21324_v9 }
 0xa87   : > { %16724 = vmatprep.subr.bf16.mxu0 %v17152_v20 }
 0xa89   : > { %15247 = vmatmul.mubr.f32.vlgmr.msra.gmra.mrb[88].mxu0 %v12554_v53 }
 0xa8a   : > { %16726 = vmatpush3.bf16.msra.mxu0 %v21227_v44  ;;  %15257 = vmatprep.mubr.msk.f32.mxu0 %vm17153_vm4, %v22381_v14 }
 0xa8b   : > { %16727 = vmatprep.subr.bf16.mxu0 %v17152_v20 }
 0xa8e   : > { %16729 = vmatpush3.bf16.msra.mxu0 %v21244_v55 }
 0xa91   : > { %15258 = vmatmul.mubr.f32.vlgmr.msra.gmra.mrb[88].mxu0 %v12554_v53 }
 0xb64   : > { %v12966_v26 = vpop.f32.mrb[88].mxu0 }
 0xb65   : > { %v16778_v7 = vadd.f32 %v21400_v45, %v12966_v26  ;;  %v15259_v12 = vpop.f32.mrb[89].mxu0 }
 0xb67   : > { %v12971_v16 = vrot.slane %v16778_v7, 4 }
 0xb69   : > { %v12973_v30 = vadd.f32 %v12971_v16, %v21405_v36 }
 0xb6b   : > { %v12974_v62 = vmax.f32 %v12973_v30, 0.0 }
 0xb6d   : > { %13588 = vst.msk [vmem:[%s17270_s11 + $0x8] sm:$0x30] %vm10994_vm7, %v12974_v62  ;;  %v12978_v60 = vrot.slane %v12974_v62, 4 }
 0xb6f   : > { %v12979_v2 = vsel %vm1036_vm3, %v12978_v60, 0 }
 0xb70   : > { %v13050_v13 = vand.u32 4294901760, %v12979_v2 }
 0xb72   : > { %v13051_v39 = vsub.f32 %v12979_v2, %v13050_v13 }
 0xb74   : > { %v13052_v5 = vand.u32 4294901760, %v13051_v39 }
 0xb76   : > { %v13053_v10 = vsub.f32 %v13051_v39, %v13052_v5 }
 0xb78   : > { %v13054_v41 = vand.u32 4294901760, %v13053_v10 }
 0xb7a   : > { %15269 = vmatmul.mubr.f32.vlgmr.msra.gmra.mrb[80].mxu1 %v13054_v41 }
 0xb7b   : > { %16738 = vmatpush3.bf16.msra.mxu1 %v21267_v50  ;;  %15279 = vmatprep.mubr.msk.f32.mxu1 %vm17153_vm4, %v22381_v14 }
 0xb7c   : > { %16739 = vmatprep.subr.bf16.mxu1 %v17152_v20 }
 0xb7f   : > { %16741 = vmatpush3.bf16.msra.mxu1 %v21275_v19 }
 0xb80   : > { %16742 = vmatprep.subr.bf16.mxu1 %v17152_v20 }
 0xb82   : > { %15280 = vmatmul.mubr.f32.vlgmr.msra.gmra.mrb[80].mxu1 %v13050_v13 }
 0xb83   : > { %16744 = vmatpush3.bf16.msra.mxu1 %v21288_v54  ;;  %15290 = vmatprep.mubr.msk.f32.mxu1 %vm17153_vm4, %v22381_v14 }
 0xb84   : > { %16745 = vmatprep.subr.bf16.mxu1 %v17152_v20 }
 0xb87   : > { %16747 = vmatpush3.bf16.msra.mxu1 %v21297_v0 }
 0xb88   : > { %16748 = vmatprep.subr.bf16.mxu1 %v17152_v20 }
 0xb8a   : > { %15291 = vmatmul.mubr.f32.vlgmr.msra.gmra.mrb[80].mxu1 %v13051_v39 }
 0xb8b   : > { %16750 = vmatpush3.bf16.msra.mxu1 %v21227_v44  ;;  %15301 = vmatprep.mubr.msk.f32.mxu1 %vm17153_vm4, %v22381_v14 }
 0xb8c   : > { %16751 = vmatprep.subr.bf16.mxu1 %v17152_v20 }
 0xb8f   : > { %16753 = vmatpush3.bf16.msra.mxu1 %v21244_v55 }
 0xb90   : > { %16754 = vmatprep.subr.bf16.mxu1 %v17152_v20 }
 0xb92   : > { %15302 = vmatmul.mubr.f32.vlgmr.msra.gmra.mrb[80].mxu1 %v13052_v5 }
 0xb93   : > { %16756 = vmatpush3.bf16.msra.mxu1 %v21311_v56  ;;  %15312 = vmatprep.mubr.msk.f32.mxu1 %vm17153_vm4, %v22381_v14 }
 0xb94   : > { %16757 = vmatprep.subr.bf16.mxu1 %v17152_v20 }
 0xb97   : > { %16759 = vmatpush3.bf16.msra.mxu1 %v21324_v9 }
 0xb98   : > { %16760 = vmatprep.subr.bf16.mxu1 %v17152_v20 }
 0xb9a   : > { %15313 = vmatmul.mubr.f32.vlgmr.msra.gmra.mrb[80].mxu1 %v13050_v13 }
 0xb9b   : > { %16762 = vmatpush3.bf16.msra.mxu1 %v21227_v44  ;;  %15323 = vmatprep.mubr.msk.f32.mxu1 %vm17153_vm4, %v22381_v14 }
 0xb9c   : > { %16763 = vmatprep.subr.bf16.mxu1 %v17152_v20 }
 0xb9f   : > { %16765 = vmatpush3.bf16.msra.mxu1 %v21244_v55 }
 0xba2   : > { %15324 = vmatmul.mubr.f32.vlgmr.msra.gmra.mrb[80].mxu1 %v13050_v13 }
 0xc75   : > { %v13462_v50 = vpop.f32.mrb[80].mxu1 }
 0xc76   : > { %v16779_v19 = vadd.f32 %v21400_v45, %v13462_v50  ;;  %v15325_v54 = vpop.f32.mrb[81].mxu1 }
 0xc78   : > { %v13467_v0 = vrot.slane %v16779_v19, 2 }
 0xc7a   : > { %v13469_v44 = vadd.f32 %v13467_v0, %v21405_v36 }
 0xc7c   : > { %v13470_v20 = vmax.f32 %v13469_v44, 0.0 }
 0xc7e   : > { %13589 = vst.msk [vmem:[%s17270_s11 + $0x8] sm:$0xc0] %vm11491_vm8, %v13470_v20  ;;  %13473 = vst.msk [vmem:[#allocation2 - $0x6] sm:$0xc0] %vm11491_vm8, %v13470_v20 }
 0xc7f   : > { %13474 = vst.msk [vmem:[#allocation5 - $0x6] sm:$0xc0] %vm11491_vm8, %v13470_v20 }
 0xc80   : > { %17069 = shalt.err (!%p17066_p7)
}
 0xc81   : > { %s17070_s24 = scalar_lea.hbm %s21686_s25, 256  ;;  %s17074_s20 = scalar_lea.hbm %s21775_s9, 512 }
 0xc82   : > { %p17071_p8 = scmp.ne.s32.totalorder %s21686_s25, %s17070_s24  ;;  %p17075_p11 = scmp.lt.u32.totalorder %s21686_s25, %s21775_s9 }
 0xc83   : > { %p17076_p12 = scmp.lt.u32.totalorder %s17074_s20, %s17070_s24  ;;  %p17078_p0 = scmp.lt.u32.totalorder %s17070_s24, %s21686_s25 }
 0xc84   : > { %p17072_p9 = pnand %p17071_p8, %p17253_p5 }
 0xc85   : > { %p17077_p13 = por %p17076_p12, %p17075_p11 }
 0xc86   : > { %p17073_p10 = pneg %p17072_p9 }
 0xc87   : > { %p17079_p1 = por %p17078_p0, %p17077_p13 }
 0xc89   : > { %p17080_p3 = pnand %p17079_p1, %p17073_p10 }
 0xc8b   : > { %17083 = shalt.err (!%p17080_p3)
}
 0xc8c   : > { %s17156_s27 = smov 32   ;;  %s17157_s12 = smov 2  }
 0xc8d   : > { %17004 = dma.vmem_to_hbm [thread:$0]  (%p17253_p5), %s21688_s30, 256, %s21686_s25, %s21698_s26, %s17156_s27, %s17156_s27, %s17157_s12  }
 0xc8e   : > { %s17084_s11 = scalar_lea.vmem %s21690_s17, 32  ;;  %p17091_p9 = scmp.lt.s32.totalorder %s21690_s17, %s21690_s17 }
 0xc8f   : > { %p17085_p4 = scmp.ne.s32.totalorder %s21690_s17, %s17084_s11  ;;  %p17092_p10 = scmp.lt.s32.totalorder %s17084_s11, %s17084_s11 }
 0xc91   : > { %p17086_p7 = pnand %p17085_p4, %p237_p2  ;;  %p17093_p11 = por %p17092_p10, %p17091_p9 }
 0xc93   : > { %p17087_p8 = pneg %p17086_p7 }
 0xc95   : > { %p17094_p12 = pnand %p17093_p11, %p17087_p8 }
 0xc97   : > { %17097 = shalt.err (!%p17094_p12)
}
 0xc98   : > { %s17098_s20 = scalar_lea.hbm %s21776_s10, 32 }
 0xc99   : > { %p17099_p5 = scmp.ne.s32.totalorder %s21776_s10, %s17098_s20  ;;  %p17104_p1 = scmp.lt.u32.totalorder %s17098_s20, %s21776_s10 }
 0xc9b   : > { %p17100_p13 = pnand %p17099_p5, %p237_p2 }
 0xc9d   : > { %p17101_p0 = pneg %p17100_p13 }
 0xc9f   : > { %p17106_p3 = pnand %p17104_p1, %p17101_p0 }
 0xca1   : > { %17109 = shalt.err (!%p17106_p3)
}
 0xca2   : > { %17006 = dma.vmem_to_hbm [thread:$0]  (%p237_p2), %s21690_s17, 32, %s21776_s10, [#allocation6]  }
 0xca3   : > { %17127 = dma.done.wait (%p237_p2), [#allocation6], 32  }
 0xca4   : > { %17129 = vsyncadd (%p237_p2), [#allocation6], 4294967264 }
 0xca5 PF: > { %p17016_p4 = scmp.ge.s32.totalorder %s17148_s16, 2  ;;  %s13519_s27 = sand.u32 1, %s17136_s13  }
 0xca6   : > { %s13520_s12 = scalar_lea.sflag [#allocation4], %s13519_s27 }
 0xca7   : > { %p17011_p7 = pnand %p17016_p4, %p17257_p6 }
 0xca9   : > { %17131 = dma.done.wait (!%p17011_p7), %s13520_s12, 256  }
 0xcaa   : > { %17133 = vsyncadd (!%p17011_p7), %s13520_s12, 4294967040  ;;  %p22_p8 = scmp.ge.s32.totalorder %s17238_s18, 4   ;;  %s22402_s13 = smov %s17140_s14 }
 0xcab   : > { %s22403_s14 = smov %s17144_s15  ;;  %s22404_s15 = smov %s17249_s21 }
 0xcac   : > { %s22405_s16 = smov %s17238_s18  ;;  %24 = sbr.rel (!%p22_p8) target bundleno = 4 (0x4), region = 110 }
 0xcb3   :  { %13525 = vsyncpa [#allocation4], 1 }
 0xcb4   :  { %13527 = vsyncpa [#allocation4 + $0x1], 1 }
 0xcb5   :  { %13528 = vsyncpa [#allocation6], 1 }

</bundles_post_ra>
